<compile_context>
chip_gen: v7x
topology: tpu7x:2x2x1
jax: 0.10.0
libtpu: 0.0.40
codegen_flags: <defaults>
</compile_context>

<pallas_src>
import functools

import jax
import jax.numpy as jnp
import numpy as np
from jax.experimental import pallas as pl
from jax.experimental.pallas import tpu as pltpu


def _round_up(x, m):
    return (x + m - 1) // m * m


def _vmem_capacity_bytes():
    """Per-core VMEM capacity; conservative 64 MiB (v7x) fallback."""
    try:
        info = pltpu.get_tpu_info()
        cap = int(getattr(info, "vmem_capacity_bytes", 0))
        if cap > 0:
            return cap
    except Exception:
        pass
    return 64 * 1024 * 1024


def _pick_row_tile(ho, h, stride, cap_rows, prefer_split=False):
    """Pick the number of output rows per grid step.

    Largest divisor of Ho that fits the VMEM-derived cap; when batch==1 prefer
    two row blocks (keeps both v7x TensorCores busy); never fall back to the
    TH=1 perf cliff."""
    cap_rows = max(1, int(cap_rows))

    def feasible(d):
        # RB>1 needs the clamped halo window (L = (d-1)*stride + 3 rows) <= H
        return d == ho or h >= (d - 1) * stride + 3

    divisors = [d for d in range(1, ho + 1) if ho % d == 0 and feasible(d)]
    fitting = [d for d in divisors if d <= cap_rows]

    if prefer_split and ho % 2 == 0:
        half = ho // 2
        if half > 1 and half in fitting:
            return half
    if fitting and max(fitting) > 1:
        return max(fitting)
    larger = [d for d in divisors if d > 1]
    if larger:
        return min(larger)     # slightly over cap beats the TH=1 cliff
    return ho                  # Ho == 1


def _bottleneck_kernel(x_ref, w1_ref, b1_ref, w2_ref, b2_ref, w3_ref, b3_ref,
                       out_ref, pad_ref, *, stride, row_tile, n_row_blocks,
                       has_shortcut):
    _, H, W, Cin = x_ref.shape
    P = w1_ref.shape[1]
    Cout = w3_ref.shape[1]
    s = stride
    TH = row_tile                      # output rows per block
    RB = n_row_blocks
    Ho = (H - 1) // s + 1
    Wo = (W - 1) // s + 1
    L, Wpad, _ = pad_ref.shape         # L = (TH-1)*s + 3 padded-h1 rows needed
    trailing = (Ho - 1) * s + 2 - H    # 0/1 (static): is padded row H+1 read?

    f32, bf16 = jnp.float32, jnp.bfloat16
    rb = pl.program_id(1)
    g0 = rb * (TH * s)                 # first padded-h1 row needed by this block

    # ---------------- conv1 (1x1) + relu, only on the rows this block needs --
    if RB == 1:
        rows, t0 = H, 0
    else:
        rows = L
        t0 = jnp.clip(g0 - 1, 0, H - L)            # clamped halo start row
    xr = jnp.maximum(x_ref[0, pl.ds(t0, rows), :, :], 0.0)      # (rows, W, Cin)
    h1 = jnp.dot(xr.reshape(rows * W, Cin).astype(bf16), w1_ref[...],
                 preferred_element_type=f32) + b1_ref[...]
    h1 = jnp.maximum(h1, 0.0).astype(bf16).reshape(rows, W, P)

    # Zero-pad along W in-register so every stored pad row covers the full
    # (Wpad, P) slab: no stale scratch is ever read, no full-scratch clear,
    # and no masked border-column stores.
    zc_l = jnp.zeros((rows, 1, P), bf16)
    zc_r = jnp.zeros((rows, Wpad - W - 1, P), bf16)
    h1p = jnp.concatenate([zc_l, h1, zc_r], axis=1)             # (rows, Wpad, P)
    zrow = jnp.zeros((1, Wpad, P), bf16)

    if RB == 1:
        pad_ref[0:1] = zrow                        # top conv padding row
        pad_ref[1:H + 1] = h1p
        if trailing:
            pad_ref[H + 1:H + 2] = zrow            # bottom conv padding row
    else:
        @pl.when(rb == 0)
        def _():                                   # padded row 0 is the zero halo
            pad_ref[0:1] = zrow
            pad_ref[1:L] = h1p[0:L - 1]

        if trailing:
            @pl.when(rb == RB - 1)
            def _():                               # padded row H+1 is the zero halo
                pad_ref[0:L - 1] = h1p[1:L]
                pad_ref[L - 1:L] = zrow

            @pl.when(jnp.logical_and(rb != 0, rb != RB - 1))
            def _():
                pad_ref[...] = h1p
        else:
            @pl.when(rb != 0)
            def _():
                pad_ref[...] = h1p

    # -------- conv2: 3x3/stride s as nine accumulating K=P matmuls ----------
    acc2 = jnp.zeros((TH * Wo, P), f32)
    for kh in range(3):
        for kw in range(3):
            if s == 1:
                win = pad_ref[kh:kh + TH, kw:kw + Wo, :]
            else:
                win = pad_ref[pl.ds(kh, TH, stride=s), pl.ds(kw, Wo, stride=s), :]
            acc2 = acc2 + jnp.dot(win.reshape(TH * Wo, P), w2_ref[kh * 3 + kw],
                                  preferred_element_type=f32)
    h2 = jnp.maximum(acc2 + b2_ref[...], 0.0).astype(bf16)      # (TH*Wo, P)

    # -------- conv3 (1x1) fused with the conv shortcut (single matmul) ------
    if has_shortcut:
        if s == 1:
            xs = x_ref[0, pl.ds(g0, TH), :, :]
        else:
            xs = x_ref[0, pl.ds(g0, TH, stride=s), pl.ds(0, Wo, stride=s), :]
        rx = jnp.maximum(xs, 0.0).reshape(TH * Wo, Cin).astype(bf16)
        kmat = jnp.concatenate([h2, rx], axis=-1)               # (TH*Wo, P+Cin)
        y = jnp.dot(kmat, w3_ref[...], preferred_element_type=f32) + b3_ref[...]
    else:
        y = jnp.dot(h2, w3_ref[...], preferred_element_type=f32) + b3_ref[...]
        # identity shortcut uses the *pre-activation* input (stride==1, Cin==Cout)
        xid = x_ref[0, pl.ds(g0, TH), :, :]
        y = y + xid.reshape(TH * Wo, Cout).astype(f32)          # residual in f32

    out_ref[0] = y.reshape(TH, Wo, Cout).astype(out_ref.dtype)


def preact_bottleneck_nobn_nhwc(x_nhwc, params, *, stride=1, row_tile_cap=None,
                                out_dtype=None, single_buffer_weights=True):
    """PreActBottleneckNoBN forward; NHWC in / NHWC out (preferred when stacking)."""
    N, H, W, Cin = x_nhwc.shape
    P = int(params["w1"].shape[0])                 # torch layout (P, Cin, 1, 1)
    Cout = 4 * P
    has_shortcut = (stride != 1) or (Cin != Cout)
    Ho = (H - 1) // stride + 1
    Wo = (W - 1) // stride + 1
    if out_dtype is None:
        out_dtype = x_nhwc.dtype

    bf16, f32 = jnp.bfloat16, jnp.float32
    # repack torch-layout weights for channels-last matmuls; bf16 MXU operands
    w1 = jnp.asarray(params["w1"]).reshape(P, Cin).T.astype(bf16)          # (Cin, P)
    b1 = jnp.asarray(params["b1"]).reshape(1, P).astype(f32)
    w2 = jnp.asarray(params["w2"]).transpose(2, 3, 1, 0).reshape(9, P, P).astype(bf16)
    b2 = jnp.asarray(params["b2"]).reshape(1, P).astype(f32)
    w3 = jnp.asarray(params["w3"]).reshape(Cout, P).T.astype(bf16)         # (P, Cout)
    b3 = jnp.asarray(params["b3"]).reshape(1, Cout).astype(f32)
    if has_shortcut:
        # fuse conv3 + conv-shortcut: [h2 | relu(x)] @ [w3; wsc] + (b3 + bsc)
        wsc = jnp.asarray(params["wsc"]).reshape(Cout, Cin).T.astype(bf16)  # (Cin, Cout)
        w3 = jnp.concatenate([w3, wsc], axis=0)                             # (P+Cin, Cout)
        b3 = b3 + jnp.asarray(params["bsc"]).reshape(1, Cout).astype(f32)
    Kc = int(w3.shape[0])

    # ----------------- VMEM-driven row-tile selection ------------------------
    Wpad = _round_up(W + 2, 16)
    x_isz = np.dtype(x_nhwc.dtype).itemsize
    o_isz = np.dtype(out_dtype).itemsize
    wbuf = 1 if single_buffer_weights else 2
    weight_bytes = 2 * (Cin * P + 9 * P * P + Kc * Cout) + 4 * (2 * P + Cout)
    vmem_limit = int(min(max(_vmem_capacity_bytes() * 0.85, 32 * 1024 * 1024),
                         120 * 1024 * 1024))
    fixed = 2 * H * W * Cin * x_isz + wbuf * weight_bytes + 3 * Wpad * P * 2
    per_row = (2 * Wo * Cout * o_isz                       # output block (2 bufs)
               + stride * Wpad * P * 2                     # padded-h1 scratch
               + stride * W * P * 6                        # h1 transients (f32+bf16)
               + Wo * (P * 8 + (P + Cin) * 2 + Cout * 4))  # conv2 acc/h2, fused K, y
    cap_rows = max(1, (int(vmem_limit * 0.75) - fixed) // per_row)
    if row_tile_cap is not None:
        cap_rows = min(cap_rows, int(row_tile_cap))
    TH = _pick_row_tile(Ho, H, stride, cap_rows, prefer_split=(N == 1))
    RB = Ho // TH
    L = (TH - 1) * stride + 3

    kernel = functools.partial(_bottleneck_kernel, stride=stride, row_tile=TH,
                               n_row_blocks=RB, has_shortcut=has_shortcut)

    flops = 2 * N * (H * W * Cin * P + Ho * Wo * 9 * P * P + Ho * Wo * Kc * Cout)
    bytes_accessed = (N * H * W * Cin * x_isz + weight_bytes
                      + N * Ho * Wo * Cout * o_isz)
    cost = pl.CostEstimate(flops=int(flops), transcendentals=0,
                           bytes_accessed=int(bytes_accessed))

    def build_and_run(single_buffer):
        def const_spec(shape):
            idx = lambda n, r, _z=(0,) * len(shape): _z
            if single_buffer:   # constant index map -> one resident copy suffices
                return pl.BlockSpec(shape, idx, pipeline_mode=pl.Buffered(1))
            return pl.BlockSpec(shape, idx)

        in_specs = [
            pl.BlockSpec((1, H, W, Cin), lambda n, r: (n, 0, 0, 0)),
            const_spec((Cin, P)),
            const_spec((1, P)),
            const_spec((9, P, P)),
            const_spec((1, P)),
            const_spec((Kc, Cout)),
            const_spec((1, Cout)),
        ]
        return pl.pallas_call(
            kernel,
            out_shape=jax.ShapeDtypeStruct((N, Ho, Wo, Cout), out_dtype),
            grid=(N, RB),
            in_specs=in_specs,
            out_specs=pl.BlockSpec((1, TH, Wo, Cout), lambda n, r: (n, r, 0, 0)),
            scratch_shapes=[pltpu.VMEM((L, Wpad, P), jnp.bfloat16)],
            compiler_params=pltpu.CompilerParams(
                dimension_semantics=("parallel", "parallel"),
                vmem_limit_bytes=vmem_limit),
            cost_estimate=cost,
        )(x_nhwc, w1, b1, w2, b2, w3, b3)

    if single_buffer_weights:
        try:
            return build_and_run(True)
        except Exception:
            pass    # pipeline_mode / Buffered(1) unsupported -> default buffering
    return build_and_run(False)


def preact_bottleneck_nobn(x_nchw, params, *, stride=1, row_tile_cap=None,
                           out_dtype=None, single_buffer_weights=True):
    """Drop-in PyTorch-layout wrapper (NCHW in / NCHW out).

    For stacked blocks, keep activations NHWC (and bf16) and call
    preact_bottleneck_nobn_nhwc directly to avoid per-layer transposes."""
    x_nhwc = jnp.transpose(x_nchw, (0, 2, 3, 1))
    out = preact_bottleneck_nobn_nhwc(x_nhwc, params, stride=stride,
                                      row_tile_cap=row_tile_cap,
                                      out_dtype=out_dtype,
                                      single_buffer_weights=single_buffer_weights)
    return jnp.transpose(out, (0, 3, 1, 2))


# ------------------------- pure-JAX reference (f32) -------------------------
def _conv2d_ref(x, w, b, stride=1, padding=0):
    y = jax.lax.conv_general_dilated(
        x, w, window_strides=(stride, stride),
        padding=[(padding, padding), (padding, padding)],
        dimension_numbers=("NCHW", "OIHW", "NCHW"))
    return y + b.reshape(1, -1, 1, 1)


def _forward_ref(x, params, stride, has_shortcut):
    out = jax.nn.relu(x)
    shortcut = (_conv2d_ref(out, params["wsc"], params["bsc"], stride)
                if has_shortcut else x)
    out = _conv2d_ref(out, params["w1"], params["b1"])
    out = _conv2d_ref(jax.nn.relu(out), params["w2"], params["b2"], stride, 1)
    out = _conv2d_ref(jax.nn.relu(out), params["w3"], params["b3"])
    return out + shortcut


if __name__ == "__main__":
    def make_params(key, in_planes, planes, has_shortcut):
        cout = 4 * planes
        ks = jax.random.split(key, 8)
        p = {
            "w1": jax.random.normal(ks[0], (planes, in_planes, 1, 1), jnp.float32) * 0.1,
            "b1": jax.random.normal(ks[1], (planes,), jnp.float32) * 0.1,
            "w2": jax.random.normal(ks[2], (planes, planes, 3, 3), jnp.float32) * 0.1,
            "b2": jax.random.normal(ks[3], (planes,), jnp.float32) * 0.1,
            "w3": jax.random.normal(ks[4], (cout, planes, 1, 1), jnp.float32) * 0.1,
            "b3": jax.random.normal(ks[5], (cout,), jnp.float32) * 0.1,
        }
        if has_shortcut:
            p["wsc"] = jax.random.normal(ks[6], (cout, in_planes, 1, 1), jnp.float32) * 0.1
            p["bsc"] = jax.random.normal(ks[7], (cout,), jnp.float32) * 0.1
        return p

    key = jax.random.PRNGKey(0)
    cases = [
        # (N, Cin, H, W, planes, stride, row_tile_cap)
        (2, 4, 16, 16, 4, 1, None),    # conv shortcut, RB collapses to 1
        (1, 8, 24, 16, 4, 1, None),    # conv shortcut, N=1 -> 2 row blocks (first/last)
        (2, 16, 16, 16, 4, 1, None),   # identity shortcut, RB = 1
        (1, 8, 24, 16, 4, 1, 8),       # forced RB = 3 (exercises middle-block path)
    ]
    for idx, (N, Cin, H, W, planes, stride, cap) in enumerate(cases):
        key, kp, kx = jax.random.split(key, 3)
        cout = 4 * planes
        has_shortcut = (stride != 1) or (Cin != cout)
        params = make_params(kp, Cin, planes, has_shortcut)
        x = jax.random.normal(kx, (N, Cin, H, W), jnp.float32)

        out = jax.block_until_ready(
            preact_bottleneck_nobn(x, params, stride=stride, row_tile_cap=cap))
        ref = _forward_ref(x, params, stride, has_shortcut)
        ho = (H - 1) // stride + 1
        wo = (W - 1) // stride + 1
        assert out.shape == ref.shape == (N, cout, ho, wo), (out.shape, ref.shape)
        # bf16 matmul operands with f32 accumulation -> loosened tolerance
        np.testing.assert_allclose(np.asarray(out), np.asarray(ref),
                                   rtol=3e-2, atol=3e-2,
                                   err_msg=f"case {idx} mismatch")
    print("KERNEL_OK")
</pallas_src>

<mosaic_0001>
module attributes {stable_mosaic.version = 11 : i64} {
  func.func @_bottleneck_kernel(%arg0: i32, %arg1: i32, %arg2: memref<1x16x16x4xf32, #tpu.memory_space<vmem>>, %arg3: memref<4x4xbf16, #tpu.memory_space<vmem>>, %arg4: memref<1x4xf32, #tpu.memory_space<vmem>>, %arg5: memref<9x4x4xbf16, #tpu.memory_space<vmem>>, %arg6: memref<1x4xf32, #tpu.memory_space<vmem>>, %arg7: memref<8x16xbf16, #tpu.memory_space<vmem>>, %arg8: memref<1x16xf32, #tpu.memory_space<vmem>>, %arg9: memref<1x16x16x16xf32, #tpu.memory_space<vmem>>, %arg10: memref<18x32x4xbf16, #tpu.memory_space<vmem>>) attributes {dimension_semantics = [#tpu.dimension_semantics<parallel>, #tpu.dimension_semantics<parallel>], iteration_bounds = array<i64: 2, 1>, scalar_prefetch = 0 : i64, scratch_operands = 1 : i64, tpu.core_type = #tpu.core_type<tc>, window_params = [{transform_indices = @transform_0, window_bounds = array<i64: 1, 16, 16, 4>}, {pipeline_mode = #tpu.pipeline_mode<synchronous>, transform_indices = @transform_1, window_bounds = array<i64: 4, 4>}, {pipeline_mode = #tpu.pipeline_mode<synchronous>, transform_indices = @transform_2, window_bounds = array<i64: 1, 4>}, {pipeline_mode = #tpu.pipeline_mode<synchronous>, transform_indices = @transform_3, window_bounds = array<i64: 9, 4, 4>}, {pipeline_mode = #tpu.pipeline_mode<synchronous>, transform_indices = @transform_4, window_bounds = array<i64: 1, 4>}, {pipeline_mode = #tpu.pipeline_mode<synchronous>, transform_indices = @transform_5, window_bounds = array<i64: 8, 16>}, {pipeline_mode = #tpu.pipeline_mode<synchronous>, transform_indices = @transform_6, window_bounds = array<i64: 1, 16>}, {transform_indices = @transform_7, window_bounds = array<i64: 1, 16, 16, 16>}]} {
    %c16_i32 = arith.constant 16 : i32
    %0 = arith.muli %arg1, %c16_i32 : i32
    %c0 = arith.constant 0 : index
    %c0_0 = arith.constant 0 : index
    %c0_1 = arith.constant 0 : index
    %c0_2 = arith.constant 0 : index
    %1 = vector.load %arg2[%c0, %c0_0, %c0_1, %c0_2] : memref<1x16x16x4xf32, #tpu.memory_space<vmem>>, vector<1x16x16x4xf32>
    %2 = vector.shape_cast %1 : vector<1x16x16x4xf32> to vector<16x16x4xf32>
    %cst = arith.constant 0.000000e+00 : f32
    %3 = vector.broadcast %cst : f32 to vector<16x16x4xf32>
    %4 = arith.maximumf %2, %3 : vector<16x16x4xf32>
    %5 = vector.shape_cast %4 : vector<16x16x4xf32> to vector<256x4xf32>
    %6 = arith.truncf %5 : vector<256x4xf32> to vector<256x4xbf16>
    %c0_3 = arith.constant 0 : index
    %c0_4 = arith.constant 0 : index
    %7 = vector.load %arg3[%c0_3, %c0_4] : memref<4x4xbf16, #tpu.memory_space<vmem>>, vector<4x4xbf16>
    %cst_5 = arith.constant dense<0.000000e+00> : vector<256x4xf32>
    %8 = tpu.matmul %6, %7, %cst_5 {dimension_numbers = #tpu.dot_dimension_numbers<[1], [0], [0], [1], [0, 0, 1, 1], [], []>} : vector<256x4xbf16>, vector<4x4xbf16>, vector<256x4xf32> -> vector<256x4xf32>
    %c0_6 = arith.constant 0 : index
    %c0_7 = arith.constant 0 : index
    %9 = vector.load %arg4[%c0_6, %c0_7] : memref<1x4xf32, #tpu.memory_space<vmem>>, vector<1x4xf32>
    %10 = vector.broadcast %9 : vector<1x4xf32> to vector<256x4xf32>
    %11 = arith.addf %8, %10 : vector<256x4xf32>
    %cst_8 = arith.constant 0.000000e+00 : f32
    %12 = vector.broadcast %cst_8 : f32 to vector<256x4xf32>
    %13 = arith.maximumf %11, %12 : vector<256x4xf32>
    %14 = arith.truncf %13 : vector<256x4xf32> to vector<256x4xbf16>
    %15 = vector.shape_cast %14 : vector<256x4xbf16> to vector<16x16x4xbf16>
    %cst_9 = arith.constant 0.000000e+00 : bf16
    %16 = vector.broadcast %cst_9 : bf16 to vector<16x1x4xbf16>
    %cst_10 = arith.constant 0.000000e+00 : bf16
    %17 = vector.broadcast %cst_10 : bf16 to vector<16x15x4xbf16>
    %18 = tpu.concatenate %16, %15, %17 in 1 : vector<16x1x4xbf16>, vector<16x16x4xbf16>, vector<16x15x4xbf16> -> vector<16x32x4xbf16>
    %cst_11 = arith.constant 0.000000e+00 : bf16
    %19 = vector.broadcast %cst_11 : bf16 to vector<1x32x4xbf16>
    %c0_12 = arith.constant 0 : index
    %c0_13 = arith.constant 0 : index
    %c0_14 = arith.constant 0 : index
    %20 = vector.load %arg10[%c0_12, %c0_13, %c0_14] : memref<18x32x4xbf16, #tpu.memory_space<vmem>>, vector<1x32x4xbf16>
    tpu.vector_store %arg10[%c0_12, %c0_13, %c0_14], %19 {strides = array<i32>} : memref<18x32x4xbf16, #tpu.memory_space<vmem>>, vector<1x32x4xbf16>,
    %c1 = arith.constant 1 : index
    %c0_15 = arith.constant 0 : index
    %c0_16 = arith.constant 0 : index
    %21 = vector.load %arg10[%c1, %c0_15, %c0_16] : memref<18x32x4xbf16, #tpu.memory_space<vmem>>, vector<16x32x4xbf16>
    tpu.vector_store %arg10[%c1, %c0_15, %c0_16], %18 {strides = array<i32>} : memref<18x32x4xbf16, #tpu.memory_space<vmem>>, vector<16x32x4xbf16>,
    %c17 = arith.constant 17 : index
    %c0_17 = arith.constant 0 : index
    %c0_18 = arith.constant 0 : index
    %22 = vector.load %arg10[%c17, %c0_17, %c0_18] : memref<18x32x4xbf16, #tpu.memory_space<vmem>>, vector<1x32x4xbf16>
    tpu.vector_store %arg10[%c17, %c0_17, %c0_18], %19 {strides = array<i32>} : memref<18x32x4xbf16, #tpu.memory_space<vmem>>, vector<1x32x4xbf16>,
    %cst_19 = arith.constant 0.000000e+00 : f32
    %23 = vector.broadcast %cst_19 : f32 to vector<256x4xf32>
    %c0_20 = arith.constant 0 : index
    %c0_21 = arith.constant 0 : index
    %c0_22 = arith.constant 0 : index
    %24 = vector.load %arg10[%c0_20, %c0_21, %c0_22] : memref<18x32x4xbf16, #tpu.memory_space<vmem>>, vector<16x16x4xbf16>
    %25 = vector.shape_cast %24 : vector<16x16x4xbf16> to vector<256x4xbf16>
    %c0_23 = arith.constant 0 : index
    %c0_24 = arith.constant 0 : index
    %c0_25 = arith.constant 0 : index
    %26 = vector.load %arg5[%c0_23, %c0_24, %c0_25] : memref<9x4x4xbf16, #tpu.memory_space<vmem>>, vector<1x4x4xbf16>
    %27 = vector.shape_cast %26 : vector<1x4x4xbf16> to vector<4x4xbf16>
    %cst_26 = arith.constant dense<0.000000e+00> : vector<256x4xf32>
    %28 = tpu.matmul %25, %27, %cst_26 {dimension_numbers = #tpu.dot_dimension_numbers<[1], [0], [0], [1], [0, 0, 1, 1], [], []>} : vector<256x4xbf16>, vector<4x4xbf16>, vector<256x4xf32> -> vector<256x4xf32>
    %29 = arith.addf %23, %28 : vector<256x4xf32>
    %c0_27 = arith.constant 0 : index
    %c1_28 = arith.constant 1 : index
    %c0_29 = arith.constant 0 : index
    %30 = vector.load %arg10[%c0_27, %c1_28, %c0_29] : memref<18x32x4xbf16, #tpu.memory_space<vmem>>, vector<16x16x4xbf16>
    %31 = vector.shape_cast %30 : vector<16x16x4xbf16> to vector<256x4xbf16>
    %c1_30 = arith.constant 1 : index
    %c0_31 = arith.constant 0 : index
    %c0_32 = arith.constant 0 : index
    %32 = vector.load %arg5[%c1_30, %c0_31, %c0_32] : memref<9x4x4xbf16, #tpu.memory_space<vmem>>, vector<1x4x4xbf16>
    %33 = vector.shape_cast %32 : vector<1x4x4xbf16> to vector<4x4xbf16>
    %cst_33 = arith.constant dense<0.000000e+00> : vector<256x4xf32>
    %34 = tpu.matmul %31, %33, %cst_33 {dimension_numbers = #tpu.dot_dimension_numbers<[1], [0], [0], [1], [0, 0, 1, 1], [], []>} : vector<256x4xbf16>, vector<4x4xbf16>, vector<256x4xf32> -> vector<256x4xf32>
    %35 = arith.addf %29, %34 : vector<256x4xf32>
    %c0_34 = arith.constant 0 : index
    %c2 = arith.constant 2 : index
    %c0_35 = arith.constant 0 : index
    %36 = vector.load %arg10[%c0_34, %c2, %c0_35] : memref<18x32x4xbf16, #tpu.memory_space<vmem>>, vector<16x16x4xbf16>
    %37 = vector.shape_cast %36 : vector<16x16x4xbf16> to vector<256x4xbf16>
    %c2_36 = arith.constant 2 : index
    %c0_37 = arith.constant 0 : index
    %c0_38 = arith.constant 0 : index
    %38 = vector.load %arg5[%c2_36, %c0_37, %c0_38] : memref<9x4x4xbf16, #tpu.memory_space<vmem>>, vector<1x4x4xbf16>
    %39 = vector.shape_cast %38 : vector<1x4x4xbf16> to vector<4x4xbf16>
    %cst_39 = arith.constant dense<0.000000e+00> : vector<256x4xf32>
    %40 = tpu.matmul %37, %39, %cst_39 {dimension_numbers = #tpu.dot_dimension_numbers<[1], [0], [0], [1], [0, 0, 1, 1], [], []>} : vector<256x4xbf16>, vector<4x4xbf16>, vector<256x4xf32> -> vector<256x4xf32>
    %41 = arith.addf %35, %40 : vector<256x4xf32>
    %c1_40 = arith.constant 1 : index
    %c0_41 = arith.constant 0 : index
    %c0_42 = arith.constant 0 : index
    %42 = vector.load %arg10[%c1_40, %c0_41, %c0_42] : memref<18x32x4xbf16, #tpu.memory_space<vmem>>, vector<16x16x4xbf16>
    %43 = vector.shape_cast %42 : vector<16x16x4xbf16> to vector<256x4xbf16>
    %c3 = arith.constant 3 : index
    %c0_43 = arith.constant 0 : index
    %c0_44 = arith.constant 0 : index
    %44 = vector.load %arg5[%c3, %c0_43, %c0_44] : memref<9x4x4xbf16, #tpu.memory_space<vmem>>, vector<1x4x4xbf16>
    %45 = vector.shape_cast %44 : vector<1x4x4xbf16> to vector<4x4xbf16>
    %cst_45 = arith.constant dense<0.000000e+00> : vector<256x4xf32>
    %46 = tpu.matmul %43, %45, %cst_45 {dimension_numbers = #tpu.dot_dimension_numbers<[1], [0], [0], [1], [0, 0, 1, 1], [], []>} : vector<256x4xbf16>, vector<4x4xbf16>, vector<256x4xf32> -> vector<256x4xf32>
    %47 = arith.addf %41, %46 : vector<256x4xf32>
    %c1_46 = arith.constant 1 : index
    %c1_47 = arith.constant 1 : index
    %c0_48 = arith.constant 0 : index
    %48 = vector.load %arg10[%c1_46, %c1_47, %c0_48] : memref<18x32x4xbf16, #tpu.memory_space<vmem>>, vector<16x16x4xbf16>
    %49 = vector.shape_cast %48 : vector<16x16x4xbf16> to vector<256x4xbf16>
    %c4 = arith.constant 4 : index
    %c0_49 = arith.constant 0 : index
    %c0_50 = arith.constant 0 : index
    %50 = vector.load %arg5[%c4, %c0_49, %c0_50] : memref<9x4x4xbf16, #tpu.memory_space<vmem>>, vector<1x4x4xbf16>
    %51 = vector.shape_cast %50 : vector<1x4x4xbf16> to vector<4x4xbf16>
    %cst_51 = arith.constant dense<0.000000e+00> : vector<256x4xf32>
    %52 = tpu.matmul %49, %51, %cst_51 {dimension_numbers = #tpu.dot_dimension_numbers<[1], [0], [0], [1], [0, 0, 1, 1], [], []>} : vector<256x4xbf16>, vector<4x4xbf16>, vector<256x4xf32> -> vector<256x4xf32>
    %53 = arith.addf %47, %52 : vector<256x4xf32>
    %c1_52 = arith.constant 1 : index
    %c2_53 = arith.constant 2 : index
    %c0_54 = arith.constant 0 : index
    %54 = vector.load %arg10[%c1_52, %c2_53, %c0_54] : memref<18x32x4xbf16, #tpu.memory_space<vmem>>, vector<16x16x4xbf16>
    %55 = vector.shape_cast %54 : vector<16x16x4xbf16> to vector<256x4xbf16>
    %c5 = arith.constant 5 : index
    %c0_55 = arith.constant 0 : index
    %c0_56 = arith.constant 0 : index
    %56 = vector.load %arg5[%c5, %c0_55, %c0_56] : memref<9x4x4xbf16, #tpu.memory_space<vmem>>, vector<1x4x4xbf16>
    %57 = vector.shape_cast %56 : vector<1x4x4xbf16> to vector<4x4xbf16>
    %cst_57 = arith.constant dense<0.000000e+00> : vector<256x4xf32>
    %58 = tpu.matmul %55, %57, %cst_57 {dimension_numbers = #tpu.dot_dimension_numbers<[1], [0], [0], [1], [0, 0, 1, 1], [], []>} : vector<256x4xbf16>, vector<4x4xbf16>, vector<256x4xf32> -> vector<256x4xf32>
    %59 = arith.addf %53, %58 : vector<256x4xf32>
    %c2_58 = arith.constant 2 : index
    %c0_59 = arith.constant 0 : index
    %c0_60 = arith.constant 0 : index
    %60 = vector.load %arg10[%c2_58, %c0_59, %c0_60] : memref<18x32x4xbf16, #tpu.memory_space<vmem>>, vector<16x16x4xbf16>
    %61 = vector.shape_cast %60 : vector<16x16x4xbf16> to vector<256x4xbf16>
    %c6 = arith.constant 6 : index
    %c0_61 = arith.constant 0 : index
    %c0_62 = arith.constant 0 : index
    %62 = vector.load %arg5[%c6, %c0_61, %c0_62] : memref<9x4x4xbf16, #tpu.memory_space<vmem>>, vector<1x4x4xbf16>
    %63 = vector.shape_cast %62 : vector<1x4x4xbf16> to vector<4x4xbf16>
    %cst_63 = arith.constant dense<0.000000e+00> : vector<256x4xf32>
    %64 = tpu.matmul %61, %63, %cst_63 {dimension_numbers = #tpu.dot_dimension_numbers<[1], [0], [0], [1], [0, 0, 1, 1], [], []>} : vector<256x4xbf16>, vector<4x4xbf16>, vector<256x4xf32> -> vector<256x4xf32>
    %65 = arith.addf %59, %64 : vector<256x4xf32>
    %c2_64 = arith.constant 2 : index
    %c1_65 = arith.constant 1 : index
    %c0_66 = arith.constant 0 : index
    %66 = vector.load %arg10[%c2_64, %c1_65, %c0_66] : memref<18x32x4xbf16, #tpu.memory_space<vmem>>, vector<16x16x4xbf16>
    %67 = vector.shape_cast %66 : vector<16x16x4xbf16> to vector<256x4xbf16>
    %c7 = arith.constant 7 : index
    %c0_67 = arith.constant 0 : index
    %c0_68 = arith.constant 0 : index
    %68 = vector.load %arg5[%c7, %c0_67, %c0_68] : memref<9x4x4xbf16, #tpu.memory_space<vmem>>, vector<1x4x4xbf16>
    %69 = vector.shape_cast %68 : vector<1x4x4xbf16> to vector<4x4xbf16>
    %cst_69 = arith.constant dense<0.000000e+00> : vector<256x4xf32>
    %70 = tpu.matmul %67, %69, %cst_69 {dimension_numbers = #tpu.dot_dimension_numbers<[1], [0], [0], [1], [0, 0, 1, 1], [], []>} : vector<256x4xbf16>, vector<4x4xbf16>, vector<256x4xf32> -> vector<256x4xf32>
    %71 = arith.addf %65, %70 : vector<256x4xf32>
    %c2_70 = arith.constant 2 : index
    %c2_71 = arith.constant 2 : index
    %c0_72 = arith.constant 0 : index
    %72 = vector.load %arg10[%c2_70, %c2_71, %c0_72] : memref<18x32x4xbf16, #tpu.memory_space<vmem>>, vector<16x16x4xbf16>
    %73 = vector.shape_cast %72 : vector<16x16x4xbf16> to vector<256x4xbf16>
    %c8 = arith.constant 8 : index
    %c0_73 = arith.constant 0 : index
    %c0_74 = arith.constant 0 : index
    %74 = vector.load %arg5[%c8, %c0_73, %c0_74] : memref<9x4x4xbf16, #tpu.memory_space<vmem>>, vector<1x4x4xbf16>
    %75 = vector.shape_cast %74 : vector<1x4x4xbf16> to vector<4x4xbf16>
    %cst_75 = arith.constant dense<0.000000e+00> : vector<256x4xf32>
    %76 = tpu.matmul %73, %75, %cst_75 {dimension_numbers = #tpu.dot_dimension_numbers<[1], [0], [0], [1], [0, 0, 1, 1], [], []>} : vector<256x4xbf16>, vector<4x4xbf16>, vector<256x4xf32> -> vector<256x4xf32>
    %77 = arith.addf %71, %76 : vector<256x4xf32>
    %c0_76 = arith.constant 0 : index
    %c0_77 = arith.constant 0 : index
    %78 = vector.load %arg6[%c0_76, %c0_77] : memref<1x4xf32, #tpu.memory_space<vmem>>, vector<1x4xf32>
    %79 = vector.broadcast %78 : vector<1x4xf32> to vector<256x4xf32>
    %80 = arith.addf %77, %79 : vector<256x4xf32>
    %cst_78 = arith.constant 0.000000e+00 : f32
    %81 = vector.broadcast %cst_78 : f32 to vector<256x4xf32>
    %82 = arith.maximumf %80, %81 : vector<256x4xf32>
    %83 = arith.truncf %82 : vector<256x4xf32> to vector<256x4xbf16>
    %c0_79 = arith.constant 0 : index
    %84 = arith.index_cast %0 : i32 to index
    %c0_80 = arith.constant 0 : index
    %c0_81 = arith.constant 0 : index
    %85 = vector.load %arg2[%c0_79, %84, %c0_80, %c0_81] : memref<1x16x16x4xf32, #tpu.memory_space<vmem>>, vector<1x16x16x4xf32>
    %86 = vector.shape_cast %85 : vector<1x16x16x4xf32> to vector<16x16x4xf32>
    %cst_82 = arith.constant 0.000000e+00 : f32
    %87 = vector.broadcast %cst_82 : f32 to vector<16x16x4xf32>
    %88 = arith.maximumf %86, %87 : vector<16x16x4xf32>
    %89 = vector.shape_cast %88 : vector<16x16x4xf32> to vector<256x4xf32>
    %90 = arith.truncf %89 : vector<256x4xf32> to vector<256x4xbf16>
    %91 = tpu.concatenate %83, %90 in 1 : vector<256x4xbf16>, vector<256x4xbf16> -> vector<256x8xbf16>
    %c0_83 = arith.constant 0 : index
    %c0_84 = arith.constant 0 : index
    %92 = vector.load %arg7[%c0_83, %c0_84] : memref<8x16xbf16, #tpu.memory_space<vmem>>, vector<8x16xbf16>
    %cst_85 = arith.constant dense<0.000000e+00> : vector<256x16xf32>
    %93 = tpu.matmul %91, %92, %cst_85 {dimension_numbers = #tpu.dot_dimension_numbers<[1], [0], [0], [1], [0, 0, 1, 1], [], []>} : vector<256x8xbf16>, vector<8x16xbf16>, vector<256x16xf32> -> vector<256x16xf32>
    %c0_86 = arith.constant 0 : index
    %c0_87 = arith.constant 0 : index
    %94 = vector.load %arg8[%c0_86, %c0_87] : memref<1x16xf32, #tpu.memory_space<vmem>>, vector<1x16xf32>
    %95 = vector.broadcast %94 : vector<1x16xf32> to vector<256x16xf32>
    %96 = arith.addf %93, %95 : vector<256x16xf32>
    %97 = vector.shape_cast %96 : vector<256x16xf32> to vector<16x16x16xf32>
    %c0_88 = arith.constant 0 : index
    %c0_89 = arith.constant 0 : index
    %c0_90 = arith.constant 0 : index
    %c0_91 = arith.constant 0 : index
    %98 = vector.load %arg9[%c0_88, %c0_89, %c0_90, %c0_91] : memref<1x16x16x16xf32, #tpu.memory_space<vmem>>, vector<1x16x16x16xf32>
    %99 = vector.shape_cast %98 : vector<1x16x16x16xf32> to vector<16x16x16xf32>
    %100 = vector.shape_cast %97 : vector<16x16x16xf32> to vector<1x16x16x16xf32>
    tpu.vector_store %arg9[%c0_88, %c0_89, %c0_90, %c0_91], %100 {strides = array<i32>} : memref<1x16x16x16xf32, #tpu.memory_space<vmem>>, vector<1x16x16x16xf32>,
    return
  }
  func.func @transform_0(%arg0: i32, %arg1: i32) -> (i32, i32, i32, i32) {
    %c0_i32 = arith.constant 0 : i32
    %c0_i32_0 = arith.constant 0 : i32
    %c0_i32_1 = arith.constant 0 : i32
    %c0_i32_2 = arith.constant 0 : i32
    return %arg0, %c0_i32, %c0_i32_0, %c0_i32_1 : i32, i32, i32, i32
  }
  func.func @transform_1(%arg0: i32, %arg1: i32) -> (i32, i32) {
    %c0_i32 = arith.constant 0 : i32
    %c0_i32_0 = arith.constant 0 : i32
    %c0_i32_1 = arith.constant 0 : i32
    return %c0_i32, %c0_i32_0 : i32, i32
  }
  func.func @transform_2(%arg0: i32, %arg1: i32) -> (i32, i32) {
    %c0_i32 = arith.constant 0 : i32
    %c0_i32_0 = arith.constant 0 : i32
    %c0_i32_1 = arith.constant 0 : i32
    return %c0_i32, %c0_i32_0 : i32, i32
  }
  func.func @transform_3(%arg0: i32, %arg1: i32) -> (i32, i32, i32) {
    %c0_i32 = arith.constant 0 : i32
    %c0_i32_0 = arith.constant 0 : i32
    %c0_i32_1 = arith.constant 0 : i32
    %c0_i32_2 = arith.constant 0 : i32
    return %c0_i32, %c0_i32_0, %c0_i32_1 : i32, i32, i32
  }
  func.func @transform_4(%arg0: i32, %arg1: i32) -> (i32, i32) {
    %c0_i32 = arith.constant 0 : i32
    %c0_i32_0 = arith.constant 0 : i32
    %c0_i32_1 = arith.constant 0 : i32
    return %c0_i32, %c0_i32_0 : i32, i32
  }
  func.func @transform_5(%arg0: i32, %arg1: i32) -> (i32, i32) {
    %c0_i32 = arith.constant 0 : i32
    %c0_i32_0 = arith.constant 0 : i32
    %c0_i32_1 = arith.constant 0 : i32
    return %c0_i32, %c0_i32_0 : i32, i32
  }
  func.func @transform_6(%arg0: i32, %arg1: i32) -> (i32, i32) {
    %c0_i32 = arith.constant 0 : i32
    %c0_i32_0 = arith.constant 0 : i32
    %c0_i32_1 = arith.constant 0 : i32
    return %c0_i32, %c0_i32_0 : i32, i32
  }
  func.func @transform_7(%arg0: i32, %arg1: i32) -> (i32, i32, i32, i32) {
    %c0_i32 = arith.constant 0 : i32
    %c0_i32_0 = arith.constant 0 : i32
    %c0_i32_1 = arith.constant 0 : i32
    return %arg0, %arg1, %c0_i32, %c0_i32_0 : i32, i32, i32, i32
  }
}

module attributes {stable_mosaic.version = 11 : i64} {
  func.func @_bottleneck_kernel(%arg0: i32, %arg1: i32, %arg2: memref<1x16x16x4xf32, #tpu.memory_space<vmem>>, %arg3: memref<4x4xbf16, #tpu.memory_space<vmem>>, %arg4: memref<1x4xf32, #tpu.memory_space<vmem>>, %arg5: memref<9x4x4xbf16, #tpu.memory_space<vmem>>, %arg6: memref<1x4xf32, #tpu.memory_space<vmem>>, %arg7: memref<8x16xbf16, #tpu.memory_space<vmem>>, %arg8: memref<1x16xf32, #tpu.memory_space<vmem>>, %arg9: memref<1x16x16x16xf32, #tpu.memory_space<vmem>>, %arg10: memref<18x32x4xbf16, #tpu.memory_space<vmem>>) attributes {dimension_semantics = [#tpu.dimension_semantics<parallel>, #tpu.dimension_semantics<parallel>], iteration_bounds = array<i64: 2, 1>, scalar_prefetch = 0 : i64, scratch_operands = 1 : i64, tpu.core_type = #tpu.core_type<tc>, window_params = [{transform_indices = @transform_0, window_bounds = array<i64: 1, 16, 16, 4>}, {pipeline_mode = #tpu.pipeline_mode<synchronous>, transform_indices = @transform_1, window_bounds = array<i64: 4, 4>}, {pipeline_mode = #tpu.pipeline_mode<synchronous>, transform_indices = @transform_2, window_bounds = array<i64: 1, 4>}, {pipeline_mode = #tpu.pipeline_mode<synchronous>, transform_indices = @transform_3, window_bounds = array<i64: 9, 4, 4>}, {pipeline_mode = #tpu.pipeline_mode<synchronous>, transform_indices = @transform_4, window_bounds = array<i64: 1, 4>}, {pipeline_mode = #tpu.pipeline_mode<synchronous>, transform_indices = @transform_5, window_bounds = array<i64: 8, 16>}, {pipeline_mode = #tpu.pipeline_mode<synchronous>, transform_indices = @transform_6, window_bounds = array<i64: 1, 16>}, {transform_indices = @transform_7, window_bounds = array<i64: 1, 16, 16, 16>}]} {
    %c16_i32 = arith.constant 16 : i32
    %0 = arith.muli %arg1, %c16_i32 : i32
    %c0 = arith.constant 0 : index
    %c0_0 = arith.constant 0 : index
    %c0_1 = arith.constant 0 : index
    %c0_2 = arith.constant 0 : index
    %1 = vector.load %arg2[%c0, %c0_0, %c0_1, %c0_2] : memref<1x16x16x4xf32, #tpu.memory_space<vmem>>, vector<1x16x16x4xf32>
    %2 = vector.shape_cast %1 : vector<1x16x16x4xf32> to vector<16x16x4xf32>
    %cst = arith.constant 0.000000e+00 : f32
    %3 = vector.broadcast %cst : f32 to vector<16x16x4xf32>
    %4 = arith.maximumf %2, %3 : vector<16x16x4xf32>
    %5 = vector.shape_cast %4 : vector<16x16x4xf32> to vector<256x4xf32>
    %6 = arith.truncf %5 : vector<256x4xf32> to vector<256x4xbf16>
    %c0_3 = arith.constant 0 : index
    %c0_4 = arith.constant 0 : index
    %7 = vector.load %arg3[%c0_3, %c0_4] : memref<4x4xbf16, #tpu.memory_space<vmem>>, vector<4x4xbf16>
    %cst_5 = arith.constant dense<0.000000e+00> : vector<256x4xf32>
    %8 = tpu.matmul %6, %7, %cst_5 {dimension_numbers = #tpu.dot_dimension_numbers<[1], [0], [0], [1], [0, 0, 1, 1], [], []>} : vector<256x4xbf16>, vector<4x4xbf16>, vector<256x4xf32> -> vector<256x4xf32>
    %c0_6 = arith.constant 0 : index
    %c0_7 = arith.constant 0 : index
    %9 = vector.load %arg4[%c0_6, %c0_7] : memref<1x4xf32, #tpu.memory_space<vmem>>, vector<1x4xf32>
    %10 = vector.broadcast %9 : vector<1x4xf32> to vector<256x4xf32>
    %11 = arith.addf %8, %10 : vector<256x4xf32>
    %cst_8 = arith.constant 0.000000e+00 : f32
    %12 = vector.broadcast %cst_8 : f32 to vector<256x4xf32>
    %13 = arith.maximumf %11, %12 : vector<256x4xf32>
    %14 = arith.truncf %13 : vector<256x4xf32> to vector<256x4xbf16>
    %15 = vector.shape_cast %14 : vector<256x4xbf16> to vector<16x16x4xbf16>
    %cst_9 = arith.constant 0.000000e+00 : bf16
    %16 = vector.broadcast %cst_9 : bf16 to vector<16x1x4xbf16>
    %cst_10 = arith.constant 0.000000e+00 : bf16
    %17 = vector.broadcast %cst_10 : bf16 to vector<16x15x4xbf16>
    %18 = tpu.concatenate %16, %15, %17 in 1 : vector<16x1x4xbf16>, vector<16x16x4xbf16>, vector<16x15x4xbf16> -> vector<16x32x4xbf16>
    %cst_11 = arith.constant 0.000000e+00 : bf16
    %19 = vector.broadcast %cst_11 : bf16 to vector<1x32x4xbf16>
    %c0_12 = arith.constant 0 : index
    %c0_13 = arith.constant 0 : index
    %c0_14 = arith.constant 0 : index
    %20 = vector.load %arg10[%c0_12, %c0_13, %c0_14] : memref<18x32x4xbf16, #tpu.memory_space<vmem>>, vector<1x32x4xbf16>
    tpu.vector_store %arg10[%c0_12, %c0_13, %c0_14], %19 {strides = array<i32>} : memref<18x32x4xbf16, #tpu.memory_space<vmem>>, vector<1x32x4xbf16>,
    %c1 = arith.constant 1 : index
    %c0_15 = arith.constant 0 : index
    %c0_16 = arith.constant 0 : index
    %21 = vector.load %arg10[%c1, %c0_15, %c0_16] : memref<18x32x4xbf16, #tpu.memory_space<vmem>>, vector<16x32x4xbf16>
    tpu.vector_store %arg10[%c1, %c0_15, %c0_16], %18 {strides = array<i32>} : memref<18x32x4xbf16, #tpu.memory_space<vmem>>, vector<16x32x4xbf16>,
    %c17 = arith.constant 17 : index
    %c0_17 = arith.constant 0 : index
    %c0_18 = arith.constant 0 : index
    %22 = vector.load %arg10[%c17, %c0_17, %c0_18] : memref<18x32x4xbf16, #tpu.memory_space<vmem>>, vector<1x32x4xbf16>
    tpu.vector_store %arg10[%c17, %c0_17, %c0_18], %19 {strides = array<i32>} : memref<18x32x4xbf16, #tpu.memory_space<vmem>>, vector<1x32x4xbf16>,
    %cst_19 = arith.constant 0.000000e+00 : f32
    %23 = vector.broadcast %cst_19 : f32 to vector<256x4xf32>
    %c0_20 = arith.constant 0 : index
    %c0_21 = arith.constant 0 : index
    %c0_22 = arith.constant 0 : index
    %24 = vector.load %arg10[%c0_20, %c0_21, %c0_22] : memref<18x32x4xbf16, #tpu.memory_space<vmem>>, vector<16x16x4xbf16>
    %25 = vector.shape_cast %24 : vector<16x16x4xbf16> to vector<256x4xbf16>
    %c0_23 = arith.constant 0 : index
    %c0_24 = arith.constant 0 : index
    %c0_25 = arith.constant 0 : index
    %26 = vector.load %arg5[%c0_23, %c0_24, %c0_25] : memref<9x4x4xbf16, #tpu.memory_space<vmem>>, vector<1x4x4xbf16>
    %27 = vector.shape_cast %26 : vector<1x4x4xbf16> to vector<4x4xbf16>
    %cst_26 = arith.constant dense<0.000000e+00> : vector<256x4xf32>
    %28 = tpu.matmul %25, %27, %cst_26 {dimension_numbers = #tpu.dot_dimension_numbers<[1], [0], [0], [1], [0, 0, 1, 1], [], []>} : vector<256x4xbf16>, vector<4x4xbf16>, vector<256x4xf32> -> vector<256x4xf32>
    %29 = arith.addf %23, %28 : vector<256x4xf32>
    %c0_27 = arith.constant 0 : index
    %c1_28 = arith.constant 1 : index
    %c0_29 = arith.constant 0 : index
    %30 = vector.load %arg10[%c0_27, %c1_28, %c0_29] : memref<18x32x4xbf16, #tpu.memory_space<vmem>>, vector<16x16x4xbf16>
    %31 = vector.shape_cast %30 : vector<16x16x4xbf16> to vector<256x4xbf16>
    %c1_30 = arith.constant 1 : index
    %c0_31 = arith.constant 0 : index
    %c0_32 = arith.constant 0 : index
    %32 = vector.load %arg5[%c1_30, %c0_31, %c0_32] : memref<9x4x4xbf16, #tpu.memory_space<vmem>>, vector<1x4x4xbf16>
    %33 = vector.shape_cast %32 : vector<1x4x4xbf16> to vector<4x4xbf16>
    %cst_33 = arith.constant dense<0.000000e+00> : vector<256x4xf32>
    %34 = tpu.matmul %31, %33, %cst_33 {dimension_numbers = #tpu.dot_dimension_numbers<[1], [0], [0], [1], [0, 0, 1, 1], [], []>} : vector<256x4xbf16>, vector<4x4xbf16>, vector<256x4xf32> -> vector<256x4xf32>
    %35 = arith.addf %29, %34 : vector<256x4xf32>
    %c0_34 = arith.constant 0 : index
    %c2 = arith.constant 2 : index
    %c0_35 = arith.constant 0 : index
    %36 = vector.load %arg10[%c0_34, %c2, %c0_35] : memref<18x32x4xbf16, #tpu.memory_space<vmem>>, vector<16x16x4xbf16>
    %37 = vector.shape_cast %36 : vector<16x16x4xbf16> to vector<256x4xbf16>
    %c2_36 = arith.constant 2 : index
    %c0_37 = arith.constant 0 : index
    %c0_38 = arith.constant 0 : index
    %38 = vector.load %arg5[%c2_36, %c0_37, %c0_38] : memref<9x4x4xbf16, #tpu.memory_space<vmem>>, vector<1x4x4xbf16>
    %39 = vector.shape_cast %38 : vector<1x4x4xbf16> to vector<4x4xbf16>
    %cst_39 = arith.constant dense<0.000000e+00> : vector<256x4xf32>
    %40 = tpu.matmul %37, %39, %cst_39 {dimension_numbers = #tpu.dot_dimension_numbers<[1], [0], [0], [1], [0, 0, 1, 1], [], []>} : vector<256x4xbf16>, vector<4x4xbf16>, vector<256x4xf32> -> vector<256x4xf32>
    %41 = arith.addf %35, %40 : vector<256x4xf32>
    %c1_40 = arith.constant 1 : index
    %c0_41 = arith.constant 0 : index
    %c0_42 = arith.constant 0 : index
    %42 = vector.load %arg10[%c1_40, %c0_41, %c0_42] : memref<18x32x4xbf16, #tpu.memory_space<vmem>>, vector<16x16x4xbf16>
    %43 = vector.shape_cast %42 : vector<16x16x4xbf16> to vector<256x4xbf16>
    %c3 = arith.constant 3 : index
    %c0_43 = arith.constant 0 : index
    %c0_44 = arith.constant 0 : index
    %44 = vector.load %arg5[%c3, %c0_43, %c0_44] : memref<9x4x4xbf16, #tpu.memory_space<vmem>>, vector<1x4x4xbf16>
    %45 = vector.shape_cast %44 : vector<1x4x4xbf16> to vector<4x4xbf16>
    %cst_45 = arith.constant dense<0.000000e+00> : vector<256x4xf32>
    %46 = tpu.matmul %43, %45, %cst_45 {dimension_numbers = #tpu.dot_dimension_numbers<[1], [0], [0], [1], [0, 0, 1, 1], [], []>} : vector<256x4xbf16>, vector<4x4xbf16>, vector<256x4xf32> -> vector<256x4xf32>
    %47 = arith.addf %41, %46 : vector<256x4xf32>
    %c1_46 = arith.constant 1 : index
    %c1_47 = arith.constant 1 : index
    %c0_48 = arith.constant 0 : index
    %48 = vector.load %arg10[%c1_46, %c1_47, %c0_48] : memref<18x32x4xbf16, #tpu.memory_space<vmem>>, vector<16x16x4xbf16>
    %49 = vector.shape_cast %48 : vector<16x16x4xbf16> to vector<256x4xbf16>
    %c4 = arith.constant 4 : index
    %c0_49 = arith.constant 0 : index
    %c0_50 = arith.constant 0 : index
    %50 = vector.load %arg5[%c4, %c0_49, %c0_50] : memref<9x4x4xbf16, #tpu.memory_space<vmem>>, vector<1x4x4xbf16>
    %51 = vector.shape_cast %50 : vector<1x4x4xbf16> to vector<4x4xbf16>
    %cst_51 = arith.constant dense<0.000000e+00> : vector<256x4xf32>
    %52 = tpu.matmul %49, %51, %cst_51 {dimension_numbers = #tpu.dot_dimension_numbers<[1], [0], [0], [1], [0, 0, 1, 1], [], []>} : vector<256x4xbf16>, vector<4x4xbf16>, vector<256x4xf32> -> vector<256x4xf32>
    %53 = arith.addf %47, %52 : vector<256x4xf32>
    %c1_52 = arith.constant 1 : index
    %c2_53 = arith.constant 2 : index
    %c0_54 = arith.constant 0 : index
    %54 = vector.load %arg10[%c1_52, %c2_53, %c0_54] : memref<18x32x4xbf16, #tpu.memory_space<vmem>>, vector<16x16x4xbf16>
    %55 = vector.shape_cast %54 : vector<16x16x4xbf16> to vector<256x4xbf16>
    %c5 = arith.constant 5 : index
    %c0_55 = arith.constant 0 : index
    %c0_56 = arith.constant 0 : index
    %56 = vector.load %arg5[%c5, %c0_55, %c0_56] : memref<9x4x4xbf16, #tpu.memory_space<vmem>>, vector<1x4x4xbf16>
    %57 = vector.shape_cast %56 : vector<1x4x4xbf16> to vector<4x4xbf16>
    %cst_57 = arith.constant dense<0.000000e+00> : vector<256x4xf32>
    %58 = tpu.matmul %55, %57, %cst_57 {dimension_numbers = #tpu.dot_dimension_numbers<[1], [0], [0], [1], [0, 0, 1, 1], [], []>} : vector<256x4xbf16>, vector<4x4xbf16>, vector<256x4xf32> -> vector<256x4xf32>
    %59 = arith.addf %53, %58 : vector<256x4xf32>
    %c2_58 = arith.constant 2 : index
    %c0_59 = arith.constant 0 : index
    %c0_60 = arith.constant 0 : index
    %60 = vector.load %arg10[%c2_58, %c0_59, %c0_60] : memref<18x32x4xbf16, #tpu.memory_space<vmem>>, vector<16x16x4xbf16>
    %61 = vector.shape_cast %60 : vector<16x16x4xbf16> to vector<256x4xbf16>
    %c6 = arith.constant 6 : index
    %c0_61 = arith.constant 0 : index
    %c0_62 = arith.constant 0 : index
    %62 = vector.load %arg5[%c6, %c0_61, %c0_62] : memref<9x4x4xbf16, #tpu.memory_space<vmem>>, vector<1x4x4xbf16>
    %63 = vector.shape_cast %62 : vector<1x4x4xbf16> to vector<4x4xbf16>
    %cst_63 = arith.constant dense<0.000000e+00> : vector<256x4xf32>
    %64 = tpu.matmul %61, %63, %cst_63 {dimension_numbers = #tpu.dot_dimension_numbers<[1], [0], [0], [1], [0, 0, 1, 1], [], []>} : vector<256x4xbf16>, vector<4x4xbf16>, vector<256x4xf32> -> vector<256x4xf32>
    %65 = arith.addf %59, %64 : vector<256x4xf32>
    %c2_64 = arith.constant 2 : index
    %c1_65 = arith.constant 1 : index
    %c0_66 = arith.constant 0 : index
    %66 = vector.load %arg10[%c2_64, %c1_65, %c0_66] : memref<18x32x4xbf16, #tpu.memory_space<vmem>>, vector<16x16x4xbf16>
    %67 = vector.shape_cast %66 : vector<16x16x4xbf16> to vector<256x4xbf16>
    %c7 = arith.constant 7 : index
    %c0_67 = arith.constant 0 : index
    %c0_68 = arith.constant 0 : index
    %68 = vector.load %arg5[%c7, %c0_67, %c0_68] : memref<9x4x4xbf16, #tpu.memory_space<vmem>>, vector<1x4x4xbf16>
    %69 = vector.shape_cast %68 : vector<1x4x4xbf16> to vector<4x4xbf16>
    %cst_69 = arith.constant dense<0.000000e+00> : vector<256x4xf32>
    %70 = tpu.matmul %67, %69, %cst_69 {dimension_numbers = #tpu.dot_dimension_numbers<[1], [0], [0], [1], [0, 0, 1, 1], [], []>} : vector<256x4xbf16>, vector<4x4xbf16>, vector<256x4xf32> -> vector<256x4xf32>
    %71 = arith.addf %65, %70 : vector<256x4xf32>
    %c2_70 = arith.constant 2 : index
    %c2_71 = arith.constant 2 : index
    %c0_72 = arith.constant 0 : index
    %72 = vector.load %arg10[%c2_70, %c2_71, %c0_72] : memref<18x32x4xbf16, #tpu.memory_space<vmem>>, vector<16x16x4xbf16>
    %73 = vector.shape_cast %72 : vector<16x16x4xbf16> to vector<256x4xbf16>
    %c8 = arith.constant 8 : index
    %c0_73 = arith.constant 0 : index
    %c0_74 = arith.constant 0 : index
    %74 = vector.load %arg5[%c8, %c0_73, %c0_74] : memref<9x4x4xbf16, #tpu.memory_space<vmem>>, vector<1x4x4xbf16>
    %75 = vector.shape_cast %74 : vector<1x4x4xbf16> to vector<4x4xbf16>
    %cst_75 = arith.constant dense<0.000000e+00> : vector<256x4xf32>
    %76 = tpu.matmul %73, %75, %cst_75 {dimension_numbers = #tpu.dot_dimension_numbers<[1], [0], [0], [1], [0, 0, 1, 1], [], []>} : vector<256x4xbf16>, vector<4x4xbf16>, vector<256x4xf32> -> vector<256x4xf32>
    %77 = arith.addf %71, %76 : vector<256x4xf32>
    %c0_76 = arith.constant 0 : index
    %c0_77 = arith.constant 0 : index
    %78 = vector.load %arg6[%c0_76, %c0_77] : memref<1x4xf32, #tpu.memory_space<vmem>>, vector<1x4xf32>
    %79 = vector.broadcast %78 : vector<1x4xf32> to vector<256x4xf32>
    %80 = arith.addf %77, %79 : vector<256x4xf32>
    %cst_78 = arith.constant 0.000000e+00 : f32
    %81 = vector.broadcast %cst_78 : f32 to vector<256x4xf32>
    %82 = arith.maximumf %80, %81 : vector<256x4xf32>
    %83 = arith.truncf %82 : vector<256x4xf32> to vector<256x4xbf16>
    %c0_79 = arith.constant 0 : index
    %84 = arith.index_cast %0 : i32 to index
    %c0_80 = arith.constant 0 : index
    %c0_81 = arith.constant 0 : index
    %85 = vector.load %arg2[%c0_79, %84, %c0_80, %c0_81] : memref<1x16x16x4xf32, #tpu.memory_space<vmem>>, vector<1x16x16x4xf32>
    %86 = vector.shape_cast %85 : vector<1x16x16x4xf32> to vector<16x16x4xf32>
    %cst_82 = arith.constant 0.000000e+00 : f32
    %87 = vector.broadcast %cst_82 : f32 to vector<16x16x4xf32>
    %88 = arith.maximumf %86, %87 : vector<16x16x4xf32>
    %89 = vector.shape_cast %88 : vector<16x16x4xf32> to vector<256x4xf32>
    %90 = arith.truncf %89 : vector<256x4xf32> to vector<256x4xbf16>
    %91 = tpu.concatenate %83, %90 in 1 : vector<256x4xbf16>, vector<256x4xbf16> -> vector<256x8xbf16>
    %c0_83 = arith.constant 0 : index
    %c0_84 = arith.constant 0 : index
    %92 = vector.load %arg7[%c0_83, %c0_84] : memref<8x16xbf16, #tpu.memory_space<vmem>>, vector<8x16xbf16>
    %cst_85 = arith.constant dense<0.000000e+00> : vector<256x16xf32>
    %93 = tpu.matmul %91, %92, %cst_85 {dimension_numbers = #tpu.dot_dimension_numbers<[1], [0], [0], [1], [0, 0, 1, 1], [], []>} : vector<256x8xbf16>, vector<8x16xbf16>, vector<256x16xf32> -> vector<256x16xf32>
    %c0_86 = arith.constant 0 : index
    %c0_87 = arith.constant 0 : index
    %94 = vector.load %arg8[%c0_86, %c0_87] : memref<1x16xf32, #tpu.memory_space<vmem>>, vector<1x16xf32>
    %95 = vector.broadcast %94 : vector<1x16xf32> to vector<256x16xf32>
    %96 = arith.addf %93, %95 : vector<256x16xf32>
    %97 = vector.shape_cast %96 : vector<256x16xf32> to vector<16x16x16xf32>
    %c0_88 = arith.constant 0 : index
    %c0_89 = arith.constant 0 : index
    %c0_90 = arith.constant 0 : index
    %c0_91 = arith.constant 0 : index
    %98 = vector.load %arg9[%c0_88, %c0_89, %c0_90, %c0_91] : memref<1x16x16x16xf32, #tpu.memory_space<vmem>>, vector<1x16x16x16xf32>
    %99 = vector.shape_cast %98 : vector<1x16x16x16xf32> to vector<16x16x16xf32>
    %100 = vector.shape_cast %97 : vector<16x16x16xf32> to vector<1x16x16x16xf32>
    tpu.vector_store %arg9[%c0_88, %c0_89, %c0_90, %c0_91], %100 {strides = array<i32>} : memref<1x16x16x16xf32, #tpu.memory_space<vmem>>, vector<1x16x16x16xf32>,
    return
  }
  func.func @transform_0(%arg0: i32, %arg1: i32) -> (i32, i32, i32, i32) {
    %c0_i32 = arith.constant 0 : i32
    %c0_i32_0 = arith.constant 0 : i32
    %c0_i32_1 = arith.constant 0 : i32
    %c0_i32_2 = arith.constant 0 : i32
    return %arg0, %c0_i32, %c0_i32_0, %c0_i32_1 : i32, i32, i32, i32
  }
  func.func @transform_1(%arg0: i32, %arg1: i32) -> (i32, i32) {
    %c0_i32 = arith.constant 0 : i32
    %c0_i32_0 = arith.constant 0 : i32
    %c0_i32_1 = arith.constant 0 : i32
    return %c0_i32, %c0_i32_0 : i32, i32
  }
  func.func @transform_2(%arg0: i32, %arg1: i32) -> (i32, i32) {
    %c0_i32 = arith.constant 0 : i32
    %c0_i32_0 = arith.constant 0 : i32
    %c0_i32_1 = arith.constant 0 : i32
    return %c0_i32, %c0_i32_0 : i32, i32
  }
  func.func @transform_3(%arg0: i32, %arg1: i32) -> (i32, i32, i32) {
    %c0_i32 = arith.constant 0 : i32
    %c0_i32_0 = arith.constant 0 : i32
    %c0_i32_1 = arith.constant 0 : i32
    %c0_i32_2 = arith.constant 0 : i32
    return %c0_i32, %c0_i32_0, %c0_i32_1 : i32, i32, i32
  }
  func.func @transform_4(%arg0: i32, %arg1: i32) -> (i32, i32) {
    %c0_i32 = arith.constant 0 : i32
    %c0_i32_0 = arith.constant 0 : i32
    %c0_i32_1 = arith.constant 0 : i32
    return %c0_i32, %c0_i32_0 : i32, i32
  }
  func.func @transform_5(%arg0: i32, %arg1: i32) -> (i32, i32) {
    %c0_i32 = arith.constant 0 : i32
    %c0_i32_0 = arith.constant 0 : i32
    %c0_i32_1 = arith.constant 0 : i32
    return %c0_i32, %c0_i32_0 : i32, i32
  }
  func.func @transform_6(%arg0: i32, %arg1: i32) -> (i32, i32) {
    %c0_i32 = arith.constant 0 : i32
    %c0_i32_0 = arith.constant 0 : i32
    %c0_i32_1 = arith.constant 0 : i32
    return %c0_i32, %c0_i32_0 : i32, i32
  }
  func.func @transform_7(%arg0: i32, %arg1: i32) -> (i32, i32, i32, i32) {
    %c0_i32 = arith.constant 0 : i32
    %c0_i32_0 = arith.constant 0 : i32
    %c0_i32_1 = arith.constant 0 : i32
    return %arg0, %arg1, %c0_i32, %c0_i32_0 : i32, i32, i32, i32
  }
}

</mosaic_0001>

<bundles_post_ra>
// kernel: tpu_custom_call.1
= control target key start
LH: loop header
LB: loop body
LE: loop exit
PB: predicated region body
PF: predicated region fallthrough
CT: control target
= control target key end

     0   :  { %12 = vsyncpa [#allocation4], 0  ;;  %s7106_s0 = inlined_call_operand.vmem [shape: f32[2,16,16,4], index: 0, kind: input, shape index: {}]   ;;  %s7107_s1 = inlined_call_operand.vmem [shape: bf16[4,4], index: 1, kind: input, shape index: {}]   ;;  %s7108_s2 = inlined_call_operand.vmem [shape: f32[1,4], index: 2, kind: input, shape index: {}]   ;;  %s7109_s3 = inlined_call_operand.vmem [shape: bf16[9,4,4], index: 3, kind: input, shape index: {}]   ;;  %s7110_s4 = inlined_call_operand.vmem [shape: f32[1,4], index: 4, kind: input, shape index: {}]   ;;  %s7111_s5 = inlined_call_operand.vmem [shape: bf16[8,16], index: 5, kind: input, shape index: {}]   ;;  %s7112_s6 = inlined_call_operand.vmem [shape: f32[1,16], index: 6, kind: input, shape index: {}]   ;;  %s7113_s7 = inlined_call_operand.hbm [shape: f32[2,16,16,16], index: 7, kind: output, shape index: {}]  }
   0x1   :  { %14 = vsyncpa [#allocation4 + $0x1], 0  ;;  %s5803_s24 = smov 0   ;;  %s5805_s25 = smov 0  }
   0x2   :  { %s5807_s26 = smov 0   ;;  %s5809_s27 = smov 0  }
   0x3   :  { %s5811_s28 = smov 0   ;;  %s5813_s29 = smov 0  }
   0x4 LB: > { %s4585_s30 = sadd.s32 4294967295, %s5756_s29   ;;  %s4586_s8 = sadd.s32 4294967294, %s5756_s29   ;;  %s5756_s29 = sphi %s5813_s29, %s20_s29   ;;  %s5752_s28 = sphi %s5811_s28, %s7131_s28   ;;  %s5748_s27 = sphi %s5809_s27, %s7130_s27   ;;  %s5744_s26 = sphi %s5807_s26, %s7129_s26   ;;  %s5740_s25 = sphi %s5805_s25, %s7128_s25   ;;  %s5736_s24 = sphi %s5803_s24, %s7127_s24  }
   0x5   : > { %s32_s9 = sadd.s32 1, %s5752_s28  ;;  %s193_s10 = sadd.s32 1, %s5744_s26 }
   0x6   : > { %p34_p0 = scmp.ge.s32.totalorder %s32_s9, 2  ;;  %p203_p1 = scmp.ne.s32.totalorder %s5744_s26, %s5740_s25 }
   0x7   : > { %p204_p2 = scmp.eq.s32.totalorder %s4585_s30, 1  ;;  %p209_p3 = scmp.ne.s32.totalorder %s5740_s25, %s5736_s24 }
   0x8   : > { %s7133_s9 = smov (%p34_p0, %s32_s9), 0  ;;  %p210_p5 = scmp.eq.s32.totalorder %s4586_s8, 1 }
   0x9   : > { %p5843_p4 = por %p204_p2, %p203_p1  ;;  %s188_s12 = ssub.s32 %s5752_s28, %s7133_s9 }
   0xa   : > { %p4589_p6 = scmp.ge.s32.totalorder %s5756_s29, 1  ;;  %p191_p7 = scmp.eq.s32.totalorder %s188_s12, 0 }
   0xb   : > { %p5850_p8 = por %p210_p5, %p209_p3  ;;  %p254_p9 = scmp.lt.s32.totalorder %s5756_s29, 3 }
   0xc   : > { %s5856_s14 = scalar_select %p191_p7, %s5744_s26, %s193_s10  }
   0xd   : > { %p255_p10 = pnand %p4589_p6, %p254_p9 }
   0xf   : > { %258 = sbr.rel (%p255_p10) target bundleno = 1107 (0x453), region = 48 }
  0x16   : > { %v374_v0 = vld [vmem:[%s7107_s1] sm:$0x3]  ;;  %vm431_vm0 = vcmask 1041408   ;;  %p286_p11 = scmp.lt.s32.totalorder %s5748_s27, 1  ;;  %vm382_vm1 = vcmask 31744   ;;  %vm788_vm3 = vcmask 1040384  }
  0x17   : > { %5606 = vmatprep.subr.msk.bf16.mxu0 %vm431_vm0, %v374_v0  ;;  %v433_v1 = vsel %vm431_vm0, %v374_v0, 0  ;;  %vm894_vm2 = vsmask.f32 7424  ;;  %vm789_vm4 = vsmask.f32 256  ;;  %vm1545_vm6 = vcmask 1046528  }
  0x18   : > { %4975 = vmatpush3.bf16.msra.mxu0 %v433_v1  ;;  %s287_s17 = scalar_select %p286_p11, %s5748_s27, 1  ;;  %vm5969_vm5 = vmand %vm788_vm3, %vm789_vm4  ;;  %vm4295_vm7 = vcmask 1043456   ;;  %vm4262_vm8 = vcmask 64512   ;;  %vm4460_vm9 = vcmask 130048  }
  0x19   : > { %s283_s22 = sand.u32 1, %s5740_s25   ;;  %s4786_s12 = sshll.u32 %s5748_s27, 12 }
  0x1a   : > { %s4785_s18 = sshll.u32 %s287_s17, 8  ;;  %s5759_s17 = smov 4  }
  0x1b   : > { %s5868_s21 = scalar_lea.vmem %s7106_s0, %s4785_s18  ;;  %s4590_s23 = sshll.u32 %s283_s22, 8 }
  0x1c   : > { %v294_v2 = vld [vmem:[%s5868_s21] sm:$0xff]  ;;  %v295_v3 = vld [vmem:[%s5868_s21 + $0x8] sm:$0xff]  ;;  %v296_v4 = vld [vmem:[%s5868_s21 + $0x10] sm:$0xff]  ;;  %s6953_s10 = scalar_lea.vmem [#allocation3], %s4590_s23  ;;  %s7047_s18 = scalar_lea.hbm %s7113_s7, %s4786_s12 }
  0x1d   : > { %v326_v5 = vmax.f32 %v294_v2, 0.0  ;;  %v327_v6 = vmax.f32 %v295_v3, 0.0  ;;  %v297_v7 = vld [vmem:[%s5868_s21 + $0x18] sm:$0xff]  ;;  %v328_v8 = vmax.f32 %v296_v4, 0.0  ;;  %v298_v9 = vld [vmem:[%s5868_s21 + $0x20] sm:$0xff]  ;;  %v299_v10 = vld [vmem:[%s5868_s21 + $0x28] sm:$0xff] }
  0x1e   : > { %v329_v11 = vmax.f32 %v297_v7, 0.0  ;;  %v330_v12 = vmax.f32 %v298_v9, 0.0  ;;  %v331_v13 = vmax.f32 %v299_v10, 0.0  ;;  %v300_v15 = vld [vmem:[%s5868_s21 + $0x30] sm:$0xff]  ;;  %v301_v16 = vld [vmem:[%s5868_s21 + $0x38] sm:$0xff]  ;;  %v302_v19 = vld [vmem:[%s5868_s21 + $0x40] sm:$0xff] }
  0x1f   : > { %v358_v14 = vpack.c.bf16 %v327_v6, %v326_v5  ;;  %v303_v20 = vld [vmem:[%s5868_s21 + $0x48] sm:$0xff]  ;;  %v332_v21 = vmax.f32 %v300_v15, 0.0  ;;  %v333_v22 = vmax.f32 %v301_v16, 0.0  ;;  %v334_v23 = vmax.f32 %v302_v19, 0.0  ;;  %v304_v27 = vld [vmem:[%s5868_s21 + $0x50] sm:$0xff]  ;;  %v305_v28 = vld [vmem:[%s5868_s21 + $0x58] sm:$0xff] }
  0x20   : > { %v359_v17 = vpack.c.bf16 %v329_v11, %v328_v8  ;;  %v360_v18 = vpack.c.bf16 %v331_v13, %v330_v12  ;;  %v335_v24 = vmax.f32 %v303_v20, 0.0  ;;  %v306_v29 = vld [vmem:[%s5868_s21 + $0x60] sm:$0xff]  ;;  %v307_v30 = vld [vmem:[%s5868_s21 + $0x68] sm:$0xff]  ;;  %v336_v31 = vmax.f32 %v304_v27, 0.0  ;;  %v308_v37 = vld [vmem:[%s5868_s21 + $0x70] sm:$0xff]  ;;  %s4510_s15 = sshll.u32 %s6953_s10, 4  ;;  %s7049_s15 = int_to_ptr.vmem [resolvable:$true] %s4510_s15 }
  0x21   : > { %4976 = vmatprep.mubr.msk.bf16.mxu0 %vm382_vm1, %v358_v14  ;;  %v361_v25 = vpack.c.bf16 %v333_v22, %v332_v21  ;;  %v337_v32 = vmax.f32 %v305_v28, 0.0  ;;  %v338_v33 = vmax.f32 %v306_v29, 0.0  ;;  %v339_v34 = vmax.f32 %v307_v30, 0.0  ;;  %v309_v38 = vld [vmem:[%s5868_s21 + $0x78] sm:$0xff]  ;;  %v310_v39 = vld [vmem:[%s5868_s21 + $0x80] sm:$0xff]  ;;  %v311_v40 = vld [vmem:[%s5868_s21 + $0x88] sm:$0xff] }
  0x22   : > { %4977 = vmatmul.mubr.msk.bf16.vlgmr.msra.gmra.mrb[0].mxu0 %vm382_vm1, %v359_v17  ;;  %v362_v26 = vpack.c.bf16 %v335_v24, %v334_v23  ;;  %v340_v41 = vmax.f32 %v308_v37, 0.0  ;;  %v341_v42 = vmax.f32 %v309_v38, 0.0  ;;  %v342_v43 = vmax.f32 %v310_v39, 0.0  ;;  %v312_v47 = vld [vmem:[%s5868_s21 + $0x90] sm:$0xff]  ;;  %v313_v48 = vld [vmem:[%s5868_s21 + $0x98] sm:$0xff]  ;;  %v314_v49 = vld [vmem:[%s5868_s21 + $0xa0] sm:$0xff] }
  0x23   : > { %4980 = vmatprep.mubr.msk.bf16.mxu0 %vm382_vm1, %v360_v18  ;;  %v363_v35 = vpack.c.bf16 %v337_v32, %v336_v31  ;;  %v364_v36 = vpack.c.bf16 %v339_v34, %v338_v33  ;;  %v343_v44 = vmax.f32 %v311_v40, 0.0  ;;  %v315_v50 = vld [vmem:[%s5868_s21 + $0xa8] sm:$0xff]  ;;  %v344_v51 = vmax.f32 %v312_v47, 0.0  ;;  %v316_v57 = vld [vmem:[%s5868_s21 + $0xb0] sm:$0xff]  ;;  %v317_v58 = vld [vmem:[%s5868_s21 + $0xb8] sm:$0xff]  ;;  %s7060_s27 = scalar_lea.sflag [#allocation4], %s283_s22 }
  0x24   : > { %v365_v45 = vpack.c.bf16 %v341_v42, %v340_v41  ;;  %v345_v52 = vmax.f32 %v313_v48, 0.0  ;;  %v346_v53 = vmax.f32 %v314_v49, 0.0  ;;  %v347_v54 = vmax.f32 %v315_v50, 0.0  ;;  %v318_v59 = vld [vmem:[%s5868_s21 + $0xc0] sm:$0xff]  ;;  %v319_v60 = vld [vmem:[%s5868_s21 + $0xc8] sm:$0xff]  ;;  %v320_v3 = vld [vmem:[%s5868_s21 + $0xd0] sm:$0xff] }
  0x25   : > { %v366_v46 = vpack.c.bf16 %v343_v44, %v342_v43  ;;  %v348_v61 = vmax.f32 %v316_v57, 0.0  ;;  %v349_v62 = vmax.f32 %v317_v58, 0.0  ;;  %v350_v63 = vmax.f32 %v318_v59, 0.0  ;;  %v321_v4 = vld [vmem:[%s5868_s21 + $0xd8] sm:$0xff]  ;;  %v322_v5 = vld [vmem:[%s5868_s21 + $0xe0] sm:$0xff]  ;;  %v323_v6 = vld [vmem:[%s5868_s21 + $0xe8] sm:$0xff] }
  0x26   : > { %v367_v55 = vpack.c.bf16 %v345_v52, %v344_v51  ;;  %v368_v56 = vpack.c.bf16 %v347_v54, %v346_v53  ;;  %v351_v0 = vmax.f32 %v319_v60, 0.0  ;;  %v352_v7 = vmax.f32 %v320_v3, 0.0  ;;  %v324_v13 = vld [vmem:[%s5868_s21 + $0xf0] sm:$0xff]  ;;  %v325_v14 = vld [vmem:[%s5868_s21 + $0xf8] sm:$0xff]  ;;  %v5936_v30 = vld [vmem:[%s7109_s3 + $0x6] sm:$0x3] }
  0x27   : > { %v369_v1 = vpack.c.bf16 %v349_v62, %v348_v61  ;;  %v353_v8 = vmax.f32 %v321_v4, 0.0  ;;  %v354_v9 = vmax.f32 %v322_v5, 0.0  ;;  %v355_v10 = vmax.f32 %v323_v6, 0.0  ;;  %5611 = vmatprep.subr.msk.bf16.mxu1 %vm431_vm0, %v5936_v30  ;;  %v5947_v32 = vld [vmem:[%s7109_s3 + $0x8] sm:$0x3]  ;;  %s5678_s19 = scalar_lea.vmem %s7049_s15, 4096 }
  0x28   : > { %v370_v2 = vpack.c.bf16 %v351_v0, %v350_v63  ;;  %v356_v15 = vmax.f32 %v324_v13, 0.0  ;;  %v357_v16 = vmax.f32 %v325_v14, 0.0  ;;  %v5758_v18 = vmov 0   ;;  %v5955_v33 = vld [vmem:[%s7109_s3] sm:$0x3]  ;;  %p5679_p12 = scmp.ne.s32.totalorder %s7049_s15, %s5678_s19 }
  0x29   : > { %v371_v11 = vpack.c.bf16 %v353_v8, %v352_v7  ;;  %v372_v12 = vpack.c.bf16 %v355_v10, %v354_v9  ;;  %823 = vst.msk [vmem:[#allocation2] sm:$0xff] %vm382_vm1, %v5758_v18  ;;  %824 = vst.msk [vmem:[#allocation2 + $0x8] sm:$0xff] %vm382_vm1, %v5758_v18  ;;  %v5942_v31 = vsel %vm431_vm0, %v5936_v30, 0  ;;  %v5962_v34 = vld [vmem:[%s7108_s2] ss:$0 sm:$0xff] }
  0x2a   : > { %4981 = vmatmul.mubr.msk.bf16.gmra.mrb[4].mxu0 %vm382_vm1, %v361_v25  ;;  %v373_v17 = vpack.c.bf16 %v357_v16, %v356_v15  ;;  %859 = vst.msk [vmem:[#allocation2 + $0x110] sm:$0xff] %vm382_vm1, %v5758_v18  ;;  %860 = vst.msk [vmem:[#allocation2 + $0x118] sm:$0xff] %vm382_vm1, %v5758_v18  ;;  %v4610_v25 = vld [vmem:[%s7109_s3 + $0x2] sm:$0x3]  ;;  %5349 = vmatpush3.bf16.msra.mxu1 %v5942_v31  ;;  %p5680_p13 = pnand %p5679_p12, %p5843_p4 }
  0x2b   : > { %4984 = vmatprep.mubr.msk.bf16.mxu0 %vm382_vm1, %v362_v26  ;;  %5607 = vmatprep.subr.msk.bf16.mxu0 %vm431_vm0, %v4610_v25  ;;  %v1138_v26 = vsel %vm431_vm0, %v4610_v25, 0 }
  0x2c   : > { %5009 = vmatpush3.bf16.msra.mxu0 %v1138_v26  ;;  %5612 = vmatprep.subr.msk.bf16.mxu1 %vm431_vm0, %v5947_v32  ;;  %p5681_p0 = pneg %p5680_p13 }
  0x2d   : > { %5608 = vmatprep.subr.msk.bf16.mxu0 %vm431_vm0, %v5955_v33 }
  0x30   : > { %v5922_v19 = vld [vmem:[#allocation2] sm:$0xff]  ;;  %v878_v21 = vld [vmem:[#allocation2 + $0x8] sm:$0x1] }
  0x31   : > { %v898_v20 = vshll.u32 %v5922_v19, 16  ;;  %v896_v22 = vshrl.u32 %v5922_v19, 16  ;;  %v903_v24 = vshll.u32 %v878_v21, 16 }
  0x32   : > { %4985 = vmatmul.mubr.msk.bf16.gmra.mrb[8].mxu0 %vm382_vm1, %v363_v35 }
  0x33   : > { %4988 = vmatprep.mubr.msk.bf16.mxu0 %vm382_vm1, %v364_v36  ;;  %v900_v23 = vrot.slane %v898_v20, 1  ;;  %v905_v28 = vrot.slane %v903_v24, 1  ;;  %v5993_v24 = vsel %vm431_vm0, %v5947_v32, 0 }
  0x35   : > { %v901_v27 = vor.u32 %v900_v23, %v896_v22 }
  0x37   : > { %v906_v29 = vsel %vm894_vm2, %v901_v27, %v905_v28  ;;  %v5998_v28 = vsel %vm431_vm0, %v5955_v33, 0 }
  0x3a   : > { %4989 = vmatmul.mubr.msk.bf16.gmra.mrb[12].mxu0 %vm382_vm1, %v365_v45 }
  0x3b   : > { %4992 = vmatprep.mubr.msk.bf16.mxu0 %vm382_vm1, %v366_v46 }
  0x42   : > { %4993 = vmatmul.mubr.msk.bf16.gmra.mrb[16].mxu0 %vm382_vm1, %v367_v55 }
  0x43   : > { %4996 = vmatprep.mubr.msk.bf16.mxu0 %vm382_vm1, %v368_v56 }
  0x4a   : > { %4997 = vmatmul.mubr.msk.bf16.gmra.mrb[20].mxu0 %vm382_vm1, %v369_v1 }
  0x4b   : > { %5000 = vmatprep.mubr.msk.bf16.mxu0 %vm382_vm1, %v370_v2 }
  0x52   : > { %5001 = vmatmul.mubr.msk.bf16.gmra.mrb[24].mxu0 %vm382_vm1, %v371_v11 }
  0x53   : > { %5004 = vmatprep.mubr.msk.bf16.mxu0 %vm382_vm1, %v372_v12 }
  0x5a   : > { %5005 = vmatmul.mubr.msk.bf16.gmra.mrb[28].mxu0 %vm382_vm1, %v373_v17 }
  0x5b   : > { %5010 = vmatprep.mubr.msk.bf16.mxu0 %vm382_vm1, %v906_v29 }
  0xf5   : > { %v4978_v35 = vpop.f32.mrb[0].mxu0 }
  0xf6   : > { %v478_v36 = vadd.f32 %v4978_v35, %v5962_v34  ;;  %v469_v37 = vpop.f32.mrb[1].mxu0 }
  0xf7   : > { %v470_v38 = vadd.f32 %v5962_v34, %v469_v37  ;;  %v4979_v39 = vpop.f32.mrb[2].mxu0 }
  0xf8   : > { %v481_v40 = vadd.f32 %v4979_v39, %v5962_v34  ;;  %v472_v41 = vpop.f32.mrb[3].mxu0  ;;  %v598_v43 = vmax.f32 %v478_v36, 0.0 }
  0xf9   : > { %v473_v42 = vadd.f32 %v5962_v34, %v472_v41  ;;  %v596_v45 = vmax.f32 %v470_v38, 0.0 }
  0xfa   : > { %v599_v44 = vmax.f32 %v481_v40, 0.0 }
  0xfb   : > { %v597_v46 = vmax.f32 %v473_v42, 0.0 }
  0xfc   : > { %v629_v47 = vpack.c.bf16 %v599_v44, %v598_v43 }
  0xfd   : > { %v628_v48 = vpack.c.bf16 %v597_v46, %v596_v45  ;;  %v4982_v49 = vpop.f32.mrb[4].mxu0 }
  0xfe   : > { %v652_v50 = vshrl.u32 %v629_v47, 16  ;;  %v494_v51 = vadd.f32 %v4982_v49, %v5962_v34  ;;  %v485_v52 = vpop.f32.mrb[5].mxu0  ;;  %v655_v58 = vshll.u32 %v629_v47, 16 }
  0xff   : > { %v645_v54 = vshrl.u32 %v628_v48, 16  ;;  %v486_v55 = vadd.f32 %v5962_v34, %v485_v52  ;;  %v4983_v56 = vpop.f32.mrb[6].mxu0  ;;  %v648_v62 = vshll.u32 %v628_v48, 16 }
 0x100   : > { %v654_v57 = vrot.slane %v652_v50, 7  ;;  %v497_v59 = vadd.f32 %v4983_v56, %v5962_v34  ;;  %v488_v60 = vpop.f32.mrb[7].mxu0  ;;  %v602_v2 = vmax.f32 %v494_v51, 0.0 }
 0x101   : > { %v647_v61 = vrot.slane %v645_v54, 7  ;;  %v489_v63 = vadd.f32 %v5962_v34, %v488_v60  ;;  %v600_v6 = vmax.f32 %v486_v55, 0.0 }
 0x102   : > { %v657_v0 = vor.u32 %v655_v58, %v654_v57  ;;  %v808_v1 = vsel %vm5969_vm5, %v654_v57, 0  ;;  %v603_v3 = vmax.f32 %v497_v59, 0.0 }
 0x103   : > { %829 = vst.msk [vmem:[#allocation2 + $0x28] sm:$0xff] %vm382_vm1, %v808_v1  ;;  %v650_v4 = vor.u32 %v648_v62, %v647_v61  ;;  %v807_v5 = vsel %vm5969_vm5, %v647_v61, 0  ;;  %v601_v7 = vmax.f32 %v489_v63, 0.0 }
 0x104   : > { %v792_v8 = vsel %vm5969_vm5, 0, %v657_v0  ;;  %827 = vst.msk [vmem:[#allocation2 + $0x18] sm:$0xff] %vm382_vm1, %v807_v5  ;;  %v631_v9 = vpack.c.bf16 %v603_v3, %v602_v2 }
 0x105   : > { %828 = vst.msk [vmem:[#allocation2 + $0x20] sm:$0xff] %vm382_vm1, %v792_v8  ;;  %v791_v10 = vsel %vm5969_vm5, 0, %v650_v4  ;;  %v630_v11 = vpack.c.bf16 %v601_v7, %v600_v6  ;;  %v4986_v12 = vpop.f32.mrb[8].mxu0 }
 0x106   : > { %826 = vst.msk [vmem:[#allocation2 + $0x10] sm:$0xff] %vm382_vm1, %v791_v10  ;;  %v666_v13 = vshrl.u32 %v631_v9, 16  ;;  %v510_v14 = vadd.f32 %v4986_v12, %v5962_v34  ;;  %v501_v15 = vpop.f32.mrb[9].mxu0  ;;  %v669_v21 = vshll.u32 %v631_v9, 16 }
 0x107   : > { %v659_v16 = vshrl.u32 %v630_v11, 16  ;;  %v502_v17 = vadd.f32 %v5962_v34, %v501_v15  ;;  %v4987_v18 = vpop.f32.mrb[10].mxu0  ;;  %v662_v26 = vshll.u32 %v630_v11, 16 }
 0x108   : > { %v668_v20 = vrot.slane %v666_v13, 7  ;;  %v513_v22 = vadd.f32 %v4987_v18, %v5962_v34  ;;  %v504_v23 = vpop.f32.mrb[11].mxu0  ;;  %v606_v36 = vmax.f32 %v510_v14, 0.0 }
 0x109   : > { %v661_v25 = vrot.slane %v659_v16, 7  ;;  %v505_v27 = vadd.f32 %v5962_v34, %v504_v23  ;;  %v604_v40 = vmax.f32 %v502_v17, 0.0 }
 0x10a   : > { %v671_v29 = vor.u32 %v669_v21, %v668_v20  ;;  %v810_v35 = vsel %vm5969_vm5, %v668_v20, 0  ;;  %v607_v37 = vmax.f32 %v513_v22, 0.0  ;;  %v6002_v38 = vld [vmem:[#allocation2 + $0x28] sm:$0x1] }
 0x10b   : > { %833 = vst.msk [vmem:[#allocation2 + $0x48] sm:$0xff] %vm382_vm1, %v810_v35  ;;  %v664_v32 = vor.u32 %v662_v26, %v661_v25  ;;  %v809_v39 = vsel %vm5969_vm5, %v661_v25, 0  ;;  %v605_v41 = vmax.f32 %v505_v27, 0.0  ;;  %v6007_v42 = vld [vmem:[#allocation2 + $0x18] sm:$0x1]  ;;  %v927_v46 = vshll.u32 %v6002_v38, 16 }
 0x10c   : > { %v794_v33 = vsel %vm5969_vm5, 0, %v671_v29  ;;  %831 = vst.msk [vmem:[#allocation2 + $0x38] sm:$0xff] %vm382_vm1, %v809_v39  ;;  %v633_v43 = vpack.c.bf16 %v607_v37, %v606_v36  ;;  %v915_v44 = vshll.u32 %v6007_v42, 16  ;;  %v6013_v45 = vld [vmem:[#allocation2 + $0x20] sm:$0xff] }
 0x10d   : > { %832 = vst.msk [vmem:[#allocation2 + $0x40] sm:$0xff] %vm382_vm1, %v794_v33  ;;  %v793_v47 = vsel %vm5969_vm5, 0, %v664_v32  ;;  %v632_v48 = vpack.c.bf16 %v605_v41, %v604_v40  ;;  %v4990_v49 = vpop.f32.mrb[12].mxu0  ;;  %v6019_v50 = vld [vmem:[#allocation2 + $0x10] sm:$0xff]  ;;  %v920_v51 = vshrl.u32 %v6013_v45, 16  ;;  %v922_v52 = vshll.u32 %v6013_v45, 16 }
 0x10e   : > { %830 = vst.msk [vmem:[#allocation2 + $0x30] sm:$0xff] %vm382_vm1, %v793_v47  ;;  %v680_v54 = vshrl.u32 %v633_v43, 16  ;;  %v683_v55 = vshll.u32 %v633_v43, 16  ;;  %v526_v56 = vadd.f32 %v4990_v49, %v5962_v34  ;;  %v517_v57 = vpop.f32.mrb[13].mxu0  ;;  %v908_v58 = vshrl.u32 %v6019_v50, 16 }
 0x10f   : > { %v673_v59 = vshrl.u32 %v632_v48, 16  ;;  %v676_v60 = vshll.u32 %v632_v48, 16  ;;  %v518_v61 = vadd.f32 %v5962_v34, %v517_v57  ;;  %v4991_v62 = vpop.f32.mrb[14].mxu0  ;;  %v910_v63 = vshll.u32 %v6019_v50, 16  ;;  %v6064_v47 = vld [vmem:[%s7109_s3 + $0x4] sm:$0x3] }
 0x110   : > { %v682_v0 = vrot.slane %v680_v54, 7  ;;  %v610_v1 = vmax.f32 %v526_v56, 0.0  ;;  %v529_v2 = vadd.f32 %v4991_v62, %v5962_v34  ;;  %v520_v3 = vpop.f32.mrb[15].mxu0  ;;  %v917_v4 = vrot.slane %v915_v44, 1 }
 0x111   : > { %v675_v5 = vrot.slane %v673_v59, 7  ;;  %v608_v6 = vmax.f32 %v518_v61, 0.0  ;;  %v521_v7 = vadd.f32 %v5962_v34, %v520_v3  ;;  %v912_v8 = vrot.slane %v910_v63, 1 }
 0x112   : > { %v685_v9 = vor.u32 %v683_v55, %v682_v0  ;;  %v812_v10 = vsel %vm5969_vm5, %v682_v0, 0  ;;  %v611_v11 = vmax.f32 %v529_v2, 0.0  ;;  %v924_v12 = vrot.slane %v922_v52, 1  ;;  %v6075_v63 = vld [vmem:[#allocation2 + $0x48] sm:$0x1] }
 0x113   : > { %837 = vst.msk [vmem:[#allocation2 + $0x68] sm:$0xff] %vm382_vm1, %v812_v10  ;;  %v678_v13 = vor.u32 %v676_v60, %v675_v5  ;;  %v811_v14 = vsel %vm5969_vm5, %v675_v5, 0  ;;  %v609_v15 = vmax.f32 %v521_v7, 0.0  ;;  %v6035_v16 = vor.u32 %v912_v8, %v908_v58  ;;  %v6037_v17 = vld [vmem:[#allocation2 + $0x38] sm:$0x1] }
 0x114   : > { %v796_v18 = vsel %vm5969_vm5, 0, %v685_v9  ;;  %835 = vst.msk [vmem:[#allocation2 + $0x58] sm:$0xff] %vm382_vm1, %v811_v14  ;;  %v635_v20 = vpack.c.bf16 %v611_v11, %v610_v1  ;;  %v6042_v21 = vor.u32 %v924_v12, %v920_v51  ;;  %v929_v22 = vrot.slane %v927_v46, 1  ;;  %v6068_v55 = vld [vmem:[#allocation2 + $0x40] sm:$0xff] }
 0x115   : > { %836 = vst.msk [vmem:[#allocation2 + $0x60] sm:$0xff] %vm382_vm1, %v796_v18  ;;  %v795_v23 = vsel %vm5969_vm5, 0, %v678_v13  ;;  %v634_v25 = vpack.c.bf16 %v609_v15, %v608_v6  ;;  %v4994_v26 = vpop.f32.mrb[16].mxu0  ;;  %v918_v27 = vsel %vm894_vm2, %v6035_v16, %v917_v4  ;;  %v6049_v29 = vld [vmem:[#allocation2 + $0x30] sm:$0xff]  ;;  %v939_v35 = vshll.u32 %v6037_v17, 16 }
 0x116   : > { %834 = vst.msk [vmem:[#allocation2 + $0x50] sm:$0xff] %vm382_vm1, %v795_v23  ;;  %v694_v36 = vshrl.u32 %v635_v20, 16  ;;  %v697_v37 = vshll.u32 %v635_v20, 16  ;;  %v542_v32 = vadd.f32 %v4994_v26, %v5962_v34  ;;  %5011 = vmatmul.mubr.msk.bf16.vlgmr.msra.gmra.mrb[32].mxu0 %vm382_vm1, %v918_v27  ;;  %v533_v39 = vpop.f32.mrb[17].mxu0  ;;  %v930_v40 = vsel %vm894_vm2, %v6042_v21, %v929_v22 }
 0x117   : > { %v687_v41 = vshrl.u32 %v634_v25, 16  ;;  %v690_v33 = vshll.u32 %v634_v25, 16  ;;  %v534_v43 = vadd.f32 %v5962_v34, %v533_v39  ;;  %5014 = vmatprep.mubr.msk.bf16.mxu0 %vm382_vm1, %v930_v40  ;;  %v4995_v44 = vpop.f32.mrb[18].mxu0  ;;  %v932_v46 = vshrl.u32 %v6049_v29, 16  ;;  %5043 = vmatpush3.bf16.msra.mxu0 %v5998_v28 }
 0x118   : > { %v696_v48 = vrot.slane %v694_v36, 7  ;;  %v614_v49 = vmax.f32 %v542_v32, 0.0  ;;  %v545_v51 = vadd.f32 %v4995_v44, %v5962_v34  ;;  %v536_v52 = vpop.f32.mrb[19].mxu0  ;;  %v934_v54 = vshll.u32 %v6049_v29, 16  ;;  %5609 = vmatprep.subr.msk.bf16.mxu0 %vm431_vm0, %v6064_v47 }
 0x119   : > { %v689_v56 = vrot.slane %v687_v41, 7  ;;  %v612_v57 = vmax.f32 %v534_v43, 0.0  ;;  %v537_v28 = vadd.f32 %v5962_v34, %v536_v52  ;;  %v941_v58 = vrot.slane %v939_v35, 1 }
 0x11a   : > { %v699_v59 = vor.u32 %v697_v37, %v696_v48  ;;  %v814_v60 = vsel %vm5969_vm5, %v696_v48, 0  ;;  %v615_v61 = vmax.f32 %v545_v51, 0.0  ;;  %v936_v62 = vrot.slane %v934_v54, 1 }
 0x11b   : > { %841 = vst.msk [vmem:[#allocation2 + $0x88] sm:$0xff] %vm382_vm1, %v814_v60  ;;  %v692_v0 = vor.u32 %v690_v33, %v689_v56  ;;  %v813_v1 = vsel %vm5969_vm5, %v689_v56, 0  ;;  %v613_v2 = vmax.f32 %v537_v28, 0.0  ;;  %v944_v3 = vshrl.u32 %v6068_v55, 16  ;;  %v6081_v4 = vld [vmem:[#allocation2 + $0x58] sm:$0x1] }
 0x11c   : > { %v798_v5 = vsel %vm5969_vm5, 0, %v699_v59  ;;  %839 = vst.msk [vmem:[#allocation2 + $0x78] sm:$0xff] %vm382_vm1, %v813_v1  ;;  %v637_v6 = vpack.c.bf16 %v615_v61, %v614_v49  ;;  %v6086_v7 = vor.u32 %v936_v62, %v932_v46  ;;  %v946_v8 = vshll.u32 %v6068_v55, 16  ;;  %v6109_v54 = vld [vmem:[#allocation2 + $0x60] sm:$0xff] }
 0x11d   : > { %840 = vst.msk [vmem:[#allocation2 + $0x80] sm:$0xff] %vm382_vm1, %v798_v5  ;;  %v797_v9 = vsel %vm5969_vm5, 0, %v692_v0  ;;  %v636_v10 = vpack.c.bf16 %v613_v2, %v612_v57  ;;  %v4998_v11 = vpop.f32.mrb[20].mxu0  ;;  %v951_v12 = vshll.u32 %v6075_v63, 16  ;;  %v963_v13 = vshll.u32 %v6081_v4, 16  ;;  %v6100_v36 = vld [vmem:[#allocation2 + $0x50] sm:$0xff] }
 0x11e   : > { %838 = vst.msk [vmem:[#allocation2 + $0x70] sm:$0xff] %vm382_vm1, %v797_v9  ;;  %v708_v14 = vshrl.u32 %v637_v6, 16  ;;  %v711_v15 = vshll.u32 %v637_v6, 16  ;;  %v558_v18 = vadd.f32 %v4998_v11, %v5962_v34  ;;  %v942_v20 = vsel %vm894_vm2, %v6086_v7, %v941_v58  ;;  %v549_v22 = vpop.f32.mrb[21].mxu0 }
 0x11f   : > { %v701_v23 = vshrl.u32 %v636_v10, 16  ;;  %v704_v25 = vshll.u32 %v636_v10, 16  ;;  %5015 = vmatmul.mubr.msk.bf16.gmra.mrb[36].mxu0 %vm382_vm1, %v942_v20  ;;  %v550_v26 = vadd.f32 %v5962_v34, %v549_v22  ;;  %v948_v27 = vrot.slane %v946_v8, 1  ;;  %v4999_v35 = vpop.f32.mrb[22].mxu0 }
 0x120   : > { %v710_v37 = vrot.slane %v708_v14, 7  ;;  %v618_v32 = vmax.f32 %v558_v18, 0.0  ;;  %v953_v39 = vrot.slane %v951_v12, 1  ;;  %v561_v40 = vadd.f32 %v4999_v35, %v5962_v34  ;;  %v552_v41 = vpop.f32.mrb[23].mxu0 }
 0x121   : > { %v703_v33 = vrot.slane %v701_v23, 7  ;;  %v616_v43 = vmax.f32 %v550_v26, 0.0  ;;  %v6103_v44 = vor.u32 %v948_v27, %v944_v3  ;;  %v553_v46 = vadd.f32 %v5962_v34, %v552_v41  ;;  %v6124_v3 = vld [vmem:[#allocation2 + $0x68] sm:$0x1] }
 0x122   : > { %v713_v48 = vor.u32 %v711_v15, %v710_v37  ;;  %v816_v49 = vsel %vm5969_vm5, %v710_v37, 0  ;;  %v619_v51 = vmax.f32 %v561_v40, 0.0  ;;  %v956_v52 = vshrl.u32 %v6100_v36, 16 }
 0x123   : > { %845 = vst.msk [vmem:[#allocation2 + $0xa8] sm:$0xff] %vm382_vm1, %v816_v49  ;;  %v706_v56 = vor.u32 %v704_v25, %v703_v33  ;;  %v815_v57 = vsel %vm5969_vm5, %v703_v33, 0  ;;  %v954_v28 = vsel %vm894_vm2, %v6103_v44, %v953_v39  ;;  %v617_v58 = vmax.f32 %v553_v46, 0.0 }
 0x124   : > { %v800_v59 = vsel %vm5969_vm5, 0, %v713_v48  ;;  %843 = vst.msk [vmem:[#allocation2 + $0x98] sm:$0xff] %vm382_vm1, %v815_v57  ;;  %5018 = vmatprep.mubr.msk.bf16.mxu0 %vm382_vm1, %v954_v28  ;;  %v639_v60 = vpack.c.bf16 %v619_v51, %v618_v32  ;;  %v958_v61 = vshll.u32 %v6100_v36, 16  ;;  %v965_v62 = vrot.slane %v963_v13, 1  ;;  %v6143_v48 = vld [vmem:[#allocation2 + $0x78] sm:$0x1] }
 0x125   : > { %844 = vst.msk [vmem:[#allocation2 + $0xa0] sm:$0xff] %vm382_vm1, %v800_v59  ;;  %v799_v0 = vsel %vm5969_vm5, 0, %v706_v56  ;;  %v638_v1 = vpack.c.bf16 %v617_v58, %v616_v43  ;;  %v5002_v2 = vpop.f32.mrb[24].mxu0  ;;  %v968_v5 = vshrl.u32 %v6109_v54, 16  ;;  %v970_v6 = vshll.u32 %v6109_v54, 16  ;;  %v6137_v40 = vld [vmem:[#allocation2 + $0x70] sm:$0xff] }
 0x126   : > { %842 = vst.msk [vmem:[#allocation2 + $0x90] sm:$0xff] %vm382_vm1, %v799_v0  ;;  %v722_v8 = vshrl.u32 %v639_v60, 16  ;;  %v725_v9 = vshll.u32 %v639_v60, 16  ;;  %v574_v10 = vadd.f32 %v5002_v2, %v5962_v34  ;;  %v960_v11 = vrot.slane %v958_v61, 1  ;;  %v565_v12 = vpop.f32.mrb[25].mxu0  ;;  %v6150_v57 = vld [vmem:[#allocation2 + $0x80] sm:$0xff] }
 0x127   : > { %v715_v13 = vshrl.u32 %v638_v1, 16  ;;  %v718_v14 = vshll.u32 %v638_v1, 16  ;;  %v566_v15 = vadd.f32 %v5962_v34, %v565_v12  ;;  %v972_v18 = vrot.slane %v970_v6, 1  ;;  %v5003_v20 = vpop.f32.mrb[26].mxu0  ;;  %v6159_v61 = vld [vmem:[#allocation2 + $0x88] sm:$0x1] }
 0x128   : > { %v724_v22 = vrot.slane %v722_v8, 7  ;;  %v622_v23 = vmax.f32 %v574_v10, 0.0  ;;  %v6131_v25 = vor.u32 %v960_v11, %v956_v52  ;;  %v975_v26 = vshll.u32 %v6124_v3, 16  ;;  %v568_v27 = vpop.f32.mrb[27].mxu0 }
 0x129   : > { %v717_v35 = vrot.slane %v715_v13, 7  ;;  %v620_v37 = vmax.f32 %v566_v15, 0.0  ;;  %v6134_v32 = vor.u32 %v972_v18, %v968_v5  ;;  %v577_v39 = vadd.f32 %v5003_v20, %v5962_v34 }
 0x12a   : > { %v727_v41 = vor.u32 %v725_v9, %v724_v22  ;;  %v818_v33 = vsel %vm5969_vm5, %v724_v22, 0  ;;  %v966_v43 = vsel %vm894_vm2, %v6131_v25, %v965_v62  ;;  %v977_v46 = vrot.slane %v975_v26, 1  ;;  %v6164_v62 = vld [vmem:[%s7109_s3 + $0xa] sm:$0x3] }
 0x12b   : > { %849 = vst.msk [vmem:[#allocation2 + $0xc8] sm:$0xff] %vm382_vm1, %v818_v33  ;;  %v720_v49 = vor.u32 %v718_v14, %v717_v35  ;;  %v817_v51 = vsel %vm5969_vm5, %v717_v35, 0  ;;  %5019 = vmatmul.mubr.msk.bf16.gmra.mrb[40].mxu0 %vm382_vm1, %v966_v43  ;;  %v623_v52 = vmax.f32 %v577_v39, 0.0  ;;  %v569_v56 = vadd.f32 %v5962_v34, %v568_v27 }
 0x12c   : > { %v802_v28 = vsel %vm5969_vm5, 0, %v727_v41  ;;  %847 = vst.msk [vmem:[#allocation2 + $0xb8] sm:$0xff] %vm382_vm1, %v817_v51  ;;  %v978_v58 = vsel %vm894_vm2, %v6134_v32, %v977_v46  ;;  %v980_v59 = vshrl.u32 %v6137_v40, 16  ;;  %v982_v60 = vshll.u32 %v6137_v40, 16  ;;  %v6179_v14 = vld [vmem:[#allocation2 + $0xa0] sm:$0xff] }
 0x12d   : > { %848 = vst.msk [vmem:[#allocation2 + $0xc0] sm:$0xff] %vm382_vm1, %v802_v28  ;;  %v801_v0 = vsel %vm5969_vm5, 0, %v720_v49  ;;  %5022 = vmatprep.mubr.msk.bf16.mxu0 %vm382_vm1, %v978_v58  ;;  %v641_v1 = vpack.c.bf16 %v623_v52, %v622_v23  ;;  %v621_v2 = vmax.f32 %v569_v56, 0.0  ;;  %v5006_v5 = vpop.f32.mrb[28].mxu0  ;;  %v987_v6 = vshll.u32 %v6143_v48, 16  ;;  %v6171_v8 = vld [vmem:[#allocation2 + $0x90] sm:$0xff] }
 0x12e   : > { %846 = vst.msk [vmem:[#allocation2 + $0xb0] sm:$0xff] %vm382_vm1, %v801_v0  ;;  %v590_v9 = vadd.f32 %v5006_v5, %v5962_v34  ;;  %v984_v10 = vrot.slane %v982_v60, 1  ;;  %v581_v11 = vpop.f32.mrb[29].mxu0  ;;  %v992_v12 = vshrl.u32 %v6150_v57, 16  ;;  %v994_v13 = vshll.u32 %v6150_v57, 16  ;;  %5128 = vmatprep.mubr.msk.bf16.mxu1 %vm382_vm1, %v6171_v8 }
 0x12f   : > { %v736_v15 = vshrl.u32 %v641_v1, 16  ;;  %v739_v18 = vshll.u32 %v641_v1, 16  ;;  %v640_v20 = vpack.c.bf16 %v621_v2, %v620_v37  ;;  %v989_v22 = vrot.slane %v987_v6, 1  ;;  %v5007_v23 = vpop.f32.mrb[30].mxu0  ;;  %5129 = vmatmul.mubr.msk.bf16.vlgmr.msra.gmra.mrb[0].mxu1 %vm382_vm1, %v6179_v14  ;;  %v6198_v60 = vld [vmem:[#allocation2 + $0x98] sm:$0x1] }
 0x130   : > { %v626_v26 = vmax.f32 %v590_v9, 0.0  ;;  %v6183_v27 = vor.u32 %v984_v10, %v980_v59  ;;  %v582_v35 = vadd.f32 %v5962_v34, %v581_v11  ;;  %v996_v39 = vrot.slane %v994_v13, 1  ;;  %5145 = vmatpush3.bf16.msra.mxu1 %v5993_v24  ;;  %v584_v41 = vpop.f32.mrb[31].mxu0  ;;  %v6204_v6 = vld [vmem:[#allocation2 + $0xa8] sm:$0x1] }
 0x131   : > { %v738_v33 = vrot.slane %v736_v15, 7  ;;  %v729_v43 = vshrl.u32 %v640_v20, 16  ;;  %v732_v46 = vshll.u32 %v640_v20, 16  ;;  %v999_v49 = vshll.u32 %v6159_v61, 16  ;;  %5613 = vmatprep.subr.msk.bf16.mxu1 %vm431_vm0, %v6164_v62 }
 0x132   : > { %v990_v37 = vsel %vm894_vm2, %v6183_v27, %v989_v22  ;;  %v624_v51 = vmax.f32 %v582_v35, 0.0  ;;  %v6192_v52 = vor.u32 %v996_v39, %v992_v12  ;;  %v593_v56 = vadd.f32 %v5007_v23, %v5962_v34 }
 0x133   : > { %v741_v28 = vor.u32 %v739_v18, %v738_v33  ;;  %v820_v24 = vsel %vm5969_vm5, %v738_v33, 0  ;;  %v731_v58 = vrot.slane %v729_v43, 7  ;;  %5023 = vmatmul.mubr.msk.bf16.gmra.mrb[44].mxu0 %vm382_vm1, %v990_v37  ;;  %v1001_v59 = vrot.slane %v999_v49, 1 }
 0x134   : > { %853 = vst.msk [vmem:[#allocation2 + $0xe8] sm:$0xff] %vm382_vm1, %v820_v24  ;;  %v627_v0 = vmax.f32 %v593_v56, 0.0  ;;  %v585_v1 = vadd.f32 %v5962_v34, %v584_v41  ;;  %v1004_v2 = vshrl.u32 %v6171_v8, 16  ;;  %v1006_v5 = vshll.u32 %v6171_v8, 16  ;;  %v6220_v22 = vld [vmem:[#allocation2 + $0xc0] sm:$0xff] }
 0x135   : > { %v804_v9 = vsel %vm5969_vm5, 0, %v741_v28  ;;  %v734_v10 = vor.u32 %v732_v46, %v731_v58  ;;  %v819_v11 = vsel %vm5969_vm5, %v731_v58, 0  ;;  %v1002_v12 = vsel %vm894_vm2, %v6192_v52, %v1001_v59  ;;  %v6212_v13 = vld [vmem:[#allocation2 + $0xb0] sm:$0xff]  ;;  %v6232_v46 = vld [vmem:[#allocation2 + $0xb8] sm:$0x1] }
 0x136   : > { %852 = vst.msk [vmem:[#allocation2 + $0xe0] sm:$0xff] %vm382_vm1, %v804_v9  ;;  %851 = vst.msk [vmem:[#allocation2 + $0xd8] sm:$0xff] %vm382_vm1, %v819_v11  ;;  %5026 = vmatprep.mubr.msk.bf16.mxu0 %vm382_vm1, %v1002_v12  ;;  %v643_v34 = vpack.c.bf16 %v627_v0, %v626_v26  ;;  %v625_v15 = vmax.f32 %v585_v1, 0.0  ;;  %v1008_v18 = vrot.slane %v1006_v5, 1  ;;  %v1011_v20 = vshll.u32 %v6198_v60, 16  ;;  %5132 = vmatprep.mubr.msk.bf16.mxu1 %vm382_vm1, %v6212_v13 }
 0x137   : > { %v803_v23 = vsel %vm5969_vm5, 0, %v734_v10  ;;  %v1018_v35 = vshll.u32 %v6179_v14, 16  ;;  %v1023_v39 = vshll.u32 %v6204_v6, 16  ;;  %5133 = vmatmul.mubr.msk.bf16.gmra.mrb[4].mxu1 %vm382_vm1, %v6220_v22  ;;  %v1016_v43 = vshrl.u32 %v6179_v14, 16  ;;  %v6236_v1 = vld [vmem:[#allocation2 + $0xc8] sm:$0x1] }
 0x138   : > { %850 = vst.msk [vmem:[#allocation2 + $0xd0] sm:$0xff] %vm382_vm1, %v803_v23  ;;  %v750_v26 = vshrl.u32 %v643_v34, 16  ;;  %v642_v41 = vpack.c.bf16 %v625_v15, %v624_v51  ;;  %v6229_v33 = vor.u32 %v1008_v18, %v1004_v2  ;;  %v753_v49 = vshll.u32 %v643_v34, 16 }
 0x139   : > { %v1013_v37 = vrot.slane %v1011_v20, 1  ;;  %v1020_v56 = vrot.slane %v1018_v35, 1  ;;  %v1025_v28 = vrot.slane %v1023_v39, 1  ;;  %v1028_v59 = vshrl.u32 %v6212_v13, 16 }
 0x13a   : > { %v752_v24 = vrot.slane %v750_v26, 7  ;;  %v743_v58 = vshrl.u32 %v642_v41, 16  ;;  %v1030_v0 = vshll.u32 %v6212_v13, 16  ;;  %v746_v5 = vshll.u32 %v642_v41, 16 }
 0x13b   : > { %v1014_v51 = vsel %vm894_vm2, %v6229_v33, %v1013_v37  ;;  %v6240_v2 = vor.u32 %v1020_v56, %v1016_v43  ;;  %v1035_v9 = vshll.u32 %v6232_v46, 16  ;;  %v1042_v18 = vshll.u32 %v6220_v22, 16 }
 0x13c   : > { %v755_v10 = vor.u32 %v753_v49, %v752_v24  ;;  %v822_v11 = vsel %vm5969_vm5, %v752_v24, 0  ;;  %v745_v12 = vrot.slane %v743_v58, 7  ;;  %5027 = vmatmul.mubr.msk.bf16.gmra.mrb[48].mxu0 %vm382_vm1, %v1014_v51  ;;  %v1032_v34 = vrot.slane %v1030_v0, 1 }
 0x13d   : > { %857 = vst.msk [vmem:[#allocation2 + $0x108] sm:$0xff] %vm382_vm1, %v822_v11  ;;  %v1026_v15 = vsel %vm894_vm2, %v6240_v2, %v1025_v28  ;;  %v1047_v20 = vshll.u32 %v6236_v1, 16  ;;  %v6258_v41 = vld [vmem:[#allocation2 + $0xe0] sm:$0xff]  ;;  %v1037_v43 = vrot.slane %v1035_v9, 1  ;;  %v1040_v49 = vshrl.u32 %v6220_v22, 16 }
 0x13e   : > { %v806_v23 = vsel %vm5969_vm5, 0, %v755_v10  ;;  %v748_v35 = vor.u32 %v746_v5, %v745_v12  ;;  %v821_v39 = vsel %vm5969_vm5, %v745_v12, 0  ;;  %5030 = vmatprep.mubr.msk.bf16.mxu0 %vm382_vm1, %v1026_v15  ;;  %v6256_v26 = vor.u32 %v1032_v34, %v1028_v59  ;;  %v6269_v24 = vld [vmem:[#allocation2 + $0xd8] sm:$0x1]  ;;  %v6284_v12 = vld [vmem:[#allocation2 + $0xe8] sm:$0x1] }
 0x13f   : > { %856 = vst.msk [vmem:[#allocation2 + $0x100] sm:$0xff] %vm382_vm1, %v806_v23  ;;  %855 = vst.msk [vmem:[#allocation2 + $0xf8] sm:$0xff] %vm382_vm1, %v821_v39  ;;  %v1044_v37 = vrot.slane %v1042_v18, 1  ;;  %v6263_v56 = vld [vmem:[#allocation2 + $0xd0] sm:$0xff]  ;;  %v1066_v53 = vshll.u32 %v6258_v41, 16  ;;  %v1049_v51 = vrot.slane %v1047_v20, 1 }
 0x140   : > { %v805_v28 = vsel %vm5969_vm5, 0, %v748_v35  ;;  %5136 = vmatprep.mubr.msk.bf16.mxu1 %vm382_vm1, %v6263_v56  ;;  %7121 = vst [vmem:[#allocation6_spill] sm:$0xff] %v6269_v24  ;;  %v1054_v58 = vshll.u32 %v6263_v56, 16  ;;  %v1038_v59 = vsel %vm894_vm2, %v6256_v26, %v1037_v43  ;;  %v6280_v5 = vld [vmem:[#allocation2 + $0x18] sm:$0x1]  ;;  %v1052_v10 = vshrl.u32 %v6263_v56, 16 }
 0x141   : > { %854 = vst.msk [vmem:[#allocation2 + $0xf0] sm:$0xff] %vm382_vm1, %v805_v28  ;;  %v6275_v0 = vor.u32 %v1044_v37, %v1040_v49  ;;  %5137 = vmatmul.mubr.msk.bf16.gmra.mrb[8].mxu1 %vm382_vm1, %v6258_v41  ;;  %v1059_v11 = vshll.u32 %v6269_v24, 16  ;;  %7122 = vst [vmem:[#allocation7_spill] sm:$0xff] %v6284_v12  ;;  %v1068_v15 = vrot.slane %v1066_v53, 1  ;;  %v2142_v18 = vshll.u32 %v6280_v5, 16 }
 0x142   : > { %v1056_v9 = vrot.slane %v1054_v58, 1  ;;  %v1064_v20 = vshrl.u32 %v6258_v41, 16  ;;  %v1071_v35 = vshll.u32 %v6284_v12, 16  ;;  %v6301_v58 = vld [vmem:[#allocation2 + $0x28] sm:$0x1] }
 0x143   : > { %v1050_v34 = vsel %vm894_vm2, %v6275_v0, %v1049_v51  ;;  %v1061_v39 = vrot.slane %v1059_v11, 1  ;;  %v2144_v37 = vrot.slane %v2142_v18, 1  ;;  %v6335_v24 = vld [vmem:[#allocation2 + $0x58] sm:$0x1] }
 0x144   : > { %5031 = vmatmul.mubr.msk.bf16.gmra.mrb[52].mxu0 %vm382_vm1, %v1038_v59  ;;  %v6291_v23 = vor.u32 %v1056_v9, %v1052_v10  ;;  %v6295_v43 = vor.u32 %v1068_v15, %v1064_v20  ;;  %v6310_v9 = vld [vmem:[#allocation2 + $0x38] sm:$0x1]  ;;  %v1073_v10 = vrot.slane %v1071_v35, 1  ;;  %v2154_v20 = vshll.u32 %v6301_v58, 16 }
 0x145   : > { %5034 = vmatprep.mubr.msk.bf16.mxu0 %vm382_vm1, %v1050_v34  ;;  %v2145_v11 = vsel %vm894_vm2, %v6035_v16, %v2144_v37 }
 0x146   : > { %v6299_v28 = vld [vmem:[#allocation2 + $0xf8] sm:$0x1]  ;;  %v1062_v59 = vsel %vm894_vm2, %v6291_v23, %v1061_v39  ;;  %v6307_v53 = vld [vmem:[#allocation2 + $0x100] sm:$0xff]  ;;  %v1074_v35 = vsel %vm894_vm2, %v6295_v43, %v1073_v10  ;;  %v2166_v39 = vshll.u32 %v6310_v9, 16  ;;  %v2156_v37 = vrot.slane %v2154_v20, 1 }
 0x147   : > { %7123 = vst [vmem:[#allocation8_spill] sm:$0xff] %v6299_v28  ;;  %v1083_v18 = vshll.u32 %v6299_v28, 16  ;;  %v6329_v28 = vld [vmem:[#allocation2 + $0x48] sm:$0x1] }
 0x148   : > { %v6297_v49 = vld [vmem:[#allocation2 + $0xf0] sm:$0xff]  ;;  %v2157_v10 = vsel %vm894_vm2, %v6042_v21, %v2156_v37  ;;  %v2190_v21 = vshll.u32 %v6335_v24, 16  ;;  %v1645_v37 = vsel %vm431_vm0, %v6064_v47, 0 }
 0x149   : > { %5140 = vmatprep.mubr.msk.bf16.mxu1 %vm382_vm1, %v6297_v49  ;;  %v1078_v51 = vshll.u32 %v6297_v49, 16  ;;  %v1076_v34 = vshrl.u32 %v6297_v49, 16  ;;  %v1085_v16 = vrot.slane %v1083_v18, 1 }
 0x14a   : > { %5141 = vmatmul.mubr.msk.bf16.gmra.mrb[12].mxu1 %vm382_vm1, %v6307_v53  ;;  %v2192_v20 = vrot.slane %v2190_v21, 1 }
 0x14b   : > { %5146 = vmatprep.mubr.msk.bf16.mxu1 %vm382_vm1, %v2145_v11  ;;  %v1080_v15 = vrot.slane %v1078_v51, 1  ;;  %v2719_v51 = vsel %vm431_vm0, %v6164_v62, 0  ;;  %v2168_v11 = vrot.slane %v2166_v39, 1  ;;  %v6357_v39 = vld [vmem:[#allocation2 + $0x78] sm:$0x1] }
 0x14c   : > { %5035 = vmatmul.mubr.msk.bf16.gmra.mrb[56].mxu0 %vm382_vm1, %v1062_v59 }
 0x14d   : > { %5038 = vmatprep.mubr.msk.bf16.mxu0 %vm382_vm1, %v1074_v35  ;;  %v6325_v12 = vor.u32 %v1080_v15, %v1076_v34  ;;  %v6340_v34 = vld [vmem:[%s7109_s3 + $0xc] sm:$0x3]  ;;  %v2169_v62 = vsel %vm894_vm2, %v6086_v7, %v2168_v11  ;;  %v2178_v15 = vshll.u32 %v6329_v28, 16  ;;  %v6353_v35 = vld [vmem:[#allocation2 + $0x68] sm:$0x1] }
 0x14e   : > { %v6373_v11 = vld [vmem:[#allocation2 + $0x88] sm:$0x1] }
 0x14f   : > { %v1086_v59 = vsel %vm894_vm2, %v6325_v12, %v1085_v16  ;;  %v2180_v18 = vrot.slane %v2178_v15, 1  ;;  %v2193_v16 = vsel %vm894_vm2, %v6131_v25, %v2192_v20  ;;  %v6405_v20 = vld [vmem:[#allocation2 + $0xc8] sm:$0x1] }
 0x151   : > { %v2181_v7 = vsel %vm894_vm2, %v6103_v44, %v2180_v18 }
 0x152   : > { %5147 = vmatmul.mubr.msk.bf16.vlgmr.msra.gmra.mrb[16].mxu1 %vm382_vm1, %v2157_v10 }
 0x153   : > { %5179 = vmatpush3.bf16.msra.mxu1 %v2719_v51  ;;  %5150 = vmatprep.mubr.msk.bf16.mxu1 %vm382_vm1, %v2169_v62  ;;  %v2214_v51 = vshll.u32 %v6357_v39, 16  ;;  %v6389_v62 = vld [vmem:[#allocation2 + $0xa8] sm:$0x1] }
 0x154   : > { %5039 = vmatmul.mubr.msk.bf16.gmra.mrb[60].mxu0 %vm382_vm1, %v1086_v59  ;;  %5614 = vmatprep.subr.msk.bf16.mxu1 %vm431_vm0, %v6340_v34  ;;  %v6377_v59 = vld [vmem:[#allocation2 + $0x98] sm:$0x1] }
 0x155   : > { %5044 = vmatprep.mubr.msk.bf16.mxu0 %vm382_vm1, %v5922_v19  ;;  %v2202_v19 = vshll.u32 %v6353_v35, 16  ;;  %v2216_v25 = vrot.slane %v2214_v51, 1 }
 0x157   : > { %v2204_v44 = vrot.slane %v2202_v19, 1  ;;  %v6421_v19 = vld [vmem:[#allocation2 + $0xe8] sm:$0x1] }
 0x159   : > { %v2205_v47 = vsel %vm894_vm2, %v6134_v32, %v2204_v44 }
 0x15a   : > { %5151 = vmatmul.mubr.msk.bf16.gmra.mrb[20].mxu1 %vm382_vm1, %v2181_v7 }
 0x15b   : > { %5154 = vmatprep.mubr.msk.bf16.mxu1 %vm382_vm1, %v2193_v16 }
 0x15c   : > { %5045 = vmatmul.mubr.msk.bf16.vlgmr.msra.gmra.mrb[32].mxu0 %vm382_vm1, %v6019_v50  ;;  %v2217_v50 = vsel %vm894_vm2, %v6183_v27, %v2216_v25  ;;  %v6393_v27 = vld [vmem:[#allocation2 + $0xb8] sm:$0x1] }
 0x15d   : > { %5048 = vmatprep.mubr.msk.bf16.mxu0 %vm382_vm1, %v6013_v45  ;;  %5077 = vmatpush3.bf16.msra.mxu0 %v1645_v37  ;;  %v2226_v45 = vshll.u32 %v6373_v11, 16 }
 0x15e   : > { %5610 = vmatprep.subr.msk.bf16.mxu0 %vm431_vm0, %v5936_v30  ;;  %v2238_v30 = vshll.u32 %v6377_v59, 16 }
 0x15f   : > { %v2228_v32 = vrot.slane %v2226_v45, 1  ;;  %v6438_v45 = vld [vmem:[#allocation2 + $0x108] sm:$0x1] }
 0x160   : > { %v2240_v10 = vrot.slane %v2238_v30, 1 }
 0x161   : > { %v2229_v15 = vsel %vm894_vm2, %v6192_v52, %v2228_v32 }
 0x162   : > { %5155 = vmatmul.mubr.msk.bf16.gmra.mrb[24].mxu1 %vm382_vm1, %v2205_v47  ;;  %v2241_v21 = vsel %vm894_vm2, %v6229_v33, %v2240_v10  ;;  %v6409_v33 = vld [vmem:[#allocation2 + $0xd8] sm:$0x1]  ;;  %v2315_v10 = vshrl.u32 %v6307_v53, 16 }
 0x163   : > { %5158 = vmatprep.mubr.msk.bf16.mxu1 %vm382_vm1, %v2217_v50 }
 0x164   : > { %5049 = vmatmul.mubr.msk.bf16.gmra.mrb[36].mxu0 %vm382_vm1, %v6049_v29  ;;  %v2250_v29 = vshll.u32 %v6389_v62, 16 }
 0x165   : > { %5052 = vmatprep.mubr.msk.bf16.mxu0 %vm382_vm1, %v6068_v55  ;;  %v2262_v55 = vshll.u32 %v6393_v27, 16 }
 0x166   : > { %v2252_v52 = vrot.slane %v2250_v29, 1 }
 0x167   : > { %v2264_v18 = vrot.slane %v2262_v55, 1 }
 0x168   : > { %v2253_v7 = vsel %vm894_vm2, %v6240_v2, %v2252_v52  ;;  %v2621_v52 = vrot.slane %v6280_v5, 1 }
 0x169   : > { %v2265_v16 = vsel %vm894_vm2, %v6256_v26, %v2264_v18  ;;  %v6425_v26 = vld [vmem:[#allocation2 + $0xf8] sm:$0x1] }
 0x16a   : > { %5159 = vmatmul.mubr.msk.bf16.gmra.mrb[28].mxu1 %vm382_vm1, %v2229_v15  ;;  %v2310_v25 = vshll.u32 %v6425_v26, 16  ;;  %v2322_v15 = vshll.u32 %v6438_v45, 16 }
 0x16b   : > { %5162 = vmatprep.mubr.msk.bf16.mxu1 %vm382_vm1, %v2241_v21  ;;  %v2572_v21 = vld [vmem:[#allocation2 + $0x10] sm:$0xfe] }
 0x16c   : > { %5053 = vmatmul.mubr.msk.bf16.gmra.mrb[40].mxu0 %vm382_vm1, %v6100_v36  ;;  %v2274_v36 = vshll.u32 %v6405_v20, 16  ;;  %v2312_v50 = vrot.slane %v2310_v25, 1  ;;  %v2620_v29 = vrot.slane %v2572_v21, 1  ;;  %v2324_v55 = vrot.slane %v2322_v15, 1 }
 0x16d   : > { %5056 = vmatprep.mubr.msk.bf16.mxu0 %vm382_vm1, %v6109_v54  ;;  %v2286_v54 = vshll.u32 %v6409_v33, 16  ;;  %v2627_v25 = vrot.slane %v6310_v9, 1  ;;  %v1498_v9 = vld [vmem:[#allocation2 + $0x10] sm:$0xfe]  ;;  %v2630_v21 = vrot.slane %v6329_v28, 1 }
 0x16e   : > { %v2276_v2 = vrot.slane %v2274_v36, 1  ;;  %v2313_v32 = vsel %vm894_vm2, %v6325_v12, %v2312_v50  ;;  %v2622_v18 = vsel %vm1545_vm6, %v2620_v29, %v2621_v52  ;;  %v1497_v36 = vld [vmem:[#allocation2] sm:$0xfe]  ;;  %v1549_v15 = vrot.slane %v1498_v9, 1  ;;  %v1500_v28 = vld [vmem:[#allocation2 + $0x30] sm:$0xfe] }
 0x16f   : > { %v2288_v37 = vrot.slane %v2286_v54, 1  ;;  %v1546_v5 = vrot.slane %v1497_v36, 1  ;;  %v2633_v29 = vrot.slane %v6335_v24, 1  ;;  %v2578_v36 = vld [vmem:[#allocation2 + $0x70] sm:$0xfe]  ;;  %v2642_v9 = vrot.slane %v6373_v11, 1 }
 0x170   : > { %v2277_v51 = vsel %vm894_vm2, %v6275_v0, %v2276_v2  ;;  %v2317_v0 = vshll.u32 %v6307_v53, 16 }
 0x171   : > { %v2289_v44 = vsel %vm894_vm2, %v6291_v23, %v2288_v37  ;;  %v5677_v37 = vld [vmem:[#allocation2 + $0x8] sm:$0x1] }
 0x172   : > { %5163 = vmatmul.mubr.msk.bf16.gmra.mrb[0].mxu1 %vm382_vm1, %v2253_v7  ;;  %v2319_v30 = vrot.slane %v2317_v0, 1  ;;  %v2573_v7 = vld [vmem:[#allocation2 + $0x20] sm:$0xfe] }
 0x173   : > { %5166 = vmatprep.mubr.msk.bf16.mxu1 %vm382_vm1, %v2265_v16  ;;  %v2574_v16 = vld [vmem:[#allocation2 + $0x30] sm:$0xfe]  ;;  %v2623_v54 = vrot.slane %v2573_v7, 1  ;;  %v2577_v7 = vld [vmem:[#allocation2 + $0x60] sm:$0xfe] }
 0x174   : > { %5057 = vmatmul.mubr.msk.bf16.gmra.mrb[44].mxu0 %vm382_vm1, %v6137_v40  ;;  %v2298_v40 = vshll.u32 %v6421_v19, 16  ;;  %v2626_v2 = vrot.slane %v2574_v16, 1 }
 0x175   : > { %5060 = vmatprep.mubr.msk.bf16.mxu0 %vm382_vm1, %v6150_v57 }
 0x176   : > { %v2300_v47 = vrot.slane %v2298_v40, 1  ;;  %v2982_v40 = vsel %vm431_vm0, %v6340_v34, 0  ;;  %v2628_v50 = vsel %vm1545_vm6, %v2626_v2, %v2627_v25  ;;  %v1499_v34 = vld [vmem:[#allocation2 + $0x20] sm:$0xfe]  ;;  %v1555_v2 = vrot.slane %v1500_v28, 1 }
 0x177   : > { %v1559_v25 = vrot.slane %v6075_v63, 1 }
 0x178   : > { %v2301_v23 = vsel %vm894_vm2, %v6295_v43, %v2300_v47  ;;  %v2320_v43 = vor.u32 %v2319_v30, %v2315_v10  ;;  %v6469_v47 = vld [vmem:[%s7109_s3 + $0xe] sm:$0x3]  ;;  %v2575_v30 = vld [vmem:[#allocation2 + $0x40] sm:$0xfe] }
 0x17a   : > { %5167 = vmatmul.mubr.msk.bf16.gmra.mrb[4].mxu1 %vm382_vm1, %v2277_v51  ;;  %v2325_v12 = vsel %vm894_vm2, %v2320_v43, %v2324_v55  ;;  %v1547_v51 = vrot.slane %v5677_v37, 1  ;;  %v1552_v43 = vrot.slane %v1499_v34, 1  ;;  %v1550_v55 = vrot.slane %v6007_v42, 1  ;;  %v1501_v42 = vld [vmem:[#allocation2 + $0x40] sm:$0xfe] }
 0x17b   : > { %5170 = vmatprep.mubr.msk.bf16.mxu1 %vm382_vm1, %v2289_v44  ;;  %v2624_v44 = vrot.slane %v6301_v58, 1  ;;  %v2576_v58 = vld [vmem:[#allocation2 + $0x50] sm:$0xfe]  ;;  %v1558_v37 = vrot.slane %v1501_v42, 1  ;;  %v1571_v42 = vrot.slane %v6159_v61, 1 }
 0x17c   : > { %5061 = vmatmul.mubr.msk.bf16.gmra.mrb[48].mxu0 %vm382_vm1, %v6171_v8  ;;  %v2632_v10 = vrot.slane %v2576_v58, 1  ;;  %v1551_v16 = vsel %vm1545_vm6, %v1549_v15, %v1550_v55 }
 0x17d   : > { %5064 = vmatprep.mubr.msk.bf16.mxu0 %vm382_vm1, %v6179_v14  ;;  %v2625_v0 = vsel %vm1545_vm6, %v2623_v54, %v2624_v44  ;;  %v2635_v54 = vrot.slane %v2577_v7, 1  ;;  %v1556_v44 = vrot.slane %v6037_v17, 1  ;;  %v1503_v17 = vld [vmem:[#allocation2 + $0x60] sm:$0xfe]  ;;  %v2648_v7 = vrot.slane %v6389_v62, 1 }
 0x17e   : > { %v1564_v34 = vrot.slane %v1503_v17, 1  ;;  %v2586_v17 = vld [vmem:[#allocation2 + $0xf0] sm:$0xfe] }
 0x182   : > { %5171 = vmatmul.mubr.msk.bf16.gmra.mrb[8].mxu1 %vm382_vm1, %v2301_v23  ;;  %v1548_v23 = vsel %vm1545_vm6, %v1546_v5, %v1547_v51  ;;  %v2636_v5 = vrot.slane %v6353_v35, 1  ;;  %v2639_v51 = vrot.slane %v6357_v39, 1  ;;  %v1560_v35 = vsel %vm1545_vm6, %v1558_v37, %v1559_v25  ;;  %v1502_v39 = vld [vmem:[#allocation2 + $0x50] sm:$0xfe] }
 0x183   : > { %5174 = vmatprep.mubr.msk.bf16.mxu1 %vm382_vm1, %v2313_v32  ;;  %v2629_v32 = vrot.slane %v2575_v30, 1  ;;  %v1561_v58 = vrot.slane %v1502_v39, 1  ;;  %v2657_v25 = vrot.slane %v6409_v33, 1  ;;  %v1508_v33 = vld [vmem:[#allocation2 + $0xb0] sm:$0xfe] }
 0x184   : > { %5065 = vmatmul.mubr.msk.bf16.gmra.mrb[52].mxu0 %vm382_vm1, %v6212_v13 }
 0x185   : > { %5068 = vmatprep.mubr.msk.bf16.mxu0 %vm382_vm1, %v6220_v22  ;;  %v2631_v52 = vsel %vm1545_vm6, %v2629_v32, %v2630_v21  ;;  %v2645_v32 = vrot.slane %v6377_v59, 1  ;;  %v1565_v21 = vrot.slane %v6124_v3, 1  ;;  %v1504_v59 = vld [vmem:[#allocation2 + $0x70] sm:$0xfe] }
 0x187   : > { %v1566_v11 = vsel %vm1545_vm6, %v1564_v34, %v1565_v21  ;;  %v2663_v34 = vrot.slane %v6425_v26, 1  ;;  %v1510_v26 = vld [vmem:[#allocation2 + $0xd0] sm:$0xfe] }
 0x18a   : > { %5175 = vmatmul.mubr.msk.bf16.gmra.mrb[12].mxu1 %vm382_vm1, %v2325_v12  ;;  %v1553_v12 = vrot.slane %v6002_v38, 1  ;;  %v2638_v38 = vrot.slane %v2578_v36, 1  ;;  %v2651_v36 = vrot.slane %v6393_v27, 1  ;;  %v1506_v27 = vld [vmem:[#allocation2 + $0x90] sm:$0xfe] }
 0x18b   : > { %5180 = vmatprep.mubr.msk.bf16.mxu1 %vm382_vm1, %v2622_v18  ;;  %v2634_v18 = vsel %vm1545_vm6, %v2632_v10, %v2633_v29  ;;  %v1562_v10 = vrot.slane %v6081_v4, 1  ;;  %v2581_v29 = vld [vmem:[#allocation2 + $0xa0] sm:$0xfe] }
 0x18c   : > { %5069 = vmatmul.mubr.msk.bf16.gmra.mrb[56].mxu0 %vm382_vm1, %v6263_v56  ;;  %v1554_v24 = vsel %vm1545_vm6, %v1552_v43, %v1553_v12  ;;  %v1505_v4 = vld [vmem:[#allocation2 + $0x80] sm:$0xfe]  ;;  %v2647_v12 = vrot.slane %v2581_v29, 1 }
 0x18d   : > { %5072 = vmatprep.mubr.msk.bf16.mxu0 %vm382_vm1, %v6258_v41  ;;  %v1563_v55 = vsel %vm1545_vm6, %v1561_v58, %v1562_v10  ;;  %v2660_v58 = vrot.slane %v6421_v19, 1 }
 0x18e   : > { %v2649_v28 = vsel %vm1545_vm6, %v2647_v12, %v2648_v7  ;;  %v2915_v7 = vld [vmem:[#allocation2 + $0x20] sm:$0xff] }
 0x192   : > { %5181 = vmatmul.mubr.msk.bf16.vlgmr.msra.gmra.mrb[16].mxu1 %vm382_vm1, %v2625_v0  ;;  %v2640_v0 = vsel %vm1545_vm6, %v2638_v38, %v2639_v51  ;;  %v2583_v38 = vld [vmem:[#allocation2 + $0xc0] sm:$0xfe]  ;;  %v1573_v51 = vrot.slane %v1506_v27, 1  ;;  %v1840_v27 = vld [vmem:[#allocation2 + $0x10] sm:$0xff] }
 0x193   : > { %5213 = vmatpush3.bf16.msra.mxu1 %v2982_v40  ;;  %5184 = vmatprep.mubr.msk.bf16.mxu1 %vm382_vm1, %v2628_v50  ;;  %v2637_v40 = vsel %vm1545_vm6, %v2635_v54, %v2636_v5  ;;  %v2579_v50 = vld [vmem:[#allocation2 + $0x80] sm:$0xfe]  ;;  %v2584_v5 = vld [vmem:[#allocation2 + $0xd0] sm:$0xfe]  ;;  %v2653_v37 = vrot.slane %v2583_v38, 1 }
 0x194   : > { %5073 = vmatmul.mubr.msk.bf16.gmra.mrb[60].mxu0 %vm382_vm1, %v6297_v49  ;;  %5615 = vmatprep.subr.msk.bf16.mxu1 %vm431_vm0, %v6469_v47  ;;  %v2641_v30 = vrot.slane %v2579_v50, 1  ;;  %v2656_v61 = vrot.slane %v2584_v5, 1  ;;  %v2916_v38 = vld [vmem:[#allocation2 + $0x30] sm:$0xff]  ;;  %v2917_v5 = vld [vmem:[#allocation2 + $0x40] sm:$0xff] }
 0x195   : > { %5078 = vmatprep.mubr.msk.bf16.mxu0 %vm382_vm1, %v1548_v23  ;;  %v2580_v23 = vld [vmem:[#allocation2 + $0x90] sm:$0xfe] }
 0x196   : > { %v2644_v63 = vrot.slane %v2580_v23, 1  ;;  %v2643_v15 = vsel %vm1545_vm6, %v2641_v30, %v2642_v9  ;;  %v2658_v23 = vsel %vm1545_vm6, %v2656_v61, %v2657_v25 }
 0x198   : > { %v2646_v43 = vsel %vm1545_vm6, %v2644_v63, %v2645_v32  ;;  %v1579_v63 = vrot.slane %v1508_v33, 1  ;;  %v1580_v32 = vrot.slane %v6232_v46, 1  ;;  %v1511_v46 = vld [vmem:[#allocation2 + $0xe0] sm:$0xfe] }
 0x19a   : > { %5185 = vmatmul.mubr.msk.bf16.gmra.mrb[20].mxu1 %vm382_vm1, %v2631_v52  ;;  %v2582_v52 = vld [vmem:[#allocation2 + $0xb0] sm:$0xfe]  ;;  %v1581_v29 = vsel %vm1545_vm6, %v1579_v63, %v1580_v32  ;;  %v6639_v32 = vld [vmem:[#allocation2 + $0x68] sm:$0x1] }
 0x19b   : > { %5188 = vmatprep.mubr.msk.bf16.mxu1 %vm382_vm1, %v2634_v18  ;;  %v2650_v3 = vrot.slane %v2582_v52, 1  ;;  %v1567_v18 = vrot.slane %v1504_v59, 1  ;;  %v1585_v52 = vrot.slane %v1510_v26, 1  ;;  %v7124_v59 = vld [vmem:[#allocation6_spill] sm:$0xff] }
 0x19c   : > { %5079 = vmatmul.mubr.msk.bf16.vlgmr.msra.gmra.mrb[32].mxu0 %vm382_vm1, %v1551_v16  ;;  %v1570_v16 = vrot.slane %v1505_v4, 1  ;;  %v1586_v4 = vrot.slane %v7124_v59, 1  ;;  %v6650_v59 = vld [vmem:[#allocation2 + $0x78] sm:$0x1] }
 0x19d   : > { %5082 = vmatprep.mubr.msk.bf16.mxu0 %vm382_vm1, %v1554_v24  ;;  %5111 = vmatpush3.bf16.msra.mxu0 %v5942_v31  ;;  %v1557_v31 = vsel %vm1545_vm6, %v1555_v2, %v1556_v44  ;;  %v1568_v24 = vrot.slane %v6143_v48, 1  ;;  %v2652_v54 = vsel %vm1545_vm6, %v2650_v3, %v2651_v36  ;;  %v1507_v48 = vld [vmem:[#allocation2 + $0xa0] sm:$0xfe]  ;;  %v2654_v44 = vrot.slane %v6405_v20, 1  ;;  %v7125_v3 = vld [vmem:[#allocation7_spill] sm:$0xff] }
 0x19e   : > { %v1572_v62 = vsel %vm1545_vm6, %v1570_v16, %v1571_v42  ;;  %v1587_v16 = vsel %vm1545_vm6, %v1585_v52, %v1586_v4  ;;  %v7126_v42 = vld [vmem:[#allocation8_spill] sm:$0xff] }
 0x19f   : > { %v1569_v2 = vsel %vm1545_vm6, %v1567_v18, %v1568_v24  ;;  %v2655_v50 = vsel %vm1545_vm6, %v2653_v37, %v2654_v44  ;;  %v1589_v18 = vrot.slane %v7125_v3, 1  ;;  %v1512_v24 = vld [vmem:[#allocation2 + $0xf0] sm:$0xfe]  ;;  %v6653_v3 = vld [vmem:[#allocation2 + $0x88] sm:$0x1] }
 0x1a0   : > { %v6585_v37 = vld [vmem:[#allocation2 + $0x70] sm:$0xff] }
 0x1a2   : > { %5189 = vmatmul.mubr.msk.bf16.gmra.mrb[24].mxu1 %vm382_vm1, %v2637_v40  ;;  %v1576_v40 = vrot.slane %v1507_v48, 1  ;;  %v6579_v48 = vld [vmem:[#allocation2 + $0x60] sm:$0xff] }
 0x1a3   : > { %5192 = vmatprep.mubr.msk.bf16.mxu1 %vm382_vm1, %v2640_v0  ;;  %v1574_v0 = vrot.slane %v6198_v60, 1  ;;  %v1509_v60 = vld [vmem:[#allocation2 + $0xc0] sm:$0xfe] }
 0x1a4   : > { %5083 = vmatmul.mubr.msk.bf16.gmra.mrb[36].mxu0 %vm382_vm1, %v1557_v31  ;;  %v1577_v31 = vrot.slane %v6204_v6, 1  ;;  %v2662_v6 = vrot.slane %v2586_v17, 1  ;;  %v1582_v9 = vrot.slane %v1509_v60, 1  ;;  %v3260_v60 = vshll.u32 %v6579_v48, 16 }
 0x1a5   : > { %5086 = vmatprep.mubr.msk.bf16.mxu0 %vm382_vm1, %v1560_v35  ;;  %v2585_v35 = vld [vmem:[#allocation2 + $0xe0] sm:$0xfe]  ;;  %v1575_v39 = vsel %vm1545_vm6, %v1573_v51, %v1574_v0  ;;  %v3224_v51 = vshll.u32 %v2916_v38, 16 }
 0x1a6   : > { %v1578_v20 = vsel %vm1545_vm6, %v1576_v40, %v1577_v31  ;;  %v2659_v30 = vrot.slane %v2585_v35, 1  ;;  %v2664_v21 = vsel %vm1545_vm6, %v2662_v6, %v2663_v34  ;;  %v3236_v40 = vshll.u32 %v2917_v5, 16 }
 0x1a7   : > { %v3226_v0 = vrot.slane %v3224_v51, 1  ;;  %v3222_v31 = vshrl.u32 %v2916_v38, 16  ;;  %v3234_v35 = vshrl.u32 %v2917_v5, 16 }
 0x1a8   : > { %v2661_v10 = vsel %vm1545_vm6, %v2659_v30, %v2660_v58  ;;  %v6636_v58 = vld [vmem:[#allocation2 + $0x58] sm:$0x1] }
 0x1a9   : > { %v3227_v17 = vor.u32 %v3226_v0, %v3222_v31 }
 0x1aa   : > { %5193 = vmatmul.mubr.msk.bf16.gmra.mrb[28].mxu1 %vm382_vm1, %v2643_v15  ;;  %v1583_v15 = vrot.slane %v6236_v1, 1  ;;  %v2666_v1 = vrot.slane %v6438_v45, 1  ;;  %v1591_v45 = vrot.slane %v1512_v24, 1  ;;  %v3277_v24 = vshll.u32 %v6650_v59, 16 }
 0x1ab   : > { %5196 = vmatprep.mubr.msk.bf16.mxu1 %vm382_vm1, %v2646_v43  ;;  %v2587_v43 = vld [vmem:[#allocation2 + $0x100] sm:$0xfe] }
 0x1ac   : > { %5087 = vmatmul.mubr.msk.bf16.gmra.mrb[40].mxu0 %vm382_vm1, %v1563_v55  ;;  %v1584_v19 = vsel %vm1545_vm6, %v1582_v9, %v1583_v15  ;;  %v2665_v55 = vrot.slane %v2587_v43, 1  ;;  %v3262_v15 = vrot.slane %v3260_v60, 1  ;;  %v3253_v43 = vshll.u32 %v6636_v58, 16 }
 0x1ad   : > { %5090 = vmatprep.mubr.msk.bf16.mxu0 %vm382_vm1, %v1566_v11  ;;  %v1588_v11 = vrot.slane %v1511_v46, 1  ;;  %v3272_v46 = vshll.u32 %v6585_v37, 16 }
 0x1ae   : > { %v2667_v12 = vsel %vm1545_vm6, %v2665_v55, %v2666_v1  ;;  %v3255_v1 = vrot.slane %v3253_v43, 1 }
 0x1af   : > { %v1590_v36 = vsel %vm1545_vm6, %v1588_v11, %v1589_v18 }
 0x1b2   : > { %5197 = vmatmul.mubr.msk.bf16.gmra.mrb[0].mxu1 %vm382_vm1, %v2649_v28  ;;  %v3452_v28 = vsel %vm431_vm0, %v6469_v47, 0  ;;  %v6575_v47 = vld [vmem:[#allocation2 + $0x50] sm:$0xff] }
 0x1b3   : > { %5200 = vmatprep.mubr.msk.bf16.mxu1 %vm382_vm1, %v2652_v54  ;;  %v1592_v54 = vrot.slane %v7126_v42, 1  ;;  %v3289_v42 = vshll.u32 %v6653_v3, 16 }
 0x1b4   : > { %5091 = vmatmul.mubr.msk.bf16.gmra.mrb[44].mxu0 %vm382_vm1, %v1569_v2  ;;  %v4745_v2 = vld [vmem:[%s7109_s3 + $0x10] sm:$0x3] }
 0x1b5   : > { %5094 = vmatprep.mubr.msk.bf16.mxu0 %vm382_vm1, %v1572_v62  ;;  %v1593_v62 = vsel %vm1545_vm6, %v1591_v45, %v1592_v54  ;;  %v3794_v6 = vsel %vm431_vm0, %v4745_v2, 0  ;;  %v3193_v45 = vld [vmem:[#allocation2 + $0xa0] sm:$0xff] }
 0x1ba   : > { %5201 = vmatmul.mubr.msk.bf16.gmra.mrb[4].mxu1 %vm382_vm1, %v2655_v50  ;;  %v6625_v50 = vld [vmem:[#allocation2 + $0x48] sm:$0x1] }
 0x1bb   : > { %5204 = vmatprep.mubr.msk.bf16.mxu1 %vm382_vm1, %v2658_v23 }
 0x1bc   : > { %5095 = vmatmul.mubr.msk.bf16.gmra.mrb[48].mxu0 %vm382_vm1, %v1575_v39  ;;  %v3241_v39 = vshll.u32 %v6625_v50, 16 }
 0x1bd   : > { %5098 = vmatprep.mubr.msk.bf16.mxu0 %vm382_vm1, %v1578_v20  ;;  %v3248_v20 = vshll.u32 %v6575_v47, 16 }
 0x1be   : > { %v3243_v63 = vrot.slane %v3241_v39, 1  ;;  %v6672_v39 = vld [vmem:[#allocation2 + $0xb8] sm:$0x1] }
 0x1bf   : > { %v3250_v34 = vrot.slane %v3248_v20, 1 }
 0x1c2   : > { %5205 = vmatmul.mubr.msk.bf16.gmra.mrb[8].mxu1 %vm382_vm1, %v2661_v10 }
 0x1c3   : > { %5208 = vmatprep.mubr.msk.bf16.mxu1 %vm382_vm1, %v2664_v21  ;;  %v3246_v21 = vshrl.u32 %v6575_v47, 16 }
 0x1c4   : > { %5099 = vmatmul.mubr.msk.bf16.gmra.mrb[52].mxu0 %vm382_vm1, %v1581_v29  ;;  %v3258_v29 = vshrl.u32 %v6579_v48, 16 }
 0x1c5   : > { %5102 = vmatprep.mubr.msk.bf16.mxu0 %vm382_vm1, %v1584_v19  ;;  %v3265_v19 = vshll.u32 %v6639_v32, 16  ;;  %v3251_v26 = vor.u32 %v3250_v34, %v3246_v21  ;;  %v3201_v34 = vld [vmem:[#allocation2 + $0xe0] sm:$0xff] }
 0x1c6   : > { %v3263_v55 = vor.u32 %v3262_v15, %v3258_v29 }
 0x1c7   : > { %v3267_v11 = vrot.slane %v3265_v19, 1  ;;  %v3256_v4 = vsel %vm894_vm2, %v3251_v26, %v3255_v1  ;;  %v3356_v19 = vshll.u32 %v3201_v34, 16 }
 0x1c9   : > { %v3268_v18 = vsel %vm894_vm2, %v3263_v55, %v3267_v11  ;;  %v6682_v55 = vld [vmem:[#allocation2 + $0xd8] sm:$0x1]  ;;  %v6685_v11 = vld [vmem:[#allocation2 + $0xe8] sm:$0x1] }
 0x1ca   : > { %5209 = vmatmul.mubr.msk.bf16.gmra.mrb[12].mxu1 %vm382_vm1, %v2667_v12  ;;  %v3274_v12 = vrot.slane %v3272_v46, 1 }
 0x1cb   : > { %5214 = vmatprep.mubr.msk.bf16.mxu1 %vm382_vm1, %v2915_v7 }
 0x1cc   : > { %5103 = vmatmul.mubr.msk.bf16.gmra.mrb[56].mxu0 %vm382_vm1, %v1587_v16  ;;  %v3191_v16 = vld [vmem:[#allocation2 + $0x90] sm:$0xff] }
 0x1cd   : > { %5106 = vmatprep.mubr.msk.bf16.mxu0 %vm382_vm1, %v1590_v36  ;;  %v3270_v36 = vshrl.u32 %v6585_v37, 16 }
 0x1cf   : > { %v3275_v54 = vor.u32 %v3274_v12, %v3270_v36  ;;  %v3358_v12 = vrot.slane %v3356_v19, 1  ;;  %v3205_v36 = vld [vmem:[#allocation2 + $0x100] sm:$0xff] }
 0x1d0   : > { %v4082_v19 = vld [vmem:[%s5868_s21 + $0x20] sm:$0xff] }
 0x1d2   : > { %5215 = vmatmul.mubr.msk.bf16.vlgmr.msra.gmra.mrb[16].mxu1 %vm382_vm1, %v2916_v38 }
 0x1d3   : > { %5247 = vmatpush3.bf16.msra.mxu1 %v3452_v28  ;;  %5218 = vmatprep.mubr.msk.bf16.mxu1 %vm382_vm1, %v2917_v5 }
 0x1d4   : > { %5107 = vmatmul.mubr.msk.bf16.gmra.mrb[60].mxu0 %vm382_vm1, %v1593_v62  ;;  %5616 = vmatprep.subr.msk.bf16.mxu1 %vm431_vm0, %v4745_v2  ;;  %v3279_v62 = vrot.slane %v3277_v24, 1  ;;  %v3354_v24 = vshrl.u32 %v3201_v34, 16  ;;  %v4081_v34 = vld [vmem:[%s5868_s21 + $0x18] sm:$0xff] }
 0x1d5   : > { %5112 = vmatprep.mubr.msk.bf16.mxu0 %vm382_vm1, %v1840_v27  ;;  %v3291_v27 = vrot.slane %v3289_v42, 1 }
 0x1da   : > { %5219 = vmatmul.mubr.msk.bf16.gmra.mrb[20].mxu1 %vm382_vm1, %v6575_v47 }
 0x1db   : > { %5222 = vmatprep.mubr.msk.bf16.mxu1 %vm382_vm1, %v6579_v48 }
 0x1dc   : > { %5113 = vmatmul.mubr.msk.bf16.vlgmr.msra.gmra.mrb[32].mxu0 %vm382_vm1, %v2915_v7 }
 0x1dd   : > { %5116 = vmatprep.mubr.msk.bf16.mxu0 %vm382_vm1, %v2916_v38  ;;  %v3296_v38 = vshll.u32 %v3191_v16, 16 }
 0x1e2   : > { %5223 = vmatmul.mubr.msk.bf16.gmra.mrb[24].mxu1 %vm382_vm1, %v6585_v37 }
 0x1e3   : > { %5226 = vmatprep.mubr.msk.bf16.mxu1 %vm382_vm1, %v6150_v57  ;;  %v6604_v57 = vld [vmem:[#allocation2 + $0x80] sm:$0xff] }
 0x1e4   : > { %5117 = vmatmul.mubr.msk.bf16.gmra.mrb[36].mxu0 %vm382_vm1, %v2917_v5  ;;  %v3284_v52 = vshll.u32 %v6604_v57, 16  ;;  %v3282_v28 = vshrl.u32 %v6604_v57, 16  ;;  %v3308_v5 = vshll.u32 %v3193_v45, 16 }
 0x1e5   : > { %5120 = vmatprep.mubr.msk.bf16.mxu0 %vm382_vm1, %v6575_v47  ;;  %v6662_v47 = vld [vmem:[#allocation2 + $0x98] sm:$0x1] }
 0x1e6   : > { %v3301_v51 = vshll.u32 %v6662_v47, 16 }
 0x1ea   : > { %5227 = vmatmul.mubr.msk.bf16.gmra.mrb[28].mxu1 %vm382_vm1, %v6171_v8  ;;  %v3212_v8 = vshll.u32 %v2915_v7, 16 }
 0x1eb   : > { %5230 = vmatprep.mubr.msk.bf16.mxu1 %vm382_vm1, %v6179_v14  ;;  %v6614_v14 = vld [vmem:[#allocation2 + $0x28] sm:$0x1] }
 0x1ec   : > { %5121 = vmatmul.mubr.msk.bf16.gmra.mrb[40].mxu0 %vm382_vm1, %v6579_v48  ;;  %v3217_v61 = vshll.u32 %v6614_v14, 16  ;;  %v3280_v48 = vsel %vm894_vm2, %v3275_v54, %v3279_v62  ;;  %v3359_v54 = vor.u32 %v3358_v12, %v3354_v24  ;;  %v6692_v62 = vld [vmem:[#allocation2 + $0xf8] sm:$0x1] }
 0x1ed   : > { %5124 = vmatprep.mubr.msk.bf16.mxu0 %vm382_vm1, %v6585_v37  ;;  %v4085_v24 = vld [vmem:[%s5868_s21 + $0x38] sm:$0xff] }
 0x1ee   : > { %v3219_v25 = vrot.slane %v3217_v61, 1  ;;  %v3294_v61 = vshrl.u32 %v3191_v16, 16  ;;  %v3349_v16 = vshll.u32 %v6682_v55, 16 }
 0x1f2   : > { %5231 = vmatmul.mubr.msk.bf16.gmra.mrb[0].mxu1 %vm382_vm1, %v6212_v13  ;;  %v3214_v13 = vrot.slane %v3212_v8, 1  ;;  %v3298_v8 = vrot.slane %v3296_v38, 1  ;;  %v3380_v38 = vshll.u32 %v3205_v36, 16 }
 0x1f3   : > { %5234 = vmatprep.mubr.msk.bf16.mxu1 %vm382_vm1, %v6220_v22  ;;  %v3210_v22 = vshrl.u32 %v2915_v7, 16  ;;  %v3286_v7 = vrot.slane %v3284_v52, 1 }
 0x1f4   : > { %5125 = vmatmul.mubr.msk.bf16.gmra.mrb[44].mxu0 %vm382_vm1, %v6604_v57  ;;  %v3310_v57 = vrot.slane %v3308_v5, 1  ;;  %v3299_v0 = vor.u32 %v3298_v8, %v3294_v61  ;;  %v6695_v8 = vld [vmem:[#allocation2 + $0x108] sm:$0x1]  ;;  %v4078_v61 = vld [vmem:[%s5868_s21] sm:$0xff] }
 0x1f5   : > { %v3215_v44 = vor.u32 %v3214_v13, %v3210_v22  ;;  %v3287_v2 = vor.u32 %v3286_v7, %v3282_v28  ;;  %v6665_v13 = vld [vmem:[#allocation2 + $0xa8] sm:$0x1]  ;;  %v3195_v22 = vld [vmem:[#allocation2 + $0xb0] sm:$0xff] }
 0x1f7   : > { %v3292_v37 = vsel %vm894_vm2, %v3287_v2, %v3291_v27  ;;  %v3351_v2 = vrot.slane %v3349_v16, 1  ;;  %v3696_v16 = vrot.slane %v6614_v14, 1 }
 0x1fa   : > { %5235 = vmatmul.mubr.msk.bf16.gmra.mrb[4].mxu1 %vm382_vm1, %v6263_v56  ;;  %v6621_v56 = vld [vmem:[#allocation2 + $0x110] sm:$0xff] }
 0x1fb   : > { %5238 = vmatprep.mubr.msk.bf16.mxu1 %vm382_vm1, %v6258_v41  ;;  %v6623_v41 = vld [vmem:[#allocation2 + $0x38] sm:$0x1] }
 0x1fc   : > { %v3229_v23 = vshll.u32 %v6623_v41, 16 }
 0x1fe   : > { %v3231_v30 = vrot.slane %v3229_v23, 1  ;;  %v3303_v23 = vrot.slane %v3301_v51, 1  ;;  %v4079_v51 = vld [vmem:[%s5868_s21 + $0x8] sm:$0xff] }
 0x200   : > { %v3232_v9 = vsel %vm894_vm2, %v3227_v17, %v3231_v30  ;;  %v3304_v17 = vsel %vm894_vm2, %v3299_v0, %v3303_v23  ;;  %v4110_v0 = vmax.f32 %v4078_v61, 0.0  ;;  %v4092_v61 = vld [vmem:[%s5868_s21 + $0x70] sm:$0xff] }
 0x202   : > { %5239 = vmatmul.mubr.msk.bf16.gmra.mrb[8].mxu1 %vm382_vm1, %v6297_v49  ;;  %v3220_v49 = vsel %vm894_vm2, %v3215_v44, %v3219_v25  ;;  %v3197_v44 = vld [vmem:[#allocation2 + $0xc0] sm:$0xff]  ;;  %v3313_v25 = vshll.u32 %v6665_v13, 16 }
 0x203   : > { %5242 = vmatprep.mubr.msk.bf16.mxu1 %vm382_vm1, %v6307_v53  ;;  %v3238_v53 = vrot.slane %v3236_v40, 1  ;;  %v3306_v40 = vshrl.u32 %v3193_v45, 16  ;;  %v3332_v31 = vshll.u32 %v3197_v44, 16  ;;  %v3361_v45 = vshll.u32 %v6685_v11, 16 }
 0x205   : > { %v3239_v33 = vor.u32 %v3238_v53, %v3234_v35  ;;  %v3311_v53 = vor.u32 %v3310_v57, %v3306_v40  ;;  %v3315_v35 = vrot.slane %v3313_v25, 1  ;;  %v3334_v30 = vrot.slane %v3332_v31, 1  ;;  %v6703_v40 = vld [vmem:[#allocation2 + $0x118] sm:$0x1] }
 0x206   : > { %v3363_v5 = vrot.slane %v3361_v45, 1  ;;  %v3392_v25 = vshll.u32 %v6621_v56, 16  ;;  %v3385_v31 = vshll.u32 %v6695_v8, 16  ;;  %v3648_v45 = vld [vmem:[#allocation2 + $0x30] sm:$0xfe] }
 0x207   : > { %v3244_v10 = vsel %vm894_vm2, %v3239_v33, %v3243_v63  ;;  %v6675_v33 = vld [vmem:[#allocation2 + $0xc8] sm:$0x1]  ;;  %v3316_v60 = vsel %vm894_vm2, %v3311_v53, %v3315_v35  ;;  %v3318_v63 = vshrl.u32 %v3195_v22, 16  ;;  %v3378_v53 = vshrl.u32 %v3205_v36, 16  ;;  %v4084_v36 = vld [vmem:[%s5868_s21 + $0x30] sm:$0xff] }
 0x208   : > { %v3337_v15 = vshll.u32 %v6675_v33, 16 }
 0x20a   : > { %5243 = vmatmul.mubr.msk.bf16.gmra.mrb[12].mxu1 %vm382_vm1, %v6621_v56  ;;  %v3339_v46 = vrot.slane %v3337_v15, 1 }
 0x20b   : > { %5248 = vmatprep.mubr.msk.bf16.mxu1 %vm382_vm1, %v3220_v49  ;;  %v3320_v49 = vshll.u32 %v3195_v22, 16  ;;  %v3382_v22 = vrot.slane %v3380_v38, 1 }
 0x20d   : > { %v3322_v20 = vrot.slane %v3320_v49, 1  ;;  %v4111_v49 = vmax.f32 %v4079_v51, 0.0  ;;  %v4093_v51 = vld [vmem:[%s5868_s21 + $0x78] sm:$0xff] }
 0x20f   : > { %v3323_v21 = vor.u32 %v3322_v20, %v3318_v63  ;;  %v4142_v35 = vpack.c.bf16 %v4111_v49, %v4110_v0  ;;  %v3397_v20 = vshll.u32 %v6703_v40, 16  ;;  %v3387_v63 = vrot.slane %v3385_v31, 1  ;;  %v4090_v49 = vld [vmem:[%s5868_s21 + $0x60] sm:$0xff] }
 0x210   : > { %v4124_v0 = vmax.f32 %v4092_v61, 0.0 }
 0x211   : > { %4174 = vrot.lane.b32.xlu0 %v4142_v35, %s5759_s17  ;;  %v4122_v35 = vmax.f32 %v4090_v49, 0.0  ;;  %v4106_v49 = vld [vmem:[%s5868_s21 + $0xe0] sm:$0xff] }
 0x212   : > { %5249 = vmatmul.mubr.msk.bf16.vlgmr.msra.gmra.mrb[16].mxu1 %vm382_vm1, %v3232_v9  ;;  %v3325_v9 = vshll.u32 %v6672_v39, 16 }
 0x213   : > { %5281 = vmatpush3.bf16.msra.mxu1 %v3794_v6  ;;  %5252 = vmatprep.mubr.msk.bf16.mxu1 %vm382_vm1, %v3244_v10  ;;  %v3199_v6 = vld [vmem:[#allocation2 + $0xd0] sm:$0xff]  ;;  %v3330_v10 = vshrl.u32 %v3197_v44, 16  ;;  %v3373_v44 = vshll.u32 %v6692_v62, 16 }
 0x214   : > { %v3344_v43 = vshll.u32 %v3199_v6, 16  ;;  %v3327_v26 = vrot.slane %v3325_v9, 1  ;;  %v3342_v7 = vshrl.u32 %v3199_v6, 16  ;;  %v3394_v6 = vrot.slane %v3392_v25, 1  ;;  %v4080_v9 = vld [vmem:[%s5868_s21 + $0x10] sm:$0xff] }
 0x215   : > { %v3335_v29 = vor.u32 %v3334_v30, %v3330_v10  ;;  %v3390_v30 = vshrl.u32 %v6621_v56, 16  ;;  %v4112_v15 = vmax.f32 %v4080_v9, 0.0  ;;  %v4083_v56 = vld [vmem:[%s5868_s21 + $0x28] sm:$0xff]  ;;  %v4097_v9 = vld [vmem:[%s5868_s21 + $0x98] sm:$0xff] }
 0x216   : > { %v3328_v52 = vsel %vm894_vm2, %v3323_v21, %v3327_v26  ;;  %v3346_v1 = vrot.slane %v3344_v43, 1  ;;  %v4113_v21 = vmax.f32 %v4081_v34, 0.0  ;;  %v3699_v34 = vrot.slane %v6623_v41, 1  ;;  %v4099_v41 = vld [vmem:[%s5868_s21 + $0xa8] sm:$0xff] }
 0x217   : > { %v3395_v26 = vor.u32 %v3394_v6, %v3390_v30 }
 0x218   : > { %v3347_v28 = vor.u32 %v3346_v1, %v3342_v7  ;;  %v4114_v1 = vmax.f32 %v4082_v19, 0.0  ;;  %v3650_v19 = vld [vmem:[#allocation2 + $0x50] sm:$0xfe] }
 0x21a   : > { %5253 = vmatmul.mubr.msk.bf16.gmra.mrb[20].mxu1 %vm382_vm1, %v3256_v4  ;;  %v3340_v4 = vsel %vm894_vm2, %v3335_v29, %v3339_v46  ;;  %v3352_v27 = vsel %vm894_vm2, %v3347_v28, %v3351_v2  ;;  %v3399_v29 = vrot.slane %v3397_v20, 1  ;;  %v3647_v46 = vld [vmem:[#allocation2 + $0x20] sm:$0xfe]  ;;  %v4088_v2 = vld [vmem:[%s5868_s21 + $0x50] sm:$0xff] }
 0x21b   : > { %5256 = vmatprep.mubr.msk.bf16.mxu1 %vm382_vm1, %v3268_v18  ;;  %v3203_v18 = vld [vmem:[#allocation2 + $0xf0] sm:$0xff]  ;;  %v3649_v28 = vld [vmem:[#allocation2 + $0x40] sm:$0xfe] }
 0x21c   : > { %v3368_v42 = vshll.u32 %v3203_v18, 16  ;;  %v3366_v57 = vshrl.u32 %v3203_v18, 16  ;;  %v3695_v18 = vrot.slane %v3647_v46, 1  ;;  %v3400_v7 = vsel %vm894_vm2, %v3395_v26, %v3399_v29  ;;  %v4094_v20 = vld [vmem:[%s5868_s21 + $0x80] sm:$0xff] }
 0x21d   : > { %v3701_v30 = vrot.slane %v3649_v28, 1  ;;  %v4129_v46 = vmax.f32 %v4097_v9, 0.0 }
 0x21e   : > { %v3697_v38 = vsel %vm1545_vm6, %v3695_v18, %v3696_v16  ;;  %v3651_v18 = vld [vmem:[#allocation2 + $0x60] sm:$0xfe] }
 0x222   : > { %5257 = vmatmul.mubr.msk.bf16.gmra.mrb[24].mxu1 %vm382_vm1, %v3280_v48  ;;  %v3370_v48 = vrot.slane %v3368_v42, 1  ;;  %v4116_v42 = vmax.f32 %v4084_v36, 0.0 }
 0x223   : > { %5260 = vmatprep.mubr.msk.bf16.mxu1 %vm382_vm1, %v3292_v37  ;;  %v3364_v37 = vsel %vm894_vm2, %v3359_v54, %v3363_v5  ;;  %v4117_v54 = vmax.f32 %v4085_v24, 0.0  ;;  %v4089_v5 = vld [vmem:[%s5868_s21 + $0x58] sm:$0xff]  ;;  %v4131_v24 = vmax.f32 %v4099_v41, 0.0 }
 0x224   : > { %v3371_v23 = vor.u32 %v3370_v48, %v3366_v57  ;;  %v4120_v48 = vmax.f32 %v4088_v2, 0.0  ;;  %v4087_v57 = vld [vmem:[%s5868_s21 + $0x48] sm:$0xff] }
 0x225   : > { %v4145_v14 = vpack.c.bf16 %v4117_v54, %v4116_v42  ;;  %v4119_v25 = vmax.f32 %v4087_v57, 0.0  ;;  %v4103_v2 = vld [vmem:[%s5868_s21 + $0xc8] sm:$0xff] }
 0x226   : > { %v4135_v61 = vmax.f32 %v4103_v2, 0.0  ;;  %v3661_v2 = vld [vmem:[#allocation2 + $0x100] sm:$0xfe] }
 0x22a   : > { %5261 = vmatmul.mubr.msk.bf16.gmra.mrb[28].mxu1 %vm382_vm1, %v3304_v17  ;;  %v3383_v17 = vor.u32 %v3382_v22, %v3378_v53  ;;  %v4091_v53 = vld [vmem:[%s5868_s21 + $0x68] sm:$0xff] }
 0x22b   : > { %5264 = vmatprep.mubr.msk.bf16.mxu1 %vm382_vm1, %v3316_v60  ;;  %v3375_v60 = vrot.slane %v3373_v44, 1  ;;  %v3698_v44 = vrot.slane %v3648_v45, 1  ;;  %v3704_v45 = vrot.slane %v3650_v19, 1 }
 0x22c   : > { %v3388_v43 = vsel %vm894_vm2, %v3383_v17, %v3387_v63  ;;  %v4123_v17 = vmax.f32 %v4091_v53, 0.0  ;;  %v4096_v63 = vld [vmem:[%s5868_s21 + $0x90] sm:$0xff]  ;;  %v4107_v53 = vld [vmem:[%s5868_s21 + $0xe8] sm:$0xff] }
 0x22d   : > { %v3376_v10 = vsel %vm894_vm2, %v3371_v23, %v3375_v60  ;;  %v4125_v23 = vmax.f32 %v4093_v51, 0.0  ;;  %v4095_v60 = vld [vmem:[%s5868_s21 + $0x88] sm:$0xff]  ;;  %v3700_v29 = vsel %vm1545_vm6, %v3698_v44, %v3699_v34  ;;  %v4128_v26 = vmax.f32 %v4096_v63, 0.0 }
 0x22f   : > { %v4151_v28 = vpack.c.bf16 %v4129_v46, %v4128_v26  ;;  %v3655_v26 = vld [vmem:[#allocation2 + $0xa0] sm:$0xfe]  ;;  %v3717_v46 = vrot.slane %v6662_v47, 1 }
 0x232   : > { %5265 = vmatmul.mubr.msk.bf16.gmra.mrb[0].mxu1 %vm382_vm1, %v3328_v52  ;;  %v4143_v52 = vpack.c.bf16 %v4113_v21, %v4112_v15  ;;  %v4148_v15 = vpack.c.bf16 %v4123_v17, %v4122_v35  ;;  %v4126_v21 = vmax.f32 %v4094_v20, 0.0  ;;  %v3653_v35 = vld [vmem:[#allocation2 + $0x80] sm:$0xfe]  ;;  %v4138_v20 = vmax.f32 %v4106_v49, 0.0 }
 0x233   : > { %5268 = vmatprep.mubr.msk.bf16.mxu1 %vm382_vm1, %v3340_v4  ;;  %v4115_v4 = vmax.f32 %v4083_v56, 0.0  ;;  %v4149_v56 = vpack.c.bf16 %v4125_v23, %v4124_v0  ;;  %v4109_v23 = vld [vmem:[%s5868_s21 + $0xf8] sm:$0xff]  ;;  %v3713_v34 = vrot.slane %v3653_v35, 1 }
 0x234   : > { %4176 = vrot.lane.b32.xlu0 %v4143_v52, %s5759_s17  ;;  %v4098_v52 = vld [vmem:[%s5868_s21 + $0xa0] sm:$0xff]  ;;  %v4141_v9 = vmax.f32 %v4109_v23, 0.0 }
 0x235   : > { %v4144_v12 = vpack.c.bf16 %v4115_v4, %v4114_v1  ;;  %v4100_v1 = vld [vmem:[%s5868_s21 + $0xb0] sm:$0xff]  ;;  %v4101_v4 = vld [vmem:[%s5868_s21 + $0xb8] sm:$0xff]  ;;  %v4130_v36 = vmax.f32 %v4098_v52, 0.0  ;;  %v3720_v52 = vrot.slane %v6665_v13, 1 }
 0x236   : > { %v4132_v42 = vmax.f32 %v4100_v1, 0.0  ;;  %v4133_v54 = vmax.f32 %v4101_v4, 0.0  ;;  %v3656_v1 = vld [vmem:[#allocation2 + $0xb0] sm:$0xfe]  ;;  %v3657_v4 = vld [vmem:[#allocation2 + $0xc0] sm:$0xfe] }
 0x237   : > { %4178 = vrot.lane.b32.xlu1 %v4144_v12, %s5759_s17  ;;  %v4254_v12 = vld [vmem:[%s7111_s5] sm:$0xf]  ;;  %v4152_v57 = vpack.c.bf16 %v4131_v24, %v4130_v36  ;;  %v3658_v36 = vld [vmem:[#allocation2 + $0xd0] sm:$0xfe] }
 0x238   : > { %5617 = vmatprep.subr.msk.bf16.mxu0 %vm4295_vm7, %v4254_v12  ;;  %v4153_v44 = vpack.c.bf16 %v4133_v54, %v4132_v42  ;;  %v3659_v24 = vld [vmem:[#allocation2 + $0xe0] sm:$0xfe]  ;;  %v3729_v42 = vrot.slane %v6682_v55, 1  ;;  %v3732_v54 = vrot.slane %v6685_v11, 1 }
 0x23a   : > { %5269 = vmatmul.mubr.msk.bf16.gmra.mrb[4].mxu1 %vm382_vm1, %v3352_v27  ;;  %v4086_v27 = vld [vmem:[%s5868_s21 + $0x40] sm:$0xff] }
 0x23b   : > { %5272 = vmatprep.mubr.msk.bf16.mxu1 %vm382_vm1, %v3364_v37  ;;  %v4121_v37 = vmax.f32 %v4089_v5, 0.0  ;;  %v4118_v22 = vmax.f32 %v4086_v27, 0.0  ;;  %4180 = vrot.lane.b32.xlu1 %v4145_v14, %s5759_s17  ;;  %v3707_v5 = vrot.slane %v3651_v18, 1  ;;  %v4104_v27 = vld [vmem:[%s5868_s21 + $0xd0] sm:$0xff]  ;;  %v4105_v14 = vld [vmem:[%s5868_s21 + $0xd8] sm:$0xff]  ;;  %v3725_v18 = vrot.slane %v3657_v4, 1 }
 0x23c   : > { %v4137_v0 = vmax.f32 %v4105_v14, 0.0  ;;  %v3735_v14 = vrot.slane %v6692_v62, 1 }
 0x23d   : > { %v4147_v31 = vpack.c.bf16 %v4121_v37, %v4120_v48  ;;  %v4146_v6 = vpack.c.bf16 %v4119_v25, %v4118_v22  ;;  %v3705_v48 = vrot.slane %v6636_v58, 1  ;;  %v3708_v37 = vrot.slane %v6639_v32, 1  ;;  %v3652_v32 = vld [vmem:[#allocation2 + $0x70] sm:$0xfe] }
 0x23e   : > { %v4136_v25 = vmax.f32 %v4104_v27, 0.0  ;;  %v3737_v27 = vrot.slane %v3661_v2, 1 }
 0x23f   : > { %4182 = vrot.lane.b32.xlu0 %v4146_v6, %s5759_s17  ;;  %4184 = vrot.lane.b32.xlu1 %v4147_v31, %s5759_s17  ;;  %v3706_v51 = vsel %vm1545_vm6, %v3704_v45, %v3705_v48  ;;  %v3709_v58 = vsel %vm1545_vm6, %v3707_v5, %v3708_v37  ;;  %v4108_v31 = vld [vmem:[%s5868_s21 + $0xf0] sm:$0xff]  ;;  %v3728_v45 = vrot.slane %v3658_v36, 1  ;;  %v3738_v48 = vrot.slane %v6695_v8, 1 }
 0x240   : > { %v4155_v6 = vpack.c.bf16 %v4137_v0, %v4136_v25  ;;  %v4140_v63 = vmax.f32 %v4108_v31, 0.0  ;;  %v3662_v37 = vld [vmem:[#allocation2 + $0x110] sm:$0xfe] }
 0x241   : > { %v3739_v11 = vsel %vm1545_vm6, %v3737_v27, %v3738_v48 }
 0x242   : > { %5273 = vmatmul.mubr.msk.bf16.gmra.mrb[8].mxu1 %vm382_vm1, %v3376_v10  ;;  %v3702_v10 = vrot.slane %v6625_v50, 1 }
 0x243   : > { %5276 = vmatprep.mubr.msk.bf16.mxu1 %vm382_vm1, %v3388_v43  ;;  %v4127_v43 = vmax.f32 %v4095_v60, 0.0  ;;  %4186 = vrot.lane.b32.xlu0 %v4148_v15, %s5759_s17  ;;  %v4139_v60 = vmax.f32 %v4107_v53, 0.0  ;;  %v3714_v15 = vrot.slane %v6653_v3, 1  ;;  %v3719_v3 = vrot.slane %v3655_v26, 1 }
 0x244   : > { %v3703_v50 = vsel %vm1545_vm6, %v3701_v30, %v3702_v10  ;;  %4188 = vrot.lane.b32.xlu1 %v4149_v56, %s5759_s17  ;;  %v3710_v30 = vrot.slane %v3652_v32, 1  ;;  %v3711_v10 = vrot.slane %v6650_v59, 1  ;;  %v3654_v56 = vld [vmem:[#allocation2 + $0x90] sm:$0xfe] }
 0x245   : > { %v4150_v16 = vpack.c.bf16 %v4127_v43, %v4126_v21  ;;  %v4156_v21 = vpack.c.bf16 %v4139_v60, %v4138_v20  ;;  %v3715_v19 = vsel %vm1545_vm6, %v3713_v34, %v3714_v15  ;;  %v3716_v59 = vrot.slane %v3654_v56, 1 }
 0x246   : > { %v3712_v43 = vsel %vm1545_vm6, %v3710_v30, %v3711_v10 }
 0x247   : > { %4190 = vrot.lane.b32.xlu0 %v4150_v16, %s5759_s17  ;;  %v3718_v41 = vsel %vm1545_vm6, %v3716_v59, %v3717_v46  ;;  %v3726_v16 = vrot.slane %v6675_v33, 1 }
 0x248   : > { %4192 = vrot.lane.b32.xlu1 %v4151_v28, %s5759_s17  ;;  %v3731_v28 = vrot.slane %v3659_v24, 1 }
 0x249   : > { %v3727_v13 = vsel %vm1545_vm6, %v3725_v18, %v3726_v16 }
 0x24a   : > { %5277 = vmatmul.mubr.msk.bf16.gmra.mrb[12].mxu1 %vm382_vm1, %v3400_v7  ;;  %v4297_v7 = vsel %vm4295_vm7, %v4254_v12, 0  ;;  %v3722_v12 = vrot.slane %v3656_v1, 1  ;;  %v3733_v33 = vsel %vm1545_vm6, %v3731_v28, %v3732_v54 }
 0x24b   : > { %5282 = vmatprep.mubr.msk.bf16.mxu1 %vm382_vm1, %v3697_v38  ;;  %5315 = vmatpush3.bf16.msra.mxu0 %v4297_v7  ;;  %v4102_v38 = vld [vmem:[%s5868_s21 + $0xc0] sm:$0xff]  ;;  %v3723_v7 = vrot.slane %v6672_v39, 1  ;;  %v3730_v39 = vsel %vm1545_vm6, %v3728_v45, %v3729_v42  ;;  %s5760_s21 = smov [#allocation3]  }
 0x24c   : > { %v4134_v22 = vmax.f32 %v4102_v38, 0.0  ;;  %4194 = vrot.lane.b32.xlu0 %v4152_v57, %s5759_s17  ;;  %4196 = vrot.lane.b32.xlu1 %v4153_v44, %s5759_s17  ;;  %v3660_v38 = vld [vmem:[#allocation2 + $0xf0] sm:$0xfe]  ;;  %v3740_v57 = vrot.slane %v3662_v37, 1  ;;  %s5682_s20 = sshll.u32 %s5760_s21, 4  ;;  %s5683_s20 = int_to_ptr.vmem [resolvable:$false] %s5682_s20 }
 0x24d   : > { %v3724_v47 = vsel %vm1545_vm6, %v3722_v12, %v3723_v7  ;;  %v3734_v5 = vrot.slane %v3660_v38, 1  ;;  %s5684_s23 = scalar_lea.vmem %s5683_s20, 8192  ;;  %p5685_p1 = scmp.lt.s32.totalorder %s7049_s15, %s5683_s20 }
 0x24e   : > { %v4154_v17 = vpack.c.bf16 %v4135_v61, %v4134_v22  ;;  %v3741_v22 = vrot.slane %v6703_v40, 1  ;;  %p5686_p2 = scmp.lt.s32.totalorder %s5684_s23, %s5678_s19 }
 0x24f   : > { %v3736_v55 = vsel %vm1545_vm6, %v3734_v5, %v3735_v14 }
 0x250   : > { %4198 = vrot.lane.b32.xlu0 %v4154_v17, %s5759_s17  ;;  %4200 = vrot.lane.b32.xlu1 %v4155_v6, %s5759_s17  ;;  %v3742_v61 = vsel %vm1545_vm6, %v3740_v57, %v3741_v22  ;;  %p5687_p3 = por %p5686_p2, %p5685_p1 }
 0x252   : > { %5283 = vmatmul.mubr.msk.bf16.vlgmr.msra.gmra.mrb[16].mxu1 %vm382_vm1, %v3700_v29  ;;  %v4157_v29 = vpack.c.bf16 %v4141_v9, %v4140_v63  ;;  %p5688_p5 = pnand %p5687_p3, %p5681_p0 }
 0x253   : > { %5286 = vmatprep.mubr.msk.bf16.mxu1 %vm382_vm1, %v3703_v50  ;;  %v3721_v50 = vsel %vm1545_vm6, %v3719_v3, %v3720_v52  ;;  %v6857_v52 = vld [vmem:[%s7110_s4] ss:$0 sm:$0xff] }
 0x254   : > { %4202 = vrot.lane.b32.xlu0 %v4156_v21, %s5759_s17  ;;  %4204 = vrot.lane.b32.xlu1 %v4157_v29, %s5759_s17 }
 0x25a   : > { %5287 = vmatmul.mubr.msk.bf16.gmra.mrb[20].mxu1 %vm382_vm1, %v3706_v51 }
 0x25b   : > { %5290 = vmatprep.mubr.msk.bf16.mxu1 %vm382_vm1, %v3709_v58 }
 0x262   : > { %5291 = vmatmul.mubr.msk.bf16.gmra.mrb[24].mxu1 %vm382_vm1, %v3712_v43 }
 0x263   : > { %5294 = vmatprep.mubr.msk.bf16.mxu1 %vm382_vm1, %v3715_v19 }
 0x26a   : > { %5295 = vmatmul.mubr.msk.bf16.gmra.mrb[28].mxu1 %vm382_vm1, %v3718_v41 }
 0x26b   : > { %5298 = vmatprep.mubr.msk.bf16.mxu1 %vm382_vm1, %v3721_v50 }
 0x272   : > { %5299 = vmatmul.mubr.msk.bf16.gmra.mrb[0].mxu1 %vm382_vm1, %v3724_v47 }
 0x273   : > { %5302 = vmatprep.mubr.msk.bf16.mxu1 %vm382_vm1, %v3727_v13 }
 0x27a   : > { %5303 = vmatmul.mubr.msk.bf16.gmra.mrb[4].mxu1 %vm382_vm1, %v3730_v39 }
 0x27b   : > { %5306 = vmatprep.mubr.msk.bf16.mxu1 %vm382_vm1, %v3733_v33 }
 0x282   : > { %5307 = vmatmul.mubr.msk.bf16.gmra.mrb[8].mxu1 %vm382_vm1, %v3736_v55 }
 0x283   : > { %5310 = vmatprep.mubr.msk.bf16.mxu1 %vm382_vm1, %v3739_v11  ;;  %v4175_v13 = vpop.permute.xlu0 %4174 }
 0x28a   : > { %5311 = vmatmul.mubr.msk.bf16.gmra.mrb[12].mxu1 %vm382_vm1, %v3742_v61 }
 0x28f   : > { %v6814_v51 = vpop.f32.mrb[48].mxu0 }
 0x290   : > { %v6816_v62 = vpop.f32.mrb[49].mxu0 }
 0x291   : > { %v6818_v8 = vpop.f32.mrb[50].mxu0 }
 0x292   : > { %v6820_v44 = vpop.f32.mrb[51].mxu0 }
 0x297   : > { %v6822_v25 = vpop.f32.mrb[52].mxu0 }
 0x298   : > { %v6824_v0 = vpop.f32.mrb[53].mxu0 }
 0x299   : > { %v6826_v49 = vpop.f32.mrb[54].mxu0 }
 0x29a   : > { %v6828_v53 = vpop.f32.mrb[55].mxu0 }
 0x29f   : > { %v6830_v40 = vpop.f32.mrb[56].mxu0 }
 0x2a0   : > { %v6832_v58 = vpop.f32.mrb[57].mxu0 }
 0x2a1   : > { %v6834_v32 = vpop.f32.mrb[58].mxu0 }
 0x2a2   : > { %v6836_v31 = vpop.f32.mrb[59].mxu0 }
 0x2a6   : > { %v4177_v14 = vpop.permute.xlu0 %4176 }
 0x2a7   : > { %v6838_v23 = vpop.f32.mrb[60].mxu0 }
 0x2a8   : > { %v6840_v35 = vpop.f32.mrb[61].mxu0 }
 0x2a9   : > { %v6842_v17 = vpop.f32.mrb[62].mxu0 }
 0x2aa   : > { %v6844_v20 = vpop.f32.mrb[63].mxu0 }
 0x2af   : > { %v5114_v60 = vpop.f32.mrb[32].mxu0 }
 0x2b0   : > { %v1943_v30 = vpop.f32.mrb[33].mxu0 }
 0x2b1   : > { %v5115_v6 = vpop.f32.mrb[34].mxu0 }
 0x2b2   : > { %v1946_v63 = vpop.f32.mrb[35].mxu0 }
 0x2b7   : > { %v5118_v9 = vpop.f32.mrb[36].mxu0 }
 0x2b8   : > { %v1959_v34 = vpop.f32.mrb[37].mxu0 }
 0x2b9   : > { %v5119_v10 = vpop.f32.mrb[38].mxu0 }
 0x2ba   : > { %v1962_v15 = vpop.f32.mrb[39].mxu0 }
 0x2bf   : > { %v5122_v21 = vpop.f32.mrb[40].mxu0 }
 0x2c0   : > { %v1975_v43 = vpop.f32.mrb[41].mxu0 }
 0x2c1   : > { %v5123_v29 = vpop.f32.mrb[42].mxu0 }
 0x2c2   : > { %v1978_v19 = vpop.f32.mrb[43].mxu0 }
 0x2c7   : > { %v6846_v56 = vpop.f32.mrb[44].mxu0 }
 0x2c8   : > { %v6848_v26 = vpop.f32.mrb[45].mxu0 }
 0x2c9   : > { %v6850_v59 = vpop.f32.mrb[46].mxu0 }
 0x2ca   : > { %v6852_v3 = vpop.f32.mrb[47].mxu0 }
 0x325   : > { %v5284_v46 = vpop.f32.mrb[16].mxu1 }
 0x326   : > { %v5350_v41 = vadd.f32 %v5284_v46, %v5114_v60  ;;  %v3830_v50 = vpop.f32.mrb[17].mxu1  ;;  %v4179_v60 = vpop.permute.xlu1 %4178 }
 0x327   : > { %v5351_v1 = vadd.f32 %v3830_v50, %v1943_v30  ;;  %v5285_v4 = vpop.f32.mrb[18].mxu1 }
 0x328   : > { %v3998_v12 = vadd.f32 %v5350_v41, %v6857_v52  ;;  %v5352_v18 = vadd.f32 %v5285_v4, %v5115_v6  ;;  %v3833_v7 = vpop.f32.mrb[19].mxu1 }
 0x329   : > { %v3996_v16 = vadd.f32 %v5351_v1, %v6857_v52  ;;  %v5353_v47 = vadd.f32 %v3833_v7, %v1946_v63 }
 0x32a   : > { %v3999_v36 = vadd.f32 %v5352_v18, %v6857_v52  ;;  %v4030_v45 = vmax.f32 %v3998_v12, 0.0  ;;  %v4181_v18 = vpop.permute.xlu1 %4180 }
 0x32b   : > { %v3997_v24 = vadd.f32 %v5353_v47, %v6857_v52  ;;  %v4028_v42 = vmax.f32 %v3996_v16, 0.0 }
 0x32c   : > { %v4031_v28 = vmax.f32 %v3999_v36, 0.0 }
 0x32d   : > { %v4029_v54 = vmax.f32 %v3997_v24, 0.0  ;;  %v5288_v39 = vpop.f32.mrb[20].mxu1 }
 0x32e   : > { %v4061_v33 = vpack.c.bf16 %v4031_v28, %v4030_v45  ;;  %v5354_v38 = vadd.f32 %v5288_v39, %v5118_v9  ;;  %v3846_v2 = vpop.f32.mrb[21].mxu1 }
 0x32f   : > { %v4060_v5 = vpack.c.bf16 %v4029_v54, %v4028_v42  ;;  %v5355_v27 = vadd.f32 %v3846_v2, %v1959_v34  ;;  %v5289_v48 = vpop.f32.mrb[22].mxu1 }
 0x330   : > { %v4002_v37 = vadd.f32 %v5354_v38, %v6857_v52  ;;  %v5356_v55 = vadd.f32 %v5289_v48, %v5119_v10  ;;  %v3849_v11 = vpop.f32.mrb[23].mxu1  ;;  %v4211_v30 = vsel %vm382_vm1, %v4061_v33, %v4177_v14  ;;  %v4185_v48 = vpop.permute.xlu1 %4184 }
 0x331   : > { %v4208_v57 = vsel %vm382_vm1, %v4060_v5, %v4175_v13  ;;  %v4000_v22 = vadd.f32 %v5355_v27, %v6857_v52  ;;  %v5357_v61 = vadd.f32 %v3849_v11, %v1962_v15 }
 0x332   : > { %v4003_v6 = vadd.f32 %v5356_v55, %v6857_v52  ;;  %5316 = vmatprep.mubr.msk.bf16.mxu0 %vm4262_vm8, %v4208_v57  ;;  %v4034_v9 = vmax.f32 %v4002_v37, 0.0 }
 0x333   : > { %v4001_v63 = vadd.f32 %v5357_v61, %v6857_v52  ;;  %5317 = vmatmul.mubr.msk.bf16.vlgmr.msra.gmra.mrb[64].mxu0 %vm4262_vm8, %v4211_v30  ;;  %v4032_v10 = vmax.f32 %v4000_v22, 0.0 }
 0x334   : > { %v4035_v34 = vmax.f32 %v4003_v6, 0.0 }
 0x335   : > { %v4033_v46 = vmax.f32 %v4001_v63, 0.0  ;;  %v5292_v41 = vpop.f32.mrb[24].mxu1 }
 0x336   : > { %v4063_v50 = vpack.c.bf16 %v4035_v34, %v4034_v9  ;;  %v5358_v1 = vadd.f32 %v5292_v41, %v5122_v21  ;;  %v3862_v4 = vpop.f32.mrb[25].mxu1 }
 0x337   : > { %v4062_v15 = vpack.c.bf16 %v4033_v46, %v4032_v10  ;;  %v5359_v12 = vadd.f32 %v3862_v4, %v1975_v43  ;;  %v5293_v7 = vpop.f32.mrb[26].mxu1  ;;  %v4189_v4 = vpop.permute.xlu1 %4188 }
 0x338   : > { %v4006_v16 = vadd.f32 %v5358_v1, %v6857_v52  ;;  %v5360_v47 = vadd.f32 %v5293_v7, %v5123_v29  ;;  %v3865_v13 = vpop.f32.mrb[27].mxu1  ;;  %v4217_v28 = vsel %vm382_vm1, %v4063_v50, %v4181_v18 }
 0x339   : > { %v4214_v36 = vsel %vm382_vm1, %v4062_v15, %v4179_v60  ;;  %v4004_v24 = vadd.f32 %v5359_v12, %v6857_v52  ;;  %v5361_v45 = vadd.f32 %v3865_v13, %v1978_v19  ;;  %v4183_v19 = vpop.permute.xlu0 %4182 }
 0x33a   : > { %v4007_v42 = vadd.f32 %v5360_v47, %v6857_v52  ;;  %5320 = vmatprep.mubr.msk.bf16.mxu0 %vm4262_vm8, %v4214_v36  ;;  %v4038_v43 = vmax.f32 %v4006_v16, 0.0 }
 0x33b   : > { %v4005_v21 = vadd.f32 %v5361_v45, %v6857_v52  ;;  %5321 = vmatmul.mubr.msk.bf16.gmra.mrb[68].mxu0 %vm4262_vm8, %v4217_v28  ;;  %v4036_v39 = vmax.f32 %v4004_v24, 0.0 }
 0x33c   : > { %v4039_v54 = vmax.f32 %v4007_v42, 0.0 }
 0x33d   : > { %v4037_v29 = vmax.f32 %v4005_v21, 0.0  ;;  %v5296_v33 = vpop.f32.mrb[28].mxu1 }
 0x33e   : > { %v4065_v38 = vpack.c.bf16 %v4039_v54, %v4038_v43  ;;  %v5362_v2 = vadd.f32 %v5296_v33, %v6846_v56  ;;  %v3878_v5 = vpop.f32.mrb[29].mxu1  ;;  %v4193_v33 = vpop.permute.xlu1 %4192 }
 0x33f   : > { %v4064_v27 = vpack.c.bf16 %v4037_v29, %v4036_v39  ;;  %v5363_v14 = vadd.f32 %v3878_v5, %v6848_v26  ;;  %v5297_v37 = vpop.f32.mrb[30].mxu1 }
 0x340   : > { %v4010_v55 = vadd.f32 %v5362_v2, %v6857_v52  ;;  %v5364_v11 = vadd.f32 %v5297_v37, %v6850_v59  ;;  %v3881_v57 = vpop.f32.mrb[31].mxu1  ;;  %v4223_v56 = vsel %vm382_vm1, %v4065_v38, %v4185_v48 }
 0x341   : > { %v4008_v22 = vadd.f32 %v5363_v14, %v6857_v52  ;;  %v4220_v61 = vsel %vm382_vm1, %v4064_v27, %v4183_v19  ;;  %v5365_v60 = vadd.f32 %v3881_v57, %v6852_v3  ;;  %v4187_v3 = vpop.permute.xlu0 %4186 }
 0x342   : > { %v4011_v30 = vadd.f32 %v5364_v11, %v6857_v52  ;;  %5324 = vmatprep.mubr.msk.bf16.mxu0 %vm4262_vm8, %v4220_v61  ;;  %v4042_v6 = vmax.f32 %v4010_v55, 0.0 }
 0x343   : > { %v4009_v26 = vadd.f32 %v5365_v60, %v6857_v52  ;;  %5325 = vmatmul.mubr.msk.bf16.gmra.mrb[72].mxu0 %vm4262_vm8, %v4223_v56  ;;  %v4040_v59 = vmax.f32 %v4008_v22, 0.0 }
 0x344   : > { %v4043_v63 = vmax.f32 %v4011_v30, 0.0 }
 0x345   : > { %v4041_v9 = vmax.f32 %v4009_v26, 0.0  ;;  %v5300_v34 = vpop.f32.mrb[0].mxu1 }
 0x346   : > { %v4067_v10 = vpack.c.bf16 %v4043_v63, %v4042_v6  ;;  %v5366_v46 = vadd.f32 %v5300_v34, %v6814_v51  ;;  %v3894_v41 = vpop.f32.mrb[1].mxu1  ;;  %v4197_v6 = vpop.permute.xlu1 %4196 }
 0x347   : > { %v4066_v50 = vpack.c.bf16 %v4041_v9, %v4040_v59  ;;  %v5367_v1 = vadd.f32 %v3894_v41, %v6816_v62  ;;  %v5301_v15 = vpop.f32.mrb[2].mxu1 }
 0x348   : > { %v4014_v12 = vadd.f32 %v5366_v46, %v6857_v52  ;;  %v5368_v18 = vadd.f32 %v5301_v15, %v6818_v8  ;;  %v3897_v7 = vpop.f32.mrb[3].mxu1  ;;  %v4229_v51 = vsel %vm382_vm1, %v4067_v10, %v4189_v4 }
 0x349   : > { %v4012_v16 = vadd.f32 %v5367_v1, %v6857_v52  ;;  %v4226_v47 = vsel %vm382_vm1, %v4066_v50, %v4187_v3  ;;  %v5369_v13 = vadd.f32 %v3897_v7, %v6820_v44  ;;  %v4191_v44 = vpop.permute.xlu0 %4190 }
 0x34a   : > { %v4015_v36 = vadd.f32 %v5368_v18, %v6857_v52  ;;  %5328 = vmatprep.mubr.msk.bf16.mxu0 %vm4262_vm8, %v4226_v47  ;;  %v4046_v24 = vmax.f32 %v4014_v12, 0.0 }
 0x34b   : > { %v4013_v62 = vadd.f32 %v5369_v13, %v6857_v52  ;;  %5329 = vmatmul.mubr.msk.bf16.gmra.mrb[76].mxu0 %vm4262_vm8, %v4229_v51  ;;  %v4044_v8 = vmax.f32 %v4012_v16, 0.0  ;;  %v4201_v13 = vpop.permute.xlu1 %4200 }
 0x34c   : > { %v4047_v45 = vmax.f32 %v4015_v36, 0.0 }
 0x34d   : > { %v4045_v28 = vmax.f32 %v4013_v62, 0.0  ;;  %v5304_v42 = vpop.f32.mrb[4].mxu1 }
 0x34e   : > { %v4069_v21 = vpack.c.bf16 %v4047_v45, %v4046_v24  ;;  %v5370_v43 = vadd.f32 %v5304_v42, %v6822_v25  ;;  %v3910_v54 = vpop.f32.mrb[5].mxu1 }
 0x34f   : > { %v4068_v39 = vpack.c.bf16 %v4045_v28, %v4044_v8  ;;  %v5371_v29 = vadd.f32 %v3910_v54, %v6824_v0  ;;  %v5305_v38 = vpop.f32.mrb[6].mxu1 }
 0x350   : > { %v4018_v2 = vadd.f32 %v5370_v43, %v6857_v52  ;;  %v5372_v5 = vadd.f32 %v5305_v38, %v6826_v49  ;;  %v3913_v19 = vpop.f32.mrb[7].mxu1  ;;  %v4235_v25 = vsel %vm382_vm1, %v4069_v21, %v4193_v33 }
 0x351   : > { %v4016_v27 = vadd.f32 %v5371_v29, %v6857_v52  ;;  %v4232_v14 = vsel %vm382_vm1, %v4068_v39, %v4191_v44  ;;  %v5373_v48 = vadd.f32 %v3913_v19, %v6828_v53  ;;  %v4195_v53 = vpop.permute.xlu0 %4194 }
 0x352   : > { %v4019_v37 = vadd.f32 %v5372_v5, %v6857_v52  ;;  %5332 = vmatprep.mubr.msk.bf16.mxu0 %vm4262_vm8, %v4232_v14  ;;  %v4050_v55 = vmax.f32 %v4018_v2, 0.0 }
 0x353   : > { %v4017_v0 = vadd.f32 %v5373_v48, %v6857_v52  ;;  %5333 = vmatmul.mubr.msk.bf16.gmra.mrb[80].mxu0 %vm4262_vm8, %v4235_v25  ;;  %v4048_v49 = vmax.f32 %v4016_v27, 0.0 }
 0x354   : > { %v4051_v11 = vmax.f32 %v4019_v37, 0.0 }
 0x355   : > { %v4049_v57 = vmax.f32 %v4017_v0, 0.0  ;;  %v5308_v22 = vpop.f32.mrb[8].mxu1 }
 0x356   : > { %v4071_v61 = vpack.c.bf16 %v4051_v11, %v4050_v55  ;;  %v5374_v60 = vadd.f32 %v5308_v22, %v6830_v40  ;;  %v3926_v56 = vpop.f32.mrb[9].mxu1 }
 0x357   : > { %v4070_v30 = vpack.c.bf16 %v4049_v57, %v4048_v49  ;;  %v5375_v26 = vadd.f32 %v3926_v56, %v6832_v58  ;;  %v5309_v63 = vpop.f32.mrb[10].mxu1 }
 0x358   : > { %v4022_v59 = vadd.f32 %v5374_v60, %v6857_v52  ;;  %v5376_v9 = vadd.f32 %v5309_v63, %v6834_v32  ;;  %v3929_v34 = vpop.f32.mrb[11].mxu1  ;;  %v4241_v40 = vsel %vm382_vm1, %v4071_v61, %v4197_v6 }
 0x359   : > { %v4020_v10 = vadd.f32 %v5375_v26, %v6857_v52  ;;  %v4238_v46 = vsel %vm382_vm1, %v4070_v30, %v4195_v53  ;;  %v5377_v41 = vadd.f32 %v3929_v34, %v6836_v31  ;;  %v4199_v31 = vpop.permute.xlu0 %4198 }
 0x35a   : > { %v4023_v3 = vadd.f32 %v5376_v9, %v6857_v52  ;;  %5336 = vmatprep.mubr.msk.bf16.mxu0 %vm4262_vm8, %v4238_v46  ;;  %v4054_v50 = vmax.f32 %v4022_v59, 0.0 }
 0x35b   : > { %v4021_v58 = vadd.f32 %v5377_v41, %v6857_v52  ;;  %5337 = vmatmul.mubr.msk.bf16.gmra.mrb[84].mxu0 %vm4262_vm8, %v4241_v40  ;;  %v4052_v32 = vmax.f32 %v4020_v10, 0.0 }
 0x35c   : > { %v4055_v1 = vmax.f32 %v4023_v3, 0.0 }
 0x35d   : > { %v4053_v4 = vmax.f32 %v4021_v58, 0.0  ;;  %v5312_v15 = vpop.f32.mrb[12].mxu1  ;;  %v4203_v39 = vpop.permute.xlu0 %4202 }
 0x35e   : > { %v4073_v12 = vpack.c.bf16 %v4055_v1, %v4054_v50  ;;  %v5378_v18 = vadd.f32 %v5312_v15, %v6838_v23  ;;  %v3942_v7 = vpop.f32.mrb[13].mxu1 }
 0x35f   : > { %v4072_v16 = vpack.c.bf16 %v4053_v4, %v4052_v32  ;;  %v5379_v47 = vadd.f32 %v3942_v7, %v6840_v35  ;;  %v5313_v51 = vpop.f32.mrb[14].mxu1 }
 0x360   : > { %v4026_v36 = vadd.f32 %v5378_v18, %v6857_v52  ;;  %v5380_v62 = vadd.f32 %v5313_v51, %v6842_v17  ;;  %v3945_v24 = vpop.f32.mrb[15].mxu1  ;;  %v4247_v23 = vsel %vm382_vm1, %v4073_v12, %v4201_v13 }
 0x361   : > { %v4024_v45 = vadd.f32 %v5379_v47, %v6857_v52  ;;  %v4244_v8 = vsel %vm382_vm1, %v4072_v16, %v4199_v31  ;;  %v5381_v28 = vadd.f32 %v3945_v24, %v6844_v20  ;;  %v4205_v20 = vpop.permute.xlu1 %4204 }
 0x362   : > { %v4027_v42 = vadd.f32 %v5380_v62, %v6857_v52  ;;  %5340 = vmatprep.mubr.msk.bf16.mxu0 %vm4262_vm8, %v4244_v8  ;;  %v4058_v17 = vmax.f32 %v4026_v36, 0.0 }
 0x363   : > { %v4025_v35 = vadd.f32 %v5381_v28, %v6857_v52  ;;  %5341 = vmatmul.mubr.msk.bf16.gmra.mrb[88].mxu0 %vm4262_vm8, %v4247_v23  ;;  %v4056_v43 = vmax.f32 %v4024_v45, 0.0  ;;  %v6949_v52 = vld [vmem:[%s7112_s6] ss:$0 sm:$0xff] }
 0x364   : > { %v4059_v21 = vmax.f32 %v4027_v42, 0.0 }
 0x365   : > { %v4057_v54 = vmax.f32 %v4025_v35, 0.0 }
 0x366   : > { %v4075_v44 = vpack.c.bf16 %v4059_v21, %v4058_v17 }
 0x367   : > { %v4074_v29 = vpack.c.bf16 %v4057_v54, %v4056_v43 }
 0x368   : > { %v4253_v38 = vsel %vm382_vm1, %v4075_v44, %v4205_v20 }
 0x369   : > { %v4250_v33 = vsel %vm382_vm1, %v4074_v29, %v4203_v39 }
 0x36a   : > { %5344 = vmatprep.mubr.msk.bf16.mxu0 %vm4262_vm8, %v4250_v33 }
 0x36b   : > { %5345 = vmatmul.mubr.msk.bf16.gmra.mrb[92].mxu0 %vm4262_vm8, %v4253_v38 }
 0x406   : > { %v5318_v2 = vpop.f32.mrb[64].mxu0 }
 0x407   : > { %v4342_v5 = vadd.f32 %v5318_v2, %v6949_v52  ;;  %v4333_v19 = vpop.f32.mrb[65].mxu0 }
 0x408   : > { %v4334_v27 = vadd.f32 %v6949_v52, %v4333_v19  ;;  %v5319_v14 = vpop.f32.mrb[66].mxu0 }
 0x409   : > { %4463 = vst.msk [vmem:[%s6953_s10 + $0x10] sm:$0xff] %vm4460_vm9, %v4342_v5  ;;  %v4345_v48 = vadd.f32 %v5319_v14, %v6949_v52  ;;  %v4336_v25 = vpop.f32.mrb[67].mxu0 }
 0x40a   : > { %4461 = vst.msk [vmem:[%s6953_s10] sm:$0xff] %vm4460_vm9, %v4334_v27  ;;  %v4337_v37 = vadd.f32 %v6949_v52, %v4336_v25 }
 0x40b   : > { %4464 = vst.msk [vmem:[%s6953_s10 + $0x18] sm:$0xff] %vm4460_vm9, %v4345_v48 }
 0x40c   : > { %4462 = vst.msk [vmem:[%s6953_s10 + $0x8] sm:$0xff] %vm4460_vm9, %v4337_v37 }
 0x40e   : > { %v5322_v0 = vpop.f32.mrb[68].mxu0 }
 0x40f   : > { %v4358_v55 = vadd.f32 %v5322_v0, %v6949_v52  ;;  %v4349_v11 = vpop.f32.mrb[69].mxu0 }
 0x410   : > { %v4350_v49 = vadd.f32 %v6949_v52, %v4349_v11  ;;  %v5323_v57 = vpop.f32.mrb[70].mxu0 }
 0x411   : > { %4467 = vst.msk [vmem:[%s6953_s10 + $0x30] sm:$0xff] %vm4460_vm9, %v4358_v55  ;;  %v4361_v22 = vadd.f32 %v5323_v57, %v6949_v52  ;;  %v4352_v61 = vpop.f32.mrb[71].mxu0 }
 0x412   : > { %4465 = vst.msk [vmem:[%s6953_s10 + $0x20] sm:$0xff] %vm4460_vm9, %v4350_v49  ;;  %v4353_v60 = vadd.f32 %v6949_v52, %v4352_v61 }
 0x413   : > { %4468 = vst.msk [vmem:[%s6953_s10 + $0x38] sm:$0xff] %vm4460_vm9, %v4361_v22 }
 0x414   : > { %4466 = vst.msk [vmem:[%s6953_s10 + $0x28] sm:$0xff] %vm4460_vm9, %v4353_v60 }
 0x416   : > { %v5326_v56 = vpop.f32.mrb[72].mxu0 }
 0x417   : > { %v4374_v53 = vadd.f32 %v5326_v56, %v6949_v52  ;;  %v4365_v30 = vpop.f32.mrb[73].mxu0 }
 0x418   : > { %v4366_v26 = vadd.f32 %v6949_v52, %v4365_v30  ;;  %v5327_v6 = vpop.f32.mrb[74].mxu0 }
 0x419   : > { %4471 = vst.msk [vmem:[%s6953_s10 + $0x50] sm:$0xff] %vm4460_vm9, %v4374_v53  ;;  %v4377_v63 = vadd.f32 %v5327_v6, %v6949_v52  ;;  %v4368_v59 = vpop.f32.mrb[75].mxu0 }
 0x41a   : > { %4469 = vst.msk [vmem:[%s6953_s10 + $0x40] sm:$0xff] %vm4460_vm9, %v4366_v26  ;;  %v4369_v9 = vadd.f32 %v6949_v52, %v4368_v59 }
 0x41b   : > { %4472 = vst.msk [vmem:[%s6953_s10 + $0x58] sm:$0xff] %vm4460_vm9, %v4377_v63 }
 0x41c   : > { %4470 = vst.msk [vmem:[%s6953_s10 + $0x48] sm:$0xff] %vm4460_vm9, %v4369_v9 }
 0x41e   : > { %v5330_v34 = vpop.f32.mrb[76].mxu0 }
 0x41f   : > { %v4390_v10 = vadd.f32 %v5330_v34, %v6949_v52  ;;  %v4381_v46 = vpop.f32.mrb[77].mxu0 }
 0x420   : > { %v4382_v41 = vadd.f32 %v6949_v52, %v4381_v46  ;;  %v5331_v40 = vpop.f32.mrb[78].mxu0 }
 0x421   : > { %4475 = vst.msk [vmem:[%s6953_s10 + $0x70] sm:$0xff] %vm4460_vm9, %v4390_v10  ;;  %v4393_v3 = vadd.f32 %v5331_v40, %v6949_v52  ;;  %v4384_v58 = vpop.f32.mrb[79].mxu0 }
 0x422   : > { %4473 = vst.msk [vmem:[%s6953_s10 + $0x60] sm:$0xff] %vm4460_vm9, %v4382_v41  ;;  %v4385_v50 = vadd.f32 %v6949_v52, %v4384_v58 }
 0x423   : > { %4476 = vst.msk [vmem:[%s6953_s10 + $0x78] sm:$0xff] %vm4460_vm9, %v4393_v3 }
 0x424   : > { %4474 = vst.msk [vmem:[%s6953_s10 + $0x68] sm:$0xff] %vm4460_vm9, %v4385_v50 }
 0x426   : > { %v5334_v1 = vpop.f32.mrb[80].mxu0 }
 0x427   : > { %v4406_v32 = vadd.f32 %v5334_v1, %v6949_v52  ;;  %v4397_v4 = vpop.f32.mrb[81].mxu0 }
 0x428   : > { %v4398_v15 = vadd.f32 %v6949_v52, %v4397_v4  ;;  %v5335_v12 = vpop.f32.mrb[82].mxu0 }
 0x429   : > { %4479 = vst.msk [vmem:[%s6953_s10 + $0x90] sm:$0xff] %vm4460_vm9, %v4406_v32  ;;  %v4409_v18 = vadd.f32 %v5335_v12, %v6949_v52  ;;  %v4400_v7 = vpop.f32.mrb[83].mxu0 }
 0x42a   : > { %4477 = vst.msk [vmem:[%s6953_s10 + $0x80] sm:$0xff] %vm4460_vm9, %v4398_v15  ;;  %v4401_v31 = vadd.f32 %v6949_v52, %v4400_v7 }
 0x42b   : > { %4480 = vst.msk [vmem:[%s6953_s10 + $0x98] sm:$0xff] %vm4460_vm9, %v4409_v18 }
 0x42c   : > { %4478 = vst.msk [vmem:[%s6953_s10 + $0x88] sm:$0xff] %vm4460_vm9, %v4401_v31 }
 0x42e   : > { %v5338_v16 = vpop.f32.mrb[84].mxu0 }
 0x42f   : > { %v4422_v47 = vadd.f32 %v5338_v16, %v6949_v52  ;;  %v4413_v13 = vpop.f32.mrb[85].mxu0 }
 0x430   : > { %v4414_v51 = vadd.f32 %v6949_v52, %v4413_v13  ;;  %v5339_v36 = vpop.f32.mrb[86].mxu0 }
 0x431   : > { %4483 = vst.msk [vmem:[%s6953_s10 + $0xb0] sm:$0xff] %vm4460_vm9, %v4422_v47  ;;  %v4425_v62 = vadd.f32 %v5339_v36, %v6949_v52  ;;  %v4416_v24 = vpop.f32.mrb[87].mxu0 }
 0x432   : > { %4481 = vst.msk [vmem:[%s6953_s10 + $0xa0] sm:$0xff] %vm4460_vm9, %v4414_v51  ;;  %v4417_v45 = vadd.f32 %v6949_v52, %v4416_v24 }
 0x433   : > { %4484 = vst.msk [vmem:[%s6953_s10 + $0xb8] sm:$0xff] %vm4460_vm9, %v4425_v62 }
 0x434   : > { %4482 = vst.msk [vmem:[%s6953_s10 + $0xa8] sm:$0xff] %vm4460_vm9, %v4417_v45 }
 0x436   : > { %v5342_v8 = vpop.f32.mrb[88].mxu0 }
 0x437   : > { %v4438_v28 = vadd.f32 %v5342_v8, %v6949_v52  ;;  %v4429_v23 = vpop.f32.mrb[89].mxu0 }
 0x438   : > { %v4430_v42 = vadd.f32 %v6949_v52, %v4429_v23  ;;  %v5343_v35 = vpop.f32.mrb[90].mxu0 }
 0x439   : > { %4487 = vst.msk [vmem:[%s6953_s10 + $0xd0] sm:$0xff] %vm4460_vm9, %v4438_v28  ;;  %v4441_v17 = vadd.f32 %v5343_v35, %v6949_v52  ;;  %v4432_v21 = vpop.f32.mrb[91].mxu0 }
 0x43a   : > { %4485 = vst.msk [vmem:[%s6953_s10 + $0xc0] sm:$0xff] %vm4460_vm9, %v4430_v42  ;;  %v4433_v43 = vadd.f32 %v6949_v52, %v4432_v21 }
 0x43b   : > { %4488 = vst.msk [vmem:[%s6953_s10 + $0xd8] sm:$0xff] %vm4460_vm9, %v4441_v17 }
 0x43c   : > { %4486 = vst.msk [vmem:[%s6953_s10 + $0xc8] sm:$0xff] %vm4460_vm9, %v4433_v43 }
 0x43e   : > { %v5346_v54 = vpop.f32.mrb[92].mxu0 }
 0x43f   : > { %v4454_v44 = vadd.f32 %v5346_v54, %v6949_v52  ;;  %v4445_v39 = vpop.f32.mrb[93].mxu0 }
 0x440   : > { %v4446_v29 = vadd.f32 %v6949_v52, %v4445_v39  ;;  %v5347_v20 = vpop.f32.mrb[94].mxu0 }
 0x441   : > { %4491 = vst.msk [vmem:[%s6953_s10 + $0xf0] sm:$0xff] %vm4460_vm9, %v4454_v44  ;;  %v4457_v33 = vadd.f32 %v5347_v20, %v6949_v52  ;;  %v4448_v38 = vpop.f32.mrb[95].mxu0 }
 0x442   : > { %4489 = vst.msk [vmem:[%s6953_s10 + $0xe0] sm:$0xff] %vm4460_vm9, %v4446_v29  ;;  %v4449_v2 = vadd.f32 %v6949_v52, %v4448_v38 }
 0x443   : > { %4492 = vst.msk [vmem:[%s6953_s10 + $0xf8] sm:$0xff] %vm4460_vm9, %v4457_v33 }
 0x444   : > { %4490 = vst.msk [vmem:[%s6953_s10 + $0xe8] sm:$0xff] %vm4460_vm9, %v4449_v2 }
 0x445   : > { %5691 = shalt.err (!%p5688_p5)
}
 0x446   : > { %s5692_s22 = scalar_lea.hbm %s7047_s18, 4096  ;;  %s5696_s10 = scalar_lea.hbm %s7113_s7, 8192 }
 0x447   : > { %p5693_p6 = scmp.ne.s32.totalorder %s7047_s18, %s5692_s22  ;;  %p5697_p10 = scmp.lt.u32.totalorder %s7047_s18, %s7113_s7 }
 0x448   : > { %p5698_p11 = scmp.lt.u32.totalorder %s5696_s10, %s5692_s22  ;;  %p5700_p13 = scmp.lt.u32.totalorder %s5692_s22, %s7047_s18 }
 0x449   : > { %p5694_p7 = pnand %p5693_p6, %p5843_p4 }
 0x44a   : > { %p5699_p12 = por %p5698_p11, %p5697_p10 }
 0x44b   : > { %p5695_p9 = pneg %p5694_p7 }
 0x44c   : > { %p5701_p0 = por %p5700_p13, %p5699_p12 }
 0x44e   : > { %p5702_p1 = pnand %p5701_p0, %p5695_p9 }
 0x450   : > { %5705 = shalt.err (!%p5702_p1)
}
 0x451   : > { %s5761_s17 = smov 128   ;;  %s5762_s19 = smov 8  }
 0x452   : > { %5618 = dma.vmem_to_hbm [thread:$0]  (%p5843_p4), %s7049_s15, 4096, %s7047_s18, %s7060_s27, %s5761_s17, %s5761_s17, %s5762_s19  }
 0x453 PF: > { %p5624_p2 = scmp.ge.s32.totalorder %s5756_s29, 2  ;;  %s4525_s21 = sand.u32 1, %s5736_s24  }
 0x454   : > { %s4526_s20 = scalar_lea.sflag [#allocation4], %s4525_s21 }
 0x455   : > { %p5621_p3 = pnand %p5624_p2, %p5850_p8 }
 0x457   : > { %5731 = dma.done.wait (!%p5621_p3), %s4526_s20, 4096  }
 0x458   : > { %5733 = vsyncadd (!%p5621_p3), %s4526_s20, 4294963200  ;;  %s20_s29 = sadd.s32 1, %s5756_s29   ;;  %s7127_s24 = smov %s5740_s25 }
 0x459   : > { %p17_p5 = scmp.ge.s32.totalorder %s20_s29, 4   ;;  %s7128_s25 = smov %s5744_s26 }
 0x45a   : > { %s7129_s26 = smov %s5856_s14  ;;  %s7130_s27 = smov %s5752_s28 }
 0x45b   : > { %s7131_s28 = smov %s7133_s9  ;;  %19 = sbr.rel (!%p17_p5) target bundleno = 4 (0x4), region = 95 }
 0x462   :  { %4531 = vsyncpa [#allocation4], 1 }
 0x463   :  { %4533 = vsyncpa [#allocation4 + $0x1], 1 }

// kernel: tpu_custom_call.1
= control target key start
LH: loop header
LB: loop body
LE: loop exit
PB: predicated region body
PF: predicated region fallthrough
CT: control target
= control target key end

     0   :  { %12 = vsyncpa [#allocation4], 0  ;;  %s7106_s0 = inlined_call_operand.vmem [shape: f32[2,16,16,4], index: 0, kind: input, shape index: {}]   ;;  %s7107_s1 = inlined_call_operand.vmem [shape: bf16[4,4], index: 1, kind: input, shape index: {}]   ;;  %s7108_s2 = inlined_call_operand.vmem [shape: f32[1,4], index: 2, kind: input, shape index: {}]   ;;  %s7109_s3 = inlined_call_operand.vmem [shape: bf16[9,4,4], index: 3, kind: input, shape index: {}]   ;;  %s7110_s4 = inlined_call_operand.vmem [shape: f32[1,4], index: 4, kind: input, shape index: {}]   ;;  %s7111_s5 = inlined_call_operand.vmem [shape: bf16[8,16], index: 5, kind: input, shape index: {}]   ;;  %s7112_s6 = inlined_call_operand.vmem [shape: f32[1,16], index: 6, kind: input, shape index: {}]   ;;  %s7113_s7 = inlined_call_operand.hbm [shape: f32[2,16,16,16], index: 7, kind: output, shape index: {}]  }
   0x1   :  { %14 = vsyncpa [#allocation4 + $0x1], 0  ;;  %s5803_s24 = smov 0   ;;  %s5805_s25 = smov 0  }
   0x2   :  { %s5807_s26 = smov 0   ;;  %s5809_s27 = smov 0  }
   0x3   :  { %s5811_s28 = smov 0   ;;  %s5813_s29 = smov 0  }
   0x4 LB: > { %s4585_s30 = sadd.s32 4294967295, %s5756_s29   ;;  %s4586_s8 = sadd.s32 4294967294, %s5756_s29   ;;  %s5756_s29 = sphi %s5813_s29, %s20_s29   ;;  %s5752_s28 = sphi %s5811_s28, %s7131_s28   ;;  %s5748_s27 = sphi %s5809_s27, %s7130_s27   ;;  %s5744_s26 = sphi %s5807_s26, %s7129_s26   ;;  %s5740_s25 = sphi %s5805_s25, %s7128_s25   ;;  %s5736_s24 = sphi %s5803_s24, %s7127_s24  }
   0x5   : > { %s32_s9 = sadd.s32 1, %s5752_s28  ;;  %s193_s10 = sadd.s32 1, %s5744_s26 }
   0x6   : > { %p34_p0 = scmp.ge.s32.totalorder %s32_s9, 2  ;;  %p203_p1 = scmp.ne.s32.totalorder %s5744_s26, %s5740_s25 }
   0x7   : > { %p204_p2 = scmp.eq.s32.totalorder %s4585_s30, 1  ;;  %p209_p3 = scmp.ne.s32.totalorder %s5740_s25, %s5736_s24 }
   0x8   : > { %s7133_s9 = smov (%p34_p0, %s32_s9), 0  ;;  %p210_p5 = scmp.eq.s32.totalorder %s4586_s8, 1 }
   0x9   : > { %p5843_p4 = por %p204_p2, %p203_p1  ;;  %s188_s12 = ssub.s32 %s5752_s28, %s7133_s9 }
   0xa   : > { %p4589_p6 = scmp.ge.s32.totalorder %s5756_s29, 1  ;;  %p191_p7 = scmp.eq.s32.totalorder %s188_s12, 0 }
   0xb   : > { %p5850_p8 = por %p210_p5, %p209_p3  ;;  %p254_p9 = scmp.lt.s32.totalorder %s5756_s29, 3 }
   0xc   : > { %s5856_s14 = scalar_select %p191_p7, %s5744_s26, %s193_s10  }
   0xd   : > { %p255_p10 = pnand %p4589_p6, %p254_p9 }
   0xf   : > { %258 = sbr.rel (%p255_p10) target bundleno = 1107 (0x453), region = 48 }
  0x16   : > { %v374_v0 = vld [vmem:[%s7107_s1] sm:$0x3]  ;;  %vm431_vm0 = vcmask 1041408   ;;  %p286_p11 = scmp.lt.s32.totalorder %s5748_s27, 1  ;;  %vm382_vm1 = vcmask 31744   ;;  %vm788_vm3 = vcmask 1040384  }
  0x17   : > { %5606 = vmatprep.subr.msk.bf16.mxu0 %vm431_vm0, %v374_v0  ;;  %v433_v1 = vsel %vm431_vm0, %v374_v0, 0  ;;  %vm894_vm2 = vsmask.f32 7424  ;;  %vm789_vm4 = vsmask.f32 256  ;;  %vm1545_vm6 = vcmask 1046528  }
  0x18   : > { %4975 = vmatpush3.bf16.msra.mxu0 %v433_v1  ;;  %s287_s17 = scalar_select %p286_p11, %s5748_s27, 1  ;;  %vm5969_vm5 = vmand %vm788_vm3, %vm789_vm4  ;;  %vm4295_vm7 = vcmask 1043456   ;;  %vm4262_vm8 = vcmask 64512   ;;  %vm4460_vm9 = vcmask 130048  }
  0x19   : > { %s283_s22 = sand.u32 1, %s5740_s25   ;;  %s4786_s12 = sshll.u32 %s5748_s27, 12 }
  0x1a   : > { %s4785_s18 = sshll.u32 %s287_s17, 8  ;;  %s5759_s17 = smov 4  }
  0x1b   : > { %s5868_s21 = scalar_lea.vmem %s7106_s0, %s4785_s18  ;;  %s4590_s23 = sshll.u32 %s283_s22, 8 }
  0x1c   : > { %v294_v2 = vld [vmem:[%s5868_s21] sm:$0xff]  ;;  %v295_v3 = vld [vmem:[%s5868_s21 + $0x8] sm:$0xff]  ;;  %v296_v4 = vld [vmem:[%s5868_s21 + $0x10] sm:$0xff]  ;;  %s6953_s10 = scalar_lea.vmem [#allocation3], %s4590_s23  ;;  %s7047_s18 = scalar_lea.hbm %s7113_s7, %s4786_s12 }
  0x1d   : > { %v326_v5 = vmax.f32 %v294_v2, 0.0  ;;  %v327_v6 = vmax.f32 %v295_v3, 0.0  ;;  %v297_v7 = vld [vmem:[%s5868_s21 + $0x18] sm:$0xff]  ;;  %v328_v8 = vmax.f32 %v296_v4, 0.0  ;;  %v298_v9 = vld [vmem:[%s5868_s21 + $0x20] sm:$0xff]  ;;  %v299_v10 = vld [vmem:[%s5868_s21 + $0x28] sm:$0xff] }
  0x1e   : > { %v329_v11 = vmax.f32 %v297_v7, 0.0  ;;  %v330_v12 = vmax.f32 %v298_v9, 0.0  ;;  %v331_v13 = vmax.f32 %v299_v10, 0.0  ;;  %v300_v15 = vld [vmem:[%s5868_s21 + $0x30] sm:$0xff]  ;;  %v301_v16 = vld [vmem:[%s5868_s21 + $0x38] sm:$0xff]  ;;  %v302_v19 = vld [vmem:[%s5868_s21 + $0x40] sm:$0xff] }
  0x1f   : > { %v358_v14 = vpack.c.bf16 %v327_v6, %v326_v5  ;;  %v303_v20 = vld [vmem:[%s5868_s21 + $0x48] sm:$0xff]  ;;  %v332_v21 = vmax.f32 %v300_v15, 0.0  ;;  %v333_v22 = vmax.f32 %v301_v16, 0.0  ;;  %v334_v23 = vmax.f32 %v302_v19, 0.0  ;;  %v304_v27 = vld [vmem:[%s5868_s21 + $0x50] sm:$0xff]  ;;  %v305_v28 = vld [vmem:[%s5868_s21 + $0x58] sm:$0xff] }
  0x20   : > { %v359_v17 = vpack.c.bf16 %v329_v11, %v328_v8  ;;  %v360_v18 = vpack.c.bf16 %v331_v13, %v330_v12  ;;  %v335_v24 = vmax.f32 %v303_v20, 0.0  ;;  %v306_v29 = vld [vmem:[%s5868_s21 + $0x60] sm:$0xff]  ;;  %v307_v30 = vld [vmem:[%s5868_s21 + $0x68] sm:$0xff]  ;;  %v336_v31 = vmax.f32 %v304_v27, 0.0  ;;  %v308_v37 = vld [vmem:[%s5868_s21 + $0x70] sm:$0xff]  ;;  %s4510_s15 = sshll.u32 %s6953_s10, 4  ;;  %s7049_s15 = int_to_ptr.vmem [resolvable:$true] %s4510_s15 }
  0x21   : > { %4976 = vmatprep.mubr.msk.bf16.mxu0 %vm382_vm1, %v358_v14  ;;  %v361_v25 = vpack.c.bf16 %v333_v22, %v332_v21  ;;  %v337_v32 = vmax.f32 %v305_v28, 0.0  ;;  %v338_v33 = vmax.f32 %v306_v29, 0.0  ;;  %v339_v34 = vmax.f32 %v307_v30, 0.0  ;;  %v309_v38 = vld [vmem:[%s5868_s21 + $0x78] sm:$0xff]  ;;  %v310_v39 = vld [vmem:[%s5868_s21 + $0x80] sm:$0xff]  ;;  %v311_v40 = vld [vmem:[%s5868_s21 + $0x88] sm:$0xff] }
  0x22   : > { %4977 = vmatmul.mubr.msk.bf16.vlgmr.msra.gmra.mrb[0].mxu0 %vm382_vm1, %v359_v17  ;;  %v362_v26 = vpack.c.bf16 %v335_v24, %v334_v23  ;;  %v340_v41 = vmax.f32 %v308_v37, 0.0  ;;  %v341_v42 = vmax.f32 %v309_v38, 0.0  ;;  %v342_v43 = vmax.f32 %v310_v39, 0.0  ;;  %v312_v47 = vld [vmem:[%s5868_s21 + $0x90] sm:$0xff]  ;;  %v313_v48 = vld [vmem:[%s5868_s21 + $0x98] sm:$0xff]  ;;  %v314_v49 = vld [vmem:[%s5868_s21 + $0xa0] sm:$0xff] }
  0x23   : > { %4980 = vmatprep.mubr.msk.bf16.mxu0 %vm382_vm1, %v360_v18  ;;  %v363_v35 = vpack.c.bf16 %v337_v32, %v336_v31  ;;  %v364_v36 = vpack.c.bf16 %v339_v34, %v338_v33  ;;  %v343_v44 = vmax.f32 %v311_v40, 0.0  ;;  %v315_v50 = vld [vmem:[%s5868_s21 + $0xa8] sm:$0xff]  ;;  %v344_v51 = vmax.f32 %v312_v47, 0.0  ;;  %v316_v57 = vld [vmem:[%s5868_s21 + $0xb0] sm:$0xff]  ;;  %v317_v58 = vld [vmem:[%s5868_s21 + $0xb8] sm:$0xff]  ;;  %s7060_s27 = scalar_lea.sflag [#allocation4], %s283_s22 }
  0x24   : > { %v365_v45 = vpack.c.bf16 %v341_v42, %v340_v41  ;;  %v345_v52 = vmax.f32 %v313_v48, 0.0  ;;  %v346_v53 = vmax.f32 %v314_v49, 0.0  ;;  %v347_v54 = vmax.f32 %v315_v50, 0.0  ;;  %v318_v59 = vld [vmem:[%s5868_s21 + $0xc0] sm:$0xff]  ;;  %v319_v60 = vld [vmem:[%s5868_s21 + $0xc8] sm:$0xff]  ;;  %v320_v3 = vld [vmem:[%s5868_s21 + $0xd0] sm:$0xff] }
  0x25   : > { %v366_v46 = vpack.c.bf16 %v343_v44, %v342_v43  ;;  %v348_v61 = vmax.f32 %v316_v57, 0.0  ;;  %v349_v62 = vmax.f32 %v317_v58, 0.0  ;;  %v350_v63 = vmax.f32 %v318_v59, 0.0  ;;  %v321_v4 = vld [vmem:[%s5868_s21 + $0xd8] sm:$0xff]  ;;  %v322_v5 = vld [vmem:[%s5868_s21 + $0xe0] sm:$0xff]  ;;  %v323_v6 = vld [vmem:[%s5868_s21 + $0xe8] sm:$0xff] }
  0x26   : > { %v367_v55 = vpack.c.bf16 %v345_v52, %v344_v51  ;;  %v368_v56 = vpack.c.bf16 %v347_v54, %v346_v53  ;;  %v351_v0 = vmax.f32 %v319_v60, 0.0  ;;  %v352_v7 = vmax.f32 %v320_v3, 0.0  ;;  %v324_v13 = vld [vmem:[%s5868_s21 + $0xf0] sm:$0xff]  ;;  %v325_v14 = vld [vmem:[%s5868_s21 + $0xf8] sm:$0xff]  ;;  %v5936_v30 = vld [vmem:[%s7109_s3 + $0x6] sm:$0x3] }
  0x27   : > { %v369_v1 = vpack.c.bf16 %v349_v62, %v348_v61  ;;  %v353_v8 = vmax.f32 %v321_v4, 0.0  ;;  %v354_v9 = vmax.f32 %v322_v5, 0.0  ;;  %v355_v10 = vmax.f32 %v323_v6, 0.0  ;;  %5611 = vmatprep.subr.msk.bf16.mxu1 %vm431_vm0, %v5936_v30  ;;  %v5947_v32 = vld [vmem:[%s7109_s3 + $0x8] sm:$0x3]  ;;  %s5678_s19 = scalar_lea.vmem %s7049_s15, 4096 }
  0x28   : > { %v370_v2 = vpack.c.bf16 %v351_v0, %v350_v63  ;;  %v356_v15 = vmax.f32 %v324_v13, 0.0  ;;  %v357_v16 = vmax.f32 %v325_v14, 0.0  ;;  %v5758_v18 = vmov 0   ;;  %v5955_v33 = vld [vmem:[%s7109_s3] sm:$0x3]  ;;  %p5679_p12 = scmp.ne.s32.totalorder %s7049_s15, %s5678_s19 }
  0x29   : > { %v371_v11 = vpack.c.bf16 %v353_v8, %v352_v7  ;;  %v372_v12 = vpack.c.bf16 %v355_v10, %v354_v9  ;;  %823 = vst.msk [vmem:[#allocation2] sm:$0xff] %vm382_vm1, %v5758_v18  ;;  %824 = vst.msk [vmem:[#allocation2 + $0x8] sm:$0xff] %vm382_vm1, %v5758_v18  ;;  %v5942_v31 = vsel %vm431_vm0, %v5936_v30, 0  ;;  %v5962_v34 = vld [vmem:[%s7108_s2] ss:$0 sm:$0xff] }
  0x2a   : > { %4981 = vmatmul.mubr.msk.bf16.gmra.mrb[4].mxu0 %vm382_vm1, %v361_v25  ;;  %v373_v17 = vpack.c.bf16 %v357_v16, %v356_v15  ;;  %859 = vst.msk [vmem:[#allocation2 + $0x110] sm:$0xff] %vm382_vm1, %v5758_v18  ;;  %860 = vst.msk [vmem:[#allocation2 + $0x118] sm:$0xff] %vm382_vm1, %v5758_v18  ;;  %v4610_v25 = vld [vmem:[%s7109_s3 + $0x2] sm:$0x3]  ;;  %5349 = vmatpush3.bf16.msra.mxu1 %v5942_v31  ;;  %p5680_p13 = pnand %p5679_p12, %p5843_p4 }
  0x2b   : > { %4984 = vmatprep.mubr.msk.bf16.mxu0 %vm382_vm1, %v362_v26  ;;  %5607 = vmatprep.subr.msk.bf16.mxu0 %vm431_vm0, %v4610_v25  ;;  %v1138_v26 = vsel %vm431_vm0, %v4610_v25, 0 }
  0x2c   : > { %5009 = vmatpush3.bf16.msra.mxu0 %v1138_v26  ;;  %5612 = vmatprep.subr.msk.bf16.mxu1 %vm431_vm0, %v5947_v32  ;;  %p5681_p0 = pneg %p5680_p13 }
  0x2d   : > { %5608 = vmatprep.subr.msk.bf16.mxu0 %vm431_vm0, %v5955_v33 }
  0x30   : > { %v5922_v19 = vld [vmem:[#allocation2] sm:$0xff]  ;;  %v878_v21 = vld [vmem:[#allocation2 + $0x8] sm:$0x1] }
  0x31   : > { %v898_v20 = vshll.u32 %v5922_v19, 16  ;;  %v896_v22 = vshrl.u32 %v5922_v19, 16  ;;  %v903_v24 = vshll.u32 %v878_v21, 16 }
  0x32   : > { %4985 = vmatmul.mubr.msk.bf16.gmra.mrb[8].mxu0 %vm382_vm1, %v363_v35 }
  0x33   : > { %4988 = vmatprep.mubr.msk.bf16.mxu0 %vm382_vm1, %v364_v36  ;;  %v900_v23 = vrot.slane %v898_v20, 1  ;;  %v905_v28 = vrot.slane %v903_v24, 1  ;;  %v5993_v24 = vsel %vm431_vm0, %v5947_v32, 0 }
  0x35   : > { %v901_v27 = vor.u32 %v900_v23, %v896_v22 }
  0x37   : > { %v906_v29 = vsel %vm894_vm2, %v901_v27, %v905_v28  ;;  %v5998_v28 = vsel %vm431_vm0, %v5955_v33, 0 }
  0x3a   : > { %4989 = vmatmul.mubr.msk.bf16.gmra.mrb[12].mxu0 %vm382_vm1, %v365_v45 }
  0x3b   : > { %4992 = vmatprep.mubr.msk.bf16.mxu0 %vm382_vm1, %v366_v46 }
  0x42   : > { %4993 = vmatmul.mubr.msk.bf16.gmra.mrb[16].mxu0 %vm382_vm1, %v367_v55 }
  0x43   : > { %4996 = vmatprep.mubr.msk.bf16.mxu0 %vm382_vm1, %v368_v56 }
  0x4a   : > { %4997 = vmatmul.mubr.msk.bf16.gmra.mrb[20].mxu0 %vm382_vm1, %v369_v1 }
  0x4b   : > { %5000 = vmatprep.mubr.msk.bf16.mxu0 %vm382_vm1, %v370_v2 }
  0x52   : > { %5001 = vmatmul.mubr.msk.bf16.gmra.mrb[24].mxu0 %vm382_vm1, %v371_v11 }
  0x53   : > { %5004 = vmatprep.mubr.msk.bf16.mxu0 %vm382_vm1, %v372_v12 }
  0x5a   : > { %5005 = vmatmul.mubr.msk.bf16.gmra.mrb[28].mxu0 %vm382_vm1, %v373_v17 }
  0x5b   : > { %5010 = vmatprep.mubr.msk.bf16.mxu0 %vm382_vm1, %v906_v29 }
  0xf5   : > { %v4978_v35 = vpop.f32.mrb[0].mxu0 }
  0xf6   : > { %v478_v36 = vadd.f32 %v4978_v35, %v5962_v34  ;;  %v469_v37 = vpop.f32.mrb[1].mxu0 }
  0xf7   : > { %v470_v38 = vadd.f32 %v5962_v34, %v469_v37  ;;  %v4979_v39 = vpop.f32.mrb[2].mxu0 }
  0xf8   : > { %v481_v40 = vadd.f32 %v4979_v39, %v5962_v34  ;;  %v472_v41 = vpop.f32.mrb[3].mxu0  ;;  %v598_v43 = vmax.f32 %v478_v36, 0.0 }
  0xf9   : > { %v473_v42 = vadd.f32 %v5962_v34, %v472_v41  ;;  %v596_v45 = vmax.f32 %v470_v38, 0.0 }
  0xfa   : > { %v599_v44 = vmax.f32 %v481_v40, 0.0 }
  0xfb   : > { %v597_v46 = vmax.f32 %v473_v42, 0.0 }
  0xfc   : > { %v629_v47 = vpack.c.bf16 %v599_v44, %v598_v43 }
  0xfd   : > { %v628_v48 = vpack.c.bf16 %v597_v46, %v596_v45  ;;  %v4982_v49 = vpop.f32.mrb[4].mxu0 }
  0xfe   : > { %v652_v50 = vshrl.u32 %v629_v47, 16  ;;  %v494_v51 = vadd.f32 %v4982_v49, %v5962_v34  ;;  %v485_v52 = vpop.f32.mrb[5].mxu0  ;;  %v655_v58 = vshll.u32 %v629_v47, 16 }
  0xff   : > { %v645_v54 = vshrl.u32 %v628_v48, 16  ;;  %v486_v55 = vadd.f32 %v5962_v34, %v485_v52  ;;  %v4983_v56 = vpop.f32.mrb[6].mxu0  ;;  %v648_v62 = vshll.u32 %v628_v48, 16 }
 0x100   : > { %v654_v57 = vrot.slane %v652_v50, 7  ;;  %v497_v59 = vadd.f32 %v4983_v56, %v5962_v34  ;;  %v488_v60 = vpop.f32.mrb[7].mxu0  ;;  %v602_v2 = vmax.f32 %v494_v51, 0.0 }
 0x101   : > { %v647_v61 = vrot.slane %v645_v54, 7  ;;  %v489_v63 = vadd.f32 %v5962_v34, %v488_v60  ;;  %v600_v6 = vmax.f32 %v486_v55, 0.0 }
 0x102   : > { %v657_v0 = vor.u32 %v655_v58, %v654_v57  ;;  %v808_v1 = vsel %vm5969_vm5, %v654_v57, 0  ;;  %v603_v3 = vmax.f32 %v497_v59, 0.0 }
 0x103   : > { %829 = vst.msk [vmem:[#allocation2 + $0x28] sm:$0xff] %vm382_vm1, %v808_v1  ;;  %v650_v4 = vor.u32 %v648_v62, %v647_v61  ;;  %v807_v5 = vsel %vm5969_vm5, %v647_v61, 0  ;;  %v601_v7 = vmax.f32 %v489_v63, 0.0 }
 0x104   : > { %v792_v8 = vsel %vm5969_vm5, 0, %v657_v0  ;;  %827 = vst.msk [vmem:[#allocation2 + $0x18] sm:$0xff] %vm382_vm1, %v807_v5  ;;  %v631_v9 = vpack.c.bf16 %v603_v3, %v602_v2 }
 0x105   : > { %828 = vst.msk [vmem:[#allocation2 + $0x20] sm:$0xff] %vm382_vm1, %v792_v8  ;;  %v791_v10 = vsel %vm5969_vm5, 0, %v650_v4  ;;  %v630_v11 = vpack.c.bf16 %v601_v7, %v600_v6  ;;  %v4986_v12 = vpop.f32.mrb[8].mxu0 }
 0x106   : > { %826 = vst.msk [vmem:[#allocation2 + $0x10] sm:$0xff] %vm382_vm1, %v791_v10  ;;  %v666_v13 = vshrl.u32 %v631_v9, 16  ;;  %v510_v14 = vadd.f32 %v4986_v12, %v5962_v34  ;;  %v501_v15 = vpop.f32.mrb[9].mxu0  ;;  %v669_v21 = vshll.u32 %v631_v9, 16 }
 0x107   : > { %v659_v16 = vshrl.u32 %v630_v11, 16  ;;  %v502_v17 = vadd.f32 %v5962_v34, %v501_v15  ;;  %v4987_v18 = vpop.f32.mrb[10].mxu0  ;;  %v662_v26 = vshll.u32 %v630_v11, 16 }
 0x108   : > { %v668_v20 = vrot.slane %v666_v13, 7  ;;  %v513_v22 = vadd.f32 %v4987_v18, %v5962_v34  ;;  %v504_v23 = vpop.f32.mrb[11].mxu0  ;;  %v606_v36 = vmax.f32 %v510_v14, 0.0 }
 0x109   : > { %v661_v25 = vrot.slane %v659_v16, 7  ;;  %v505_v27 = vadd.f32 %v5962_v34, %v504_v23  ;;  %v604_v40 = vmax.f32 %v502_v17, 0.0 }
 0x10a   : > { %v671_v29 = vor.u32 %v669_v21, %v668_v20  ;;  %v810_v35 = vsel %vm5969_vm5, %v668_v20, 0  ;;  %v607_v37 = vmax.f32 %v513_v22, 0.0  ;;  %v6002_v38 = vld [vmem:[#allocation2 + $0x28] sm:$0x1] }
 0x10b   : > { %833 = vst.msk [vmem:[#allocation2 + $0x48] sm:$0xff] %vm382_vm1, %v810_v35  ;;  %v664_v32 = vor.u32 %v662_v26, %v661_v25  ;;  %v809_v39 = vsel %vm5969_vm5, %v661_v25, 0  ;;  %v605_v41 = vmax.f32 %v505_v27, 0.0  ;;  %v6007_v42 = vld [vmem:[#allocation2 + $0x18] sm:$0x1]  ;;  %v927_v46 = vshll.u32 %v6002_v38, 16 }
 0x10c   : > { %v794_v33 = vsel %vm5969_vm5, 0, %v671_v29  ;;  %831 = vst.msk [vmem:[#allocation2 + $0x38] sm:$0xff] %vm382_vm1, %v809_v39  ;;  %v633_v43 = vpack.c.bf16 %v607_v37, %v606_v36  ;;  %v915_v44 = vshll.u32 %v6007_v42, 16  ;;  %v6013_v45 = vld [vmem:[#allocation2 + $0x20] sm:$0xff] }
 0x10d   : > { %832 = vst.msk [vmem:[#allocation2 + $0x40] sm:$0xff] %vm382_vm1, %v794_v33  ;;  %v793_v47 = vsel %vm5969_vm5, 0, %v664_v32  ;;  %v632_v48 = vpack.c.bf16 %v605_v41, %v604_v40  ;;  %v4990_v49 = vpop.f32.mrb[12].mxu0  ;;  %v6019_v50 = vld [vmem:[#allocation2 + $0x10] sm:$0xff]  ;;  %v920_v51 = vshrl.u32 %v6013_v45, 16  ;;  %v922_v52 = vshll.u32 %v6013_v45, 16 }
 0x10e   : > { %830 = vst.msk [vmem:[#allocation2 + $0x30] sm:$0xff] %vm382_vm1, %v793_v47  ;;  %v680_v54 = vshrl.u32 %v633_v43, 16  ;;  %v683_v55 = vshll.u32 %v633_v43, 16  ;;  %v526_v56 = vadd.f32 %v4990_v49, %v5962_v34  ;;  %v517_v57 = vpop.f32.mrb[13].mxu0  ;;  %v908_v58 = vshrl.u32 %v6019_v50, 16 }
 0x10f   : > { %v673_v59 = vshrl.u32 %v632_v48, 16  ;;  %v676_v60 = vshll.u32 %v632_v48, 16  ;;  %v518_v61 = vadd.f32 %v5962_v34, %v517_v57  ;;  %v4991_v62 = vpop.f32.mrb[14].mxu0  ;;  %v910_v63 = vshll.u32 %v6019_v50, 16  ;;  %v6064_v47 = vld [vmem:[%s7109_s3 + $0x4] sm:$0x3] }
 0x110   : > { %v682_v0 = vrot.slane %v680_v54, 7  ;;  %v610_v1 = vmax.f32 %v526_v56, 0.0  ;;  %v529_v2 = vadd.f32 %v4991_v62, %v5962_v34  ;;  %v520_v3 = vpop.f32.mrb[15].mxu0  ;;  %v917_v4 = vrot.slane %v915_v44, 1 }
 0x111   : > { %v675_v5 = vrot.slane %v673_v59, 7  ;;  %v608_v6 = vmax.f32 %v518_v61, 0.0  ;;  %v521_v7 = vadd.f32 %v5962_v34, %v520_v3  ;;  %v912_v8 = vrot.slane %v910_v63, 1 }
 0x112   : > { %v685_v9 = vor.u32 %v683_v55, %v682_v0  ;;  %v812_v10 = vsel %vm5969_vm5, %v682_v0, 0  ;;  %v611_v11 = vmax.f32 %v529_v2, 0.0  ;;  %v924_v12 = vrot.slane %v922_v52, 1  ;;  %v6075_v63 = vld [vmem:[#allocation2 + $0x48] sm:$0x1] }
 0x113   : > { %837 = vst.msk [vmem:[#allocation2 + $0x68] sm:$0xff] %vm382_vm1, %v812_v10  ;;  %v678_v13 = vor.u32 %v676_v60, %v675_v5  ;;  %v811_v14 = vsel %vm5969_vm5, %v675_v5, 0  ;;  %v609_v15 = vmax.f32 %v521_v7, 0.0  ;;  %v6035_v16 = vor.u32 %v912_v8, %v908_v58  ;;  %v6037_v17 = vld [vmem:[#allocation2 + $0x38] sm:$0x1] }
 0x114   : > { %v796_v18 = vsel %vm5969_vm5, 0, %v685_v9  ;;  %835 = vst.msk [vmem:[#allocation2 + $0x58] sm:$0xff] %vm382_vm1, %v811_v14  ;;  %v635_v20 = vpack.c.bf16 %v611_v11, %v610_v1  ;;  %v6042_v21 = vor.u32 %v924_v12, %v920_v51  ;;  %v929_v22 = vrot.slane %v927_v46, 1  ;;  %v6068_v55 = vld [vmem:[#allocation2 + $0x40] sm:$0xff] }
 0x115   : > { %836 = vst.msk [vmem:[#allocation2 + $0x60] sm:$0xff] %vm382_vm1, %v796_v18  ;;  %v795_v23 = vsel %vm5969_vm5, 0, %v678_v13  ;;  %v634_v25 = vpack.c.bf16 %v609_v15, %v608_v6  ;;  %v4994_v26 = vpop.f32.mrb[16].mxu0  ;;  %v918_v27 = vsel %vm894_vm2, %v6035_v16, %v917_v4  ;;  %v6049_v29 = vld [vmem:[#allocation2 + $0x30] sm:$0xff]  ;;  %v939_v35 = vshll.u32 %v6037_v17, 16 }
 0x116   : > { %834 = vst.msk [vmem:[#allocation2 + $0x50] sm:$0xff] %vm382_vm1, %v795_v23  ;;  %v694_v36 = vshrl.u32 %v635_v20, 16  ;;  %v697_v37 = vshll.u32 %v635_v20, 16  ;;  %v542_v32 = vadd.f32 %v4994_v26, %v5962_v34  ;;  %5011 = vmatmul.mubr.msk.bf16.vlgmr.msra.gmra.mrb[32].mxu0 %vm382_vm1, %v918_v27  ;;  %v533_v39 = vpop.f32.mrb[17].mxu0  ;;  %v930_v40 = vsel %vm894_vm2, %v6042_v21, %v929_v22 }
 0x117   : > { %v687_v41 = vshrl.u32 %v634_v25, 16  ;;  %v690_v33 = vshll.u32 %v634_v25, 16  ;;  %v534_v43 = vadd.f32 %v5962_v34, %v533_v39  ;;  %5014 = vmatprep.mubr.msk.bf16.mxu0 %vm382_vm1, %v930_v40  ;;  %v4995_v44 = vpop.f32.mrb[18].mxu0  ;;  %v932_v46 = vshrl.u32 %v6049_v29, 16  ;;  %5043 = vmatpush3.bf16.msra.mxu0 %v5998_v28 }
 0x118   : > { %v696_v48 = vrot.slane %v694_v36, 7  ;;  %v614_v49 = vmax.f32 %v542_v32, 0.0  ;;  %v545_v51 = vadd.f32 %v4995_v44, %v5962_v34  ;;  %v536_v52 = vpop.f32.mrb[19].mxu0  ;;  %v934_v54 = vshll.u32 %v6049_v29, 16  ;;  %5609 = vmatprep.subr.msk.bf16.mxu0 %vm431_vm0, %v6064_v47 }
 0x119   : > { %v689_v56 = vrot.slane %v687_v41, 7  ;;  %v612_v57 = vmax.f32 %v534_v43, 0.0  ;;  %v537_v28 = vadd.f32 %v5962_v34, %v536_v52  ;;  %v941_v58 = vrot.slane %v939_v35, 1 }
 0x11a   : > { %v699_v59 = vor.u32 %v697_v37, %v696_v48  ;;  %v814_v60 = vsel %vm5969_vm5, %v696_v48, 0  ;;  %v615_v61 = vmax.f32 %v545_v51, 0.0  ;;  %v936_v62 = vrot.slane %v934_v54, 1 }
 0x11b   : > { %841 = vst.msk [vmem:[#allocation2 + $0x88] sm:$0xff] %vm382_vm1, %v814_v60  ;;  %v692_v0 = vor.u32 %v690_v33, %v689_v56  ;;  %v813_v1 = vsel %vm5969_vm5, %v689_v56, 0  ;;  %v613_v2 = vmax.f32 %v537_v28, 0.0  ;;  %v944_v3 = vshrl.u32 %v6068_v55, 16  ;;  %v6081_v4 = vld [vmem:[#allocation2 + $0x58] sm:$0x1] }
 0x11c   : > { %v798_v5 = vsel %vm5969_vm5, 0, %v699_v59  ;;  %839 = vst.msk [vmem:[#allocation2 + $0x78] sm:$0xff] %vm382_vm1, %v813_v1  ;;  %v637_v6 = vpack.c.bf16 %v615_v61, %v614_v49  ;;  %v6086_v7 = vor.u32 %v936_v62, %v932_v46  ;;  %v946_v8 = vshll.u32 %v6068_v55, 16  ;;  %v6109_v54 = vld [vmem:[#allocation2 + $0x60] sm:$0xff] }
 0x11d   : > { %840 = vst.msk [vmem:[#allocation2 + $0x80] sm:$0xff] %vm382_vm1, %v798_v5  ;;  %v797_v9 = vsel %vm5969_vm5, 0, %v692_v0  ;;  %v636_v10 = vpack.c.bf16 %v613_v2, %v612_v57  ;;  %v4998_v11 = vpop.f32.mrb[20].mxu0  ;;  %v951_v12 = vshll.u32 %v6075_v63, 16  ;;  %v963_v13 = vshll.u32 %v6081_v4, 16  ;;  %v6100_v36 = vld [vmem:[#allocation2 + $0x50] sm:$0xff] }
 0x11e   : > { %838 = vst.msk [vmem:[#allocation2 + $0x70] sm:$0xff] %vm382_vm1, %v797_v9  ;;  %v708_v14 = vshrl.u32 %v637_v6, 16  ;;  %v711_v15 = vshll.u32 %v637_v6, 16  ;;  %v558_v18 = vadd.f32 %v4998_v11, %v5962_v34  ;;  %v942_v20 = vsel %vm894_vm2, %v6086_v7, %v941_v58  ;;  %v549_v22 = vpop.f32.mrb[21].mxu0 }
 0x11f   : > { %v701_v23 = vshrl.u32 %v636_v10, 16  ;;  %v704_v25 = vshll.u32 %v636_v10, 16  ;;  %5015 = vmatmul.mubr.msk.bf16.gmra.mrb[36].mxu0 %vm382_vm1, %v942_v20  ;;  %v550_v26 = vadd.f32 %v5962_v34, %v549_v22  ;;  %v948_v27 = vrot.slane %v946_v8, 1  ;;  %v4999_v35 = vpop.f32.mrb[22].mxu0 }
 0x120   : > { %v710_v37 = vrot.slane %v708_v14, 7  ;;  %v618_v32 = vmax.f32 %v558_v18, 0.0  ;;  %v953_v39 = vrot.slane %v951_v12, 1  ;;  %v561_v40 = vadd.f32 %v4999_v35, %v5962_v34  ;;  %v552_v41 = vpop.f32.mrb[23].mxu0 }
 0x121   : > { %v703_v33 = vrot.slane %v701_v23, 7  ;;  %v616_v43 = vmax.f32 %v550_v26, 0.0  ;;  %v6103_v44 = vor.u32 %v948_v27, %v944_v3  ;;  %v553_v46 = vadd.f32 %v5962_v34, %v552_v41  ;;  %v6124_v3 = vld [vmem:[#allocation2 + $0x68] sm:$0x1] }
 0x122   : > { %v713_v48 = vor.u32 %v711_v15, %v710_v37  ;;  %v816_v49 = vsel %vm5969_vm5, %v710_v37, 0  ;;  %v619_v51 = vmax.f32 %v561_v40, 0.0  ;;  %v956_v52 = vshrl.u32 %v6100_v36, 16 }
 0x123   : > { %845 = vst.msk [vmem:[#allocation2 + $0xa8] sm:$0xff] %vm382_vm1, %v816_v49  ;;  %v706_v56 = vor.u32 %v704_v25, %v703_v33  ;;  %v815_v57 = vsel %vm5969_vm5, %v703_v33, 0  ;;  %v954_v28 = vsel %vm894_vm2, %v6103_v44, %v953_v39  ;;  %v617_v58 = vmax.f32 %v553_v46, 0.0 }
 0x124   : > { %v800_v59 = vsel %vm5969_vm5, 0, %v713_v48  ;;  %843 = vst.msk [vmem:[#allocation2 + $0x98] sm:$0xff] %vm382_vm1, %v815_v57  ;;  %5018 = vmatprep.mubr.msk.bf16.mxu0 %vm382_vm1, %v954_v28  ;;  %v639_v60 = vpack.c.bf16 %v619_v51, %v618_v32  ;;  %v958_v61 = vshll.u32 %v6100_v36, 16  ;;  %v965_v62 = vrot.slane %v963_v13, 1  ;;  %v6143_v48 = vld [vmem:[#allocation2 + $0x78] sm:$0x1] }
 0x125   : > { %844 = vst.msk [vmem:[#allocation2 + $0xa0] sm:$0xff] %vm382_vm1, %v800_v59  ;;  %v799_v0 = vsel %vm5969_vm5, 0, %v706_v56  ;;  %v638_v1 = vpack.c.bf16 %v617_v58, %v616_v43  ;;  %v5002_v2 = vpop.f32.mrb[24].mxu0  ;;  %v968_v5 = vshrl.u32 %v6109_v54, 16  ;;  %v970_v6 = vshll.u32 %v6109_v54, 16  ;;  %v6137_v40 = vld [vmem:[#allocation2 + $0x70] sm:$0xff] }
 0x126   : > { %842 = vst.msk [vmem:[#allocation2 + $0x90] sm:$0xff] %vm382_vm1, %v799_v0  ;;  %v722_v8 = vshrl.u32 %v639_v60, 16  ;;  %v725_v9 = vshll.u32 %v639_v60, 16  ;;  %v574_v10 = vadd.f32 %v5002_v2, %v5962_v34  ;;  %v960_v11 = vrot.slane %v958_v61, 1  ;;  %v565_v12 = vpop.f32.mrb[25].mxu0  ;;  %v6150_v57 = vld [vmem:[#allocation2 + $0x80] sm:$0xff] }
 0x127   : > { %v715_v13 = vshrl.u32 %v638_v1, 16  ;;  %v718_v14 = vshll.u32 %v638_v1, 16  ;;  %v566_v15 = vadd.f32 %v5962_v34, %v565_v12  ;;  %v972_v18 = vrot.slane %v970_v6, 1  ;;  %v5003_v20 = vpop.f32.mrb[26].mxu0  ;;  %v6159_v61 = vld [vmem:[#allocation2 + $0x88] sm:$0x1] }
 0x128   : > { %v724_v22 = vrot.slane %v722_v8, 7  ;;  %v622_v23 = vmax.f32 %v574_v10, 0.0  ;;  %v6131_v25 = vor.u32 %v960_v11, %v956_v52  ;;  %v975_v26 = vshll.u32 %v6124_v3, 16  ;;  %v568_v27 = vpop.f32.mrb[27].mxu0 }
 0x129   : > { %v717_v35 = vrot.slane %v715_v13, 7  ;;  %v620_v37 = vmax.f32 %v566_v15, 0.0  ;;  %v6134_v32 = vor.u32 %v972_v18, %v968_v5  ;;  %v577_v39 = vadd.f32 %v5003_v20, %v5962_v34 }
 0x12a   : > { %v727_v41 = vor.u32 %v725_v9, %v724_v22  ;;  %v818_v33 = vsel %vm5969_vm5, %v724_v22, 0  ;;  %v966_v43 = vsel %vm894_vm2, %v6131_v25, %v965_v62  ;;  %v977_v46 = vrot.slane %v975_v26, 1  ;;  %v6164_v62 = vld [vmem:[%s7109_s3 + $0xa] sm:$0x3] }
 0x12b   : > { %849 = vst.msk [vmem:[#allocation2 + $0xc8] sm:$0xff] %vm382_vm1, %v818_v33  ;;  %v720_v49 = vor.u32 %v718_v14, %v717_v35  ;;  %v817_v51 = vsel %vm5969_vm5, %v717_v35, 0  ;;  %5019 = vmatmul.mubr.msk.bf16.gmra.mrb[40].mxu0 %vm382_vm1, %v966_v43  ;;  %v623_v52 = vmax.f32 %v577_v39, 0.0  ;;  %v569_v56 = vadd.f32 %v5962_v34, %v568_v27 }
 0x12c   : > { %v802_v28 = vsel %vm5969_vm5, 0, %v727_v41  ;;  %847 = vst.msk [vmem:[#allocation2 + $0xb8] sm:$0xff] %vm382_vm1, %v817_v51  ;;  %v978_v58 = vsel %vm894_vm2, %v6134_v32, %v977_v46  ;;  %v980_v59 = vshrl.u32 %v6137_v40, 16  ;;  %v982_v60 = vshll.u32 %v6137_v40, 16  ;;  %v6179_v14 = vld [vmem:[#allocation2 + $0xa0] sm:$0xff] }
 0x12d   : > { %848 = vst.msk [vmem:[#allocation2 + $0xc0] sm:$0xff] %vm382_vm1, %v802_v28  ;;  %v801_v0 = vsel %vm5969_vm5, 0, %v720_v49  ;;  %5022 = vmatprep.mubr.msk.bf16.mxu0 %vm382_vm1, %v978_v58  ;;  %v641_v1 = vpack.c.bf16 %v623_v52, %v622_v23  ;;  %v621_v2 = vmax.f32 %v569_v56, 0.0  ;;  %v5006_v5 = vpop.f32.mrb[28].mxu0  ;;  %v987_v6 = vshll.u32 %v6143_v48, 16  ;;  %v6171_v8 = vld [vmem:[#allocation2 + $0x90] sm:$0xff] }
 0x12e   : > { %846 = vst.msk [vmem:[#allocation2 + $0xb0] sm:$0xff] %vm382_vm1, %v801_v0  ;;  %v590_v9 = vadd.f32 %v5006_v5, %v5962_v34  ;;  %v984_v10 = vrot.slane %v982_v60, 1  ;;  %v581_v11 = vpop.f32.mrb[29].mxu0  ;;  %v992_v12 = vshrl.u32 %v6150_v57, 16  ;;  %v994_v13 = vshll.u32 %v6150_v57, 16  ;;  %5128 = vmatprep.mubr.msk.bf16.mxu1 %vm382_vm1, %v6171_v8 }
 0x12f   : > { %v736_v15 = vshrl.u32 %v641_v1, 16  ;;  %v739_v18 = vshll.u32 %v641_v1, 16  ;;  %v640_v20 = vpack.c.bf16 %v621_v2, %v620_v37  ;;  %v989_v22 = vrot.slane %v987_v6, 1  ;;  %v5007_v23 = vpop.f32.mrb[30].mxu0  ;;  %5129 = vmatmul.mubr.msk.bf16.vlgmr.msra.gmra.mrb[0].mxu1 %vm382_vm1, %v6179_v14  ;;  %v6198_v60 = vld [vmem:[#allocation2 + $0x98] sm:$0x1] }
 0x130   : > { %v626_v26 = vmax.f32 %v590_v9, 0.0  ;;  %v6183_v27 = vor.u32 %v984_v10, %v980_v59  ;;  %v582_v35 = vadd.f32 %v5962_v34, %v581_v11  ;;  %v996_v39 = vrot.slane %v994_v13, 1  ;;  %5145 = vmatpush3.bf16.msra.mxu1 %v5993_v24  ;;  %v584_v41 = vpop.f32.mrb[31].mxu0  ;;  %v6204_v6 = vld [vmem:[#allocation2 + $0xa8] sm:$0x1] }
 0x131   : > { %v738_v33 = vrot.slane %v736_v15, 7  ;;  %v729_v43 = vshrl.u32 %v640_v20, 16  ;;  %v732_v46 = vshll.u32 %v640_v20, 16  ;;  %v999_v49 = vshll.u32 %v6159_v61, 16  ;;  %5613 = vmatprep.subr.msk.bf16.mxu1 %vm431_vm0, %v6164_v62 }
 0x132   : > { %v990_v37 = vsel %vm894_vm2, %v6183_v27, %v989_v22  ;;  %v624_v51 = vmax.f32 %v582_v35, 0.0  ;;  %v6192_v52 = vor.u32 %v996_v39, %v992_v12  ;;  %v593_v56 = vadd.f32 %v5007_v23, %v5962_v34 }
 0x133   : > { %v741_v28 = vor.u32 %v739_v18, %v738_v33  ;;  %v820_v24 = vsel %vm5969_vm5, %v738_v33, 0  ;;  %v731_v58 = vrot.slane %v729_v43, 7  ;;  %5023 = vmatmul.mubr.msk.bf16.gmra.mrb[44].mxu0 %vm382_vm1, %v990_v37  ;;  %v1001_v59 = vrot.slane %v999_v49, 1 }
 0x134   : > { %853 = vst.msk [vmem:[#allocation2 + $0xe8] sm:$0xff] %vm382_vm1, %v820_v24  ;;  %v627_v0 = vmax.f32 %v593_v56, 0.0  ;;  %v585_v1 = vadd.f32 %v5962_v34, %v584_v41  ;;  %v1004_v2 = vshrl.u32 %v6171_v8, 16  ;;  %v1006_v5 = vshll.u32 %v6171_v8, 16  ;;  %v6220_v22 = vld [vmem:[#allocation2 + $0xc0] sm:$0xff] }
 0x135   : > { %v804_v9 = vsel %vm5969_vm5, 0, %v741_v28  ;;  %v734_v10 = vor.u32 %v732_v46, %v731_v58  ;;  %v819_v11 = vsel %vm5969_vm5, %v731_v58, 0  ;;  %v1002_v12 = vsel %vm894_vm2, %v6192_v52, %v1001_v59  ;;  %v6212_v13 = vld [vmem:[#allocation2 + $0xb0] sm:$0xff]  ;;  %v6232_v46 = vld [vmem:[#allocation2 + $0xb8] sm:$0x1] }
 0x136   : > { %852 = vst.msk [vmem:[#allocation2 + $0xe0] sm:$0xff] %vm382_vm1, %v804_v9  ;;  %851 = vst.msk [vmem:[#allocation2 + $0xd8] sm:$0xff] %vm382_vm1, %v819_v11  ;;  %5026 = vmatprep.mubr.msk.bf16.mxu0 %vm382_vm1, %v1002_v12  ;;  %v643_v34 = vpack.c.bf16 %v627_v0, %v626_v26  ;;  %v625_v15 = vmax.f32 %v585_v1, 0.0  ;;  %v1008_v18 = vrot.slane %v1006_v5, 1  ;;  %v1011_v20 = vshll.u32 %v6198_v60, 16  ;;  %5132 = vmatprep.mubr.msk.bf16.mxu1 %vm382_vm1, %v6212_v13 }
 0x137   : > { %v803_v23 = vsel %vm5969_vm5, 0, %v734_v10  ;;  %v1018_v35 = vshll.u32 %v6179_v14, 16  ;;  %v1023_v39 = vshll.u32 %v6204_v6, 16  ;;  %5133 = vmatmul.mubr.msk.bf16.gmra.mrb[4].mxu1 %vm382_vm1, %v6220_v22  ;;  %v1016_v43 = vshrl.u32 %v6179_v14, 16  ;;  %v6236_v1 = vld [vmem:[#allocation2 + $0xc8] sm:$0x1] }
 0x138   : > { %850 = vst.msk [vmem:[#allocation2 + $0xd0] sm:$0xff] %vm382_vm1, %v803_v23  ;;  %v750_v26 = vshrl.u32 %v643_v34, 16  ;;  %v642_v41 = vpack.c.bf16 %v625_v15, %v624_v51  ;;  %v6229_v33 = vor.u32 %v1008_v18, %v1004_v2  ;;  %v753_v49 = vshll.u32 %v643_v34, 16 }
 0x139   : > { %v1013_v37 = vrot.slane %v1011_v20, 1  ;;  %v1020_v56 = vrot.slane %v1018_v35, 1  ;;  %v1025_v28 = vrot.slane %v1023_v39, 1  ;;  %v1028_v59 = vshrl.u32 %v6212_v13, 16 }
 0x13a   : > { %v752_v24 = vrot.slane %v750_v26, 7  ;;  %v743_v58 = vshrl.u32 %v642_v41, 16  ;;  %v1030_v0 = vshll.u32 %v6212_v13, 16  ;;  %v746_v5 = vshll.u32 %v642_v41, 16 }
 0x13b   : > { %v1014_v51 = vsel %vm894_vm2, %v6229_v33, %v1013_v37  ;;  %v6240_v2 = vor.u32 %v1020_v56, %v1016_v43  ;;  %v1035_v9 = vshll.u32 %v6232_v46, 16  ;;  %v1042_v18 = vshll.u32 %v6220_v22, 16 }
 0x13c   : > { %v755_v10 = vor.u32 %v753_v49, %v752_v24  ;;  %v822_v11 = vsel %vm5969_vm5, %v752_v24, 0  ;;  %v745_v12 = vrot.slane %v743_v58, 7  ;;  %5027 = vmatmul.mubr.msk.bf16.gmra.mrb[48].mxu0 %vm382_vm1, %v1014_v51  ;;  %v1032_v34 = vrot.slane %v1030_v0, 1 }
 0x13d   : > { %857 = vst.msk [vmem:[#allocation2 + $0x108] sm:$0xff] %vm382_vm1, %v822_v11  ;;  %v1026_v15 = vsel %vm894_vm2, %v6240_v2, %v1025_v28  ;;  %v1047_v20 = vshll.u32 %v6236_v1, 16  ;;  %v6258_v41 = vld [vmem:[#allocation2 + $0xe0] sm:$0xff]  ;;  %v1037_v43 = vrot.slane %v1035_v9, 1  ;;  %v1040_v49 = vshrl.u32 %v6220_v22, 16 }
 0x13e   : > { %v806_v23 = vsel %vm5969_vm5, 0, %v755_v10  ;;  %v748_v35 = vor.u32 %v746_v5, %v745_v12  ;;  %v821_v39 = vsel %vm5969_vm5, %v745_v12, 0  ;;  %5030 = vmatprep.mubr.msk.bf16.mxu0 %vm382_vm1, %v1026_v15  ;;  %v6256_v26 = vor.u32 %v1032_v34, %v1028_v59  ;;  %v6269_v24 = vld [vmem:[#allocation2 + $0xd8] sm:$0x1]  ;;  %v6284_v12 = vld [vmem:[#allocation2 + $0xe8] sm:$0x1] }
 0x13f   : > { %856 = vst.msk [vmem:[#allocation2 + $0x100] sm:$0xff] %vm382_vm1, %v806_v23  ;;  %855 = vst.msk [vmem:[#allocation2 + $0xf8] sm:$0xff] %vm382_vm1, %v821_v39  ;;  %v1044_v37 = vrot.slane %v1042_v18, 1  ;;  %v6263_v56 = vld [vmem:[#allocation2 + $0xd0] sm:$0xff]  ;;  %v1066_v53 = vshll.u32 %v6258_v41, 16  ;;  %v1049_v51 = vrot.slane %v1047_v20, 1 }
 0x140   : > { %v805_v28 = vsel %vm5969_vm5, 0, %v748_v35  ;;  %5136 = vmatprep.mubr.msk.bf16.mxu1 %vm382_vm1, %v6263_v56  ;;  %7121 = vst [vmem:[#allocation6_spill] sm:$0xff] %v6269_v24  ;;  %v1054_v58 = vshll.u32 %v6263_v56, 16  ;;  %v1038_v59 = vsel %vm894_vm2, %v6256_v26, %v1037_v43  ;;  %v6280_v5 = vld [vmem:[#allocation2 + $0x18] sm:$0x1]  ;;  %v1052_v10 = vshrl.u32 %v6263_v56, 16 }
 0x141   : > { %854 = vst.msk [vmem:[#allocation2 + $0xf0] sm:$0xff] %vm382_vm1, %v805_v28  ;;  %v6275_v0 = vor.u32 %v1044_v37, %v1040_v49  ;;  %5137 = vmatmul.mubr.msk.bf16.gmra.mrb[8].mxu1 %vm382_vm1, %v6258_v41  ;;  %v1059_v11 = vshll.u32 %v6269_v24, 16  ;;  %7122 = vst [vmem:[#allocation7_spill] sm:$0xff] %v6284_v12  ;;  %v1068_v15 = vrot.slane %v1066_v53, 1  ;;  %v2142_v18 = vshll.u32 %v6280_v5, 16 }
 0x142   : > { %v1056_v9 = vrot.slane %v1054_v58, 1  ;;  %v1064_v20 = vshrl.u32 %v6258_v41, 16  ;;  %v1071_v35 = vshll.u32 %v6284_v12, 16  ;;  %v6301_v58 = vld [vmem:[#allocation2 + $0x28] sm:$0x1] }
 0x143   : > { %v1050_v34 = vsel %vm894_vm2, %v6275_v0, %v1049_v51  ;;  %v1061_v39 = vrot.slane %v1059_v11, 1  ;;  %v2144_v37 = vrot.slane %v2142_v18, 1  ;;  %v6335_v24 = vld [vmem:[#allocation2 + $0x58] sm:$0x1] }
 0x144   : > { %5031 = vmatmul.mubr.msk.bf16.gmra.mrb[52].mxu0 %vm382_vm1, %v1038_v59  ;;  %v6291_v23 = vor.u32 %v1056_v9, %v1052_v10  ;;  %v6295_v43 = vor.u32 %v1068_v15, %v1064_v20  ;;  %v6310_v9 = vld [vmem:[#allocation2 + $0x38] sm:$0x1]  ;;  %v1073_v10 = vrot.slane %v1071_v35, 1  ;;  %v2154_v20 = vshll.u32 %v6301_v58, 16 }
 0x145   : > { %5034 = vmatprep.mubr.msk.bf16.mxu0 %vm382_vm1, %v1050_v34  ;;  %v2145_v11 = vsel %vm894_vm2, %v6035_v16, %v2144_v37 }
 0x146   : > { %v6299_v28 = vld [vmem:[#allocation2 + $0xf8] sm:$0x1]  ;;  %v1062_v59 = vsel %vm894_vm2, %v6291_v23, %v1061_v39  ;;  %v6307_v53 = vld [vmem:[#allocation2 + $0x100] sm:$0xff]  ;;  %v1074_v35 = vsel %vm894_vm2, %v6295_v43, %v1073_v10  ;;  %v2166_v39 = vshll.u32 %v6310_v9, 16  ;;  %v2156_v37 = vrot.slane %v2154_v20, 1 }
 0x147   : > { %7123 = vst [vmem:[#allocation8_spill] sm:$0xff] %v6299_v28  ;;  %v1083_v18 = vshll.u32 %v6299_v28, 16  ;;  %v6329_v28 = vld [vmem:[#allocation2 + $0x48] sm:$0x1] }
 0x148   : > { %v6297_v49 = vld [vmem:[#allocation2 + $0xf0] sm:$0xff]  ;;  %v2157_v10 = vsel %vm894_vm2, %v6042_v21, %v2156_v37  ;;  %v2190_v21 = vshll.u32 %v6335_v24, 16  ;;  %v1645_v37 = vsel %vm431_vm0, %v6064_v47, 0 }
 0x149   : > { %5140 = vmatprep.mubr.msk.bf16.mxu1 %vm382_vm1, %v6297_v49  ;;  %v1078_v51 = vshll.u32 %v6297_v49, 16  ;;  %v1076_v34 = vshrl.u32 %v6297_v49, 16  ;;  %v1085_v16 = vrot.slane %v1083_v18, 1 }
 0x14a   : > { %5141 = vmatmul.mubr.msk.bf16.gmra.mrb[12].mxu1 %vm382_vm1, %v6307_v53  ;;  %v2192_v20 = vrot.slane %v2190_v21, 1 }
 0x14b   : > { %5146 = vmatprep.mubr.msk.bf16.mxu1 %vm382_vm1, %v2145_v11  ;;  %v1080_v15 = vrot.slane %v1078_v51, 1  ;;  %v2719_v51 = vsel %vm431_vm0, %v6164_v62, 0  ;;  %v2168_v11 = vrot.slane %v2166_v39, 1  ;;  %v6357_v39 = vld [vmem:[#allocation2 + $0x78] sm:$0x1] }
 0x14c   : > { %5035 = vmatmul.mubr.msk.bf16.gmra.mrb[56].mxu0 %vm382_vm1, %v1062_v59 }
 0x14d   : > { %5038 = vmatprep.mubr.msk.bf16.mxu0 %vm382_vm1, %v1074_v35  ;;  %v6325_v12 = vor.u32 %v1080_v15, %v1076_v34  ;;  %v6340_v34 = vld [vmem:[%s7109_s3 + $0xc] sm:$0x3]  ;;  %v2169_v62 = vsel %vm894_vm2, %v6086_v7, %v2168_v11  ;;  %v2178_v15 = vshll.u32 %v6329_v28, 16  ;;  %v6353_v35 = vld [vmem:[#allocation2 + $0x68] sm:$0x1] }
 0x14e   : > { %v6373_v11 = vld [vmem:[#allocation2 + $0x88] sm:$0x1] }
 0x14f   : > { %v1086_v59 = vsel %vm894_vm2, %v6325_v12, %v1085_v16  ;;  %v2180_v18 = vrot.slane %v2178_v15, 1  ;;  %v2193_v16 = vsel %vm894_vm2, %v6131_v25, %v2192_v20  ;;  %v6405_v20 = vld [vmem:[#allocation2 + $0xc8] sm:$0x1] }
 0x151   : > { %v2181_v7 = vsel %vm894_vm2, %v6103_v44, %v2180_v18 }
 0x152   : > { %5147 = vmatmul.mubr.msk.bf16.vlgmr.msra.gmra.mrb[16].mxu1 %vm382_vm1, %v2157_v10 }
 0x153   : > { %5179 = vmatpush3.bf16.msra.mxu1 %v2719_v51  ;;  %5150 = vmatprep.mubr.msk.bf16.mxu1 %vm382_vm1, %v2169_v62  ;;  %v2214_v51 = vshll.u32 %v6357_v39, 16  ;;  %v6389_v62 = vld [vmem:[#allocation2 + $0xa8] sm:$0x1] }
 0x154   : > { %5039 = vmatmul.mubr.msk.bf16.gmra.mrb[60].mxu0 %vm382_vm1, %v1086_v59  ;;  %5614 = vmatprep.subr.msk.bf16.mxu1 %vm431_vm0, %v6340_v34  ;;  %v6377_v59 = vld [vmem:[#allocation2 + $0x98] sm:$0x1] }
 0x155   : > { %5044 = vmatprep.mubr.msk.bf16.mxu0 %vm382_vm1, %v5922_v19  ;;  %v2202_v19 = vshll.u32 %v6353_v35, 16  ;;  %v2216_v25 = vrot.slane %v2214_v51, 1 }
 0x157   : > { %v2204_v44 = vrot.slane %v2202_v19, 1  ;;  %v6421_v19 = vld [vmem:[#allocation2 + $0xe8] sm:$0x1] }
 0x159   : > { %v2205_v47 = vsel %vm894_vm2, %v6134_v32, %v2204_v44 }
 0x15a   : > { %5151 = vmatmul.mubr.msk.bf16.gmra.mrb[20].mxu1 %vm382_vm1, %v2181_v7 }
 0x15b   : > { %5154 = vmatprep.mubr.msk.bf16.mxu1 %vm382_vm1, %v2193_v16 }
 0x15c   : > { %5045 = vmatmul.mubr.msk.bf16.vlgmr.msra.gmra.mrb[32].mxu0 %vm382_vm1, %v6019_v50  ;;  %v2217_v50 = vsel %vm894_vm2, %v6183_v27, %v2216_v25  ;;  %v6393_v27 = vld [vmem:[#allocation2 + $0xb8] sm:$0x1] }
 0x15d   : > { %5048 = vmatprep.mubr.msk.bf16.mxu0 %vm382_vm1, %v6013_v45  ;;  %5077 = vmatpush3.bf16.msra.mxu0 %v1645_v37  ;;  %v2226_v45 = vshll.u32 %v6373_v11, 16 }
 0x15e   : > { %5610 = vmatprep.subr.msk.bf16.mxu0 %vm431_vm0, %v5936_v30  ;;  %v2238_v30 = vshll.u32 %v6377_v59, 16 }
 0x15f   : > { %v2228_v32 = vrot.slane %v2226_v45, 1  ;;  %v6438_v45 = vld [vmem:[#allocation2 + $0x108] sm:$0x1] }
 0x160   : > { %v2240_v10 = vrot.slane %v2238_v30, 1 }
 0x161   : > { %v2229_v15 = vsel %vm894_vm2, %v6192_v52, %v2228_v32 }
 0x162   : > { %5155 = vmatmul.mubr.msk.bf16.gmra.mrb[24].mxu1 %vm382_vm1, %v2205_v47  ;;  %v2241_v21 = vsel %vm894_vm2, %v6229_v33, %v2240_v10  ;;  %v6409_v33 = vld [vmem:[#allocation2 + $0xd8] sm:$0x1]  ;;  %v2315_v10 = vshrl.u32 %v6307_v53, 16 }
 0x163   : > { %5158 = vmatprep.mubr.msk.bf16.mxu1 %vm382_vm1, %v2217_v50 }
 0x164   : > { %5049 = vmatmul.mubr.msk.bf16.gmra.mrb[36].mxu0 %vm382_vm1, %v6049_v29  ;;  %v2250_v29 = vshll.u32 %v6389_v62, 16 }
 0x165   : > { %5052 = vmatprep.mubr.msk.bf16.mxu0 %vm382_vm1, %v6068_v55  ;;  %v2262_v55 = vshll.u32 %v6393_v27, 16 }
 0x166   : > { %v2252_v52 = vrot.slane %v2250_v29, 1 }
 0x167   : > { %v2264_v18 = vrot.slane %v2262_v55, 1 }
 0x168   : > { %v2253_v7 = vsel %vm894_vm2, %v6240_v2, %v2252_v52  ;;  %v2621_v52 = vrot.slane %v6280_v5, 1 }
 0x169   : > { %v2265_v16 = vsel %vm894_vm2, %v6256_v26, %v2264_v18  ;;  %v6425_v26 = vld [vmem:[#allocation2 + $0xf8] sm:$0x1] }
 0x16a   : > { %5159 = vmatmul.mubr.msk.bf16.gmra.mrb[28].mxu1 %vm382_vm1, %v2229_v15  ;;  %v2310_v25 = vshll.u32 %v6425_v26, 16  ;;  %v2322_v15 = vshll.u32 %v6438_v45, 16 }
 0x16b   : > { %5162 = vmatprep.mubr.msk.bf16.mxu1 %vm382_vm1, %v2241_v21  ;;  %v2572_v21 = vld [vmem:[#allocation2 + $0x10] sm:$0xfe] }
 0x16c   : > { %5053 = vmatmul.mubr.msk.bf16.gmra.mrb[40].mxu0 %vm382_vm1, %v6100_v36  ;;  %v2274_v36 = vshll.u32 %v6405_v20, 16  ;;  %v2312_v50 = vrot.slane %v2310_v25, 1  ;;  %v2620_v29 = vrot.slane %v2572_v21, 1  ;;  %v2324_v55 = vrot.slane %v2322_v15, 1 }
 0x16d   : > { %5056 = vmatprep.mubr.msk.bf16.mxu0 %vm382_vm1, %v6109_v54  ;;  %v2286_v54 = vshll.u32 %v6409_v33, 16  ;;  %v2627_v25 = vrot.slane %v6310_v9, 1  ;;  %v1498_v9 = vld [vmem:[#allocation2 + $0x10] sm:$0xfe]  ;;  %v2630_v21 = vrot.slane %v6329_v28, 1 }
 0x16e   : > { %v2276_v2 = vrot.slane %v2274_v36, 1  ;;  %v2313_v32 = vsel %vm894_vm2, %v6325_v12, %v2312_v50  ;;  %v2622_v18 = vsel %vm1545_vm6, %v2620_v29, %v2621_v52  ;;  %v1497_v36 = vld [vmem:[#allocation2] sm:$0xfe]  ;;  %v1549_v15 = vrot.slane %v1498_v9, 1  ;;  %v1500_v28 = vld [vmem:[#allocation2 + $0x30] sm:$0xfe] }
 0x16f   : > { %v2288_v37 = vrot.slane %v2286_v54, 1  ;;  %v1546_v5 = vrot.slane %v1497_v36, 1  ;;  %v2633_v29 = vrot.slane %v6335_v24, 1  ;;  %v2578_v36 = vld [vmem:[#allocation2 + $0x70] sm:$0xfe]  ;;  %v2642_v9 = vrot.slane %v6373_v11, 1 }
 0x170   : > { %v2277_v51 = vsel %vm894_vm2, %v6275_v0, %v2276_v2  ;;  %v2317_v0 = vshll.u32 %v6307_v53, 16 }
 0x171   : > { %v2289_v44 = vsel %vm894_vm2, %v6291_v23, %v2288_v37  ;;  %v5677_v37 = vld [vmem:[#allocation2 + $0x8] sm:$0x1] }
 0x172   : > { %5163 = vmatmul.mubr.msk.bf16.gmra.mrb[0].mxu1 %vm382_vm1, %v2253_v7  ;;  %v2319_v30 = vrot.slane %v2317_v0, 1  ;;  %v2573_v7 = vld [vmem:[#allocation2 + $0x20] sm:$0xfe] }
 0x173   : > { %5166 = vmatprep.mubr.msk.bf16.mxu1 %vm382_vm1, %v2265_v16  ;;  %v2574_v16 = vld [vmem:[#allocation2 + $0x30] sm:$0xfe]  ;;  %v2623_v54 = vrot.slane %v2573_v7, 1  ;;  %v2577_v7 = vld [vmem:[#allocation2 + $0x60] sm:$0xfe] }
 0x174   : > { %5057 = vmatmul.mubr.msk.bf16.gmra.mrb[44].mxu0 %vm382_vm1, %v6137_v40  ;;  %v2298_v40 = vshll.u32 %v6421_v19, 16  ;;  %v2626_v2 = vrot.slane %v2574_v16, 1 }
 0x175   : > { %5060 = vmatprep.mubr.msk.bf16.mxu0 %vm382_vm1, %v6150_v57 }
 0x176   : > { %v2300_v47 = vrot.slane %v2298_v40, 1  ;;  %v2982_v40 = vsel %vm431_vm0, %v6340_v34, 0  ;;  %v2628_v50 = vsel %vm1545_vm6, %v2626_v2, %v2627_v25  ;;  %v1499_v34 = vld [vmem:[#allocation2 + $0x20] sm:$0xfe]  ;;  %v1555_v2 = vrot.slane %v1500_v28, 1 }
 0x177   : > { %v1559_v25 = vrot.slane %v6075_v63, 1 }
 0x178   : > { %v2301_v23 = vsel %vm894_vm2, %v6295_v43, %v2300_v47  ;;  %v2320_v43 = vor.u32 %v2319_v30, %v2315_v10  ;;  %v6469_v47 = vld [vmem:[%s7109_s3 + $0xe] sm:$0x3]  ;;  %v2575_v30 = vld [vmem:[#allocation2 + $0x40] sm:$0xfe] }
 0x17a   : > { %5167 = vmatmul.mubr.msk.bf16.gmra.mrb[4].mxu1 %vm382_vm1, %v2277_v51  ;;  %v2325_v12 = vsel %vm894_vm2, %v2320_v43, %v2324_v55  ;;  %v1547_v51 = vrot.slane %v5677_v37, 1  ;;  %v1552_v43 = vrot.slane %v1499_v34, 1  ;;  %v1550_v55 = vrot.slane %v6007_v42, 1  ;;  %v1501_v42 = vld [vmem:[#allocation2 + $0x40] sm:$0xfe] }
 0x17b   : > { %5170 = vmatprep.mubr.msk.bf16.mxu1 %vm382_vm1, %v2289_v44  ;;  %v2624_v44 = vrot.slane %v6301_v58, 1  ;;  %v2576_v58 = vld [vmem:[#allocation2 + $0x50] sm:$0xfe]  ;;  %v1558_v37 = vrot.slane %v1501_v42, 1  ;;  %v1571_v42 = vrot.slane %v6159_v61, 1 }
 0x17c   : > { %5061 = vmatmul.mubr.msk.bf16.gmra.mrb[48].mxu0 %vm382_vm1, %v6171_v8  ;;  %v2632_v10 = vrot.slane %v2576_v58, 1  ;;  %v1551_v16 = vsel %vm1545_vm6, %v1549_v15, %v1550_v55 }
 0x17d   : > { %5064 = vmatprep.mubr.msk.bf16.mxu0 %vm382_vm1, %v6179_v14  ;;  %v2625_v0 = vsel %vm1545_vm6, %v2623_v54, %v2624_v44  ;;  %v2635_v54 = vrot.slane %v2577_v7, 1  ;;  %v1556_v44 = vrot.slane %v6037_v17, 1  ;;  %v1503_v17 = vld [vmem:[#allocation2 + $0x60] sm:$0xfe]  ;;  %v2648_v7 = vrot.slane %v6389_v62, 1 }
 0x17e   : > { %v1564_v34 = vrot.slane %v1503_v17, 1  ;;  %v2586_v17 = vld [vmem:[#allocation2 + $0xf0] sm:$0xfe] }
 0x182   : > { %5171 = vmatmul.mubr.msk.bf16.gmra.mrb[8].mxu1 %vm382_vm1, %v2301_v23  ;;  %v1548_v23 = vsel %vm1545_vm6, %v1546_v5, %v1547_v51  ;;  %v2636_v5 = vrot.slane %v6353_v35, 1  ;;  %v2639_v51 = vrot.slane %v6357_v39, 1  ;;  %v1560_v35 = vsel %vm1545_vm6, %v1558_v37, %v1559_v25  ;;  %v1502_v39 = vld [vmem:[#allocation2 + $0x50] sm:$0xfe] }
 0x183   : > { %5174 = vmatprep.mubr.msk.bf16.mxu1 %vm382_vm1, %v2313_v32  ;;  %v2629_v32 = vrot.slane %v2575_v30, 1  ;;  %v1561_v58 = vrot.slane %v1502_v39, 1  ;;  %v2657_v25 = vrot.slane %v6409_v33, 1  ;;  %v1508_v33 = vld [vmem:[#allocation2 + $0xb0] sm:$0xfe] }
 0x184   : > { %5065 = vmatmul.mubr.msk.bf16.gmra.mrb[52].mxu0 %vm382_vm1, %v6212_v13 }
 0x185   : > { %5068 = vmatprep.mubr.msk.bf16.mxu0 %vm382_vm1, %v6220_v22  ;;  %v2631_v52 = vsel %vm1545_vm6, %v2629_v32, %v2630_v21  ;;  %v2645_v32 = vrot.slane %v6377_v59, 1  ;;  %v1565_v21 = vrot.slane %v6124_v3, 1  ;;  %v1504_v59 = vld [vmem:[#allocation2 + $0x70] sm:$0xfe] }
 0x187   : > { %v1566_v11 = vsel %vm1545_vm6, %v1564_v34, %v1565_v21  ;;  %v2663_v34 = vrot.slane %v6425_v26, 1  ;;  %v1510_v26 = vld [vmem:[#allocation2 + $0xd0] sm:$0xfe] }
 0x18a   : > { %5175 = vmatmul.mubr.msk.bf16.gmra.mrb[12].mxu1 %vm382_vm1, %v2325_v12  ;;  %v1553_v12 = vrot.slane %v6002_v38, 1  ;;  %v2638_v38 = vrot.slane %v2578_v36, 1  ;;  %v2651_v36 = vrot.slane %v6393_v27, 1  ;;  %v1506_v27 = vld [vmem:[#allocation2 + $0x90] sm:$0xfe] }
 0x18b   : > { %5180 = vmatprep.mubr.msk.bf16.mxu1 %vm382_vm1, %v2622_v18  ;;  %v2634_v18 = vsel %vm1545_vm6, %v2632_v10, %v2633_v29  ;;  %v1562_v10 = vrot.slane %v6081_v4, 1  ;;  %v2581_v29 = vld [vmem:[#allocation2 + $0xa0] sm:$0xfe] }
 0x18c   : > { %5069 = vmatmul.mubr.msk.bf16.gmra.mrb[56].mxu0 %vm382_vm1, %v6263_v56  ;;  %v1554_v24 = vsel %vm1545_vm6, %v1552_v43, %v1553_v12  ;;  %v1505_v4 = vld [vmem:[#allocation2 + $0x80] sm:$0xfe]  ;;  %v2647_v12 = vrot.slane %v2581_v29, 1 }
 0x18d   : > { %5072 = vmatprep.mubr.msk.bf16.mxu0 %vm382_vm1, %v6258_v41  ;;  %v1563_v55 = vsel %vm1545_vm6, %v1561_v58, %v1562_v10  ;;  %v2660_v58 = vrot.slane %v6421_v19, 1 }
 0x18e   : > { %v2649_v28 = vsel %vm1545_vm6, %v2647_v12, %v2648_v7  ;;  %v2915_v7 = vld [vmem:[#allocation2 + $0x20] sm:$0xff] }
 0x192   : > { %5181 = vmatmul.mubr.msk.bf16.vlgmr.msra.gmra.mrb[16].mxu1 %vm382_vm1, %v2625_v0  ;;  %v2640_v0 = vsel %vm1545_vm6, %v2638_v38, %v2639_v51  ;;  %v2583_v38 = vld [vmem:[#allocation2 + $0xc0] sm:$0xfe]  ;;  %v1573_v51 = vrot.slane %v1506_v27, 1  ;;  %v1840_v27 = vld [vmem:[#allocation2 + $0x10] sm:$0xff] }
 0x193   : > { %5213 = vmatpush3.bf16.msra.mxu1 %v2982_v40  ;;  %5184 = vmatprep.mubr.msk.bf16.mxu1 %vm382_vm1, %v2628_v50  ;;  %v2637_v40 = vsel %vm1545_vm6, %v2635_v54, %v2636_v5  ;;  %v2579_v50 = vld [vmem:[#allocation2 + $0x80] sm:$0xfe]  ;;  %v2584_v5 = vld [vmem:[#allocation2 + $0xd0] sm:$0xfe]  ;;  %v2653_v37 = vrot.slane %v2583_v38, 1 }
 0x194   : > { %5073 = vmatmul.mubr.msk.bf16.gmra.mrb[60].mxu0 %vm382_vm1, %v6297_v49  ;;  %5615 = vmatprep.subr.msk.bf16.mxu1 %vm431_vm0, %v6469_v47  ;;  %v2641_v30 = vrot.slane %v2579_v50, 1  ;;  %v2656_v61 = vrot.slane %v2584_v5, 1  ;;  %v2916_v38 = vld [vmem:[#allocation2 + $0x30] sm:$0xff]  ;;  %v2917_v5 = vld [vmem:[#allocation2 + $0x40] sm:$0xff] }
 0x195   : > { %5078 = vmatprep.mubr.msk.bf16.mxu0 %vm382_vm1, %v1548_v23  ;;  %v2580_v23 = vld [vmem:[#allocation2 + $0x90] sm:$0xfe] }
 0x196   : > { %v2644_v63 = vrot.slane %v2580_v23, 1  ;;  %v2643_v15 = vsel %vm1545_vm6, %v2641_v30, %v2642_v9  ;;  %v2658_v23 = vsel %vm1545_vm6, %v2656_v61, %v2657_v25 }
 0x198   : > { %v2646_v43 = vsel %vm1545_vm6, %v2644_v63, %v2645_v32  ;;  %v1579_v63 = vrot.slane %v1508_v33, 1  ;;  %v1580_v32 = vrot.slane %v6232_v46, 1  ;;  %v1511_v46 = vld [vmem:[#allocation2 + $0xe0] sm:$0xfe] }
 0x19a   : > { %5185 = vmatmul.mubr.msk.bf16.gmra.mrb[20].mxu1 %vm382_vm1, %v2631_v52  ;;  %v2582_v52 = vld [vmem:[#allocation2 + $0xb0] sm:$0xfe]  ;;  %v1581_v29 = vsel %vm1545_vm6, %v1579_v63, %v1580_v32  ;;  %v6639_v32 = vld [vmem:[#allocation2 + $0x68] sm:$0x1] }
 0x19b   : > { %5188 = vmatprep.mubr.msk.bf16.mxu1 %vm382_vm1, %v2634_v18  ;;  %v2650_v3 = vrot.slane %v2582_v52, 1  ;;  %v1567_v18 = vrot.slane %v1504_v59, 1  ;;  %v1585_v52 = vrot.slane %v1510_v26, 1  ;;  %v7124_v59 = vld [vmem:[#allocation6_spill] sm:$0xff] }
 0x19c   : > { %5079 = vmatmul.mubr.msk.bf16.vlgmr.msra.gmra.mrb[32].mxu0 %vm382_vm1, %v1551_v16  ;;  %v1570_v16 = vrot.slane %v1505_v4, 1  ;;  %v1586_v4 = vrot.slane %v7124_v59, 1  ;;  %v6650_v59 = vld [vmem:[#allocation2 + $0x78] sm:$0x1] }
 0x19d   : > { %5082 = vmatprep.mubr.msk.bf16.mxu0 %vm382_vm1, %v1554_v24  ;;  %5111 = vmatpush3.bf16.msra.mxu0 %v5942_v31  ;;  %v1557_v31 = vsel %vm1545_vm6, %v1555_v2, %v1556_v44  ;;  %v1568_v24 = vrot.slane %v6143_v48, 1  ;;  %v2652_v54 = vsel %vm1545_vm6, %v2650_v3, %v2651_v36  ;;  %v1507_v48 = vld [vmem:[#allocation2 + $0xa0] sm:$0xfe]  ;;  %v2654_v44 = vrot.slane %v6405_v20, 1  ;;  %v7125_v3 = vld [vmem:[#allocation7_spill] sm:$0xff] }
 0x19e   : > { %v1572_v62 = vsel %vm1545_vm6, %v1570_v16, %v1571_v42  ;;  %v1587_v16 = vsel %vm1545_vm6, %v1585_v52, %v1586_v4  ;;  %v7126_v42 = vld [vmem:[#allocation8_spill] sm:$0xff] }
 0x19f   : > { %v1569_v2 = vsel %vm1545_vm6, %v1567_v18, %v1568_v24  ;;  %v2655_v50 = vsel %vm1545_vm6, %v2653_v37, %v2654_v44  ;;  %v1589_v18 = vrot.slane %v7125_v3, 1  ;;  %v1512_v24 = vld [vmem:[#allocation2 + $0xf0] sm:$0xfe]  ;;  %v6653_v3 = vld [vmem:[#allocation2 + $0x88] sm:$0x1] }
 0x1a0   : > { %v6585_v37 = vld [vmem:[#allocation2 + $0x70] sm:$0xff] }
 0x1a2   : > { %5189 = vmatmul.mubr.msk.bf16.gmra.mrb[24].mxu1 %vm382_vm1, %v2637_v40  ;;  %v1576_v40 = vrot.slane %v1507_v48, 1  ;;  %v6579_v48 = vld [vmem:[#allocation2 + $0x60] sm:$0xff] }
 0x1a3   : > { %5192 = vmatprep.mubr.msk.bf16.mxu1 %vm382_vm1, %v2640_v0  ;;  %v1574_v0 = vrot.slane %v6198_v60, 1  ;;  %v1509_v60 = vld [vmem:[#allocation2 + $0xc0] sm:$0xfe] }
 0x1a4   : > { %5083 = vmatmul.mubr.msk.bf16.gmra.mrb[36].mxu0 %vm382_vm1, %v1557_v31  ;;  %v1577_v31 = vrot.slane %v6204_v6, 1  ;;  %v2662_v6 = vrot.slane %v2586_v17, 1  ;;  %v1582_v9 = vrot.slane %v1509_v60, 1  ;;  %v3260_v60 = vshll.u32 %v6579_v48, 16 }
 0x1a5   : > { %5086 = vmatprep.mubr.msk.bf16.mxu0 %vm382_vm1, %v1560_v35  ;;  %v2585_v35 = vld [vmem:[#allocation2 + $0xe0] sm:$0xfe]  ;;  %v1575_v39 = vsel %vm1545_vm6, %v1573_v51, %v1574_v0  ;;  %v3224_v51 = vshll.u32 %v2916_v38, 16 }
 0x1a6   : > { %v1578_v20 = vsel %vm1545_vm6, %v1576_v40, %v1577_v31  ;;  %v2659_v30 = vrot.slane %v2585_v35, 1  ;;  %v2664_v21 = vsel %vm1545_vm6, %v2662_v6, %v2663_v34  ;;  %v3236_v40 = vshll.u32 %v2917_v5, 16 }
 0x1a7   : > { %v3226_v0 = vrot.slane %v3224_v51, 1  ;;  %v3222_v31 = vshrl.u32 %v2916_v38, 16  ;;  %v3234_v35 = vshrl.u32 %v2917_v5, 16 }
 0x1a8   : > { %v2661_v10 = vsel %vm1545_vm6, %v2659_v30, %v2660_v58  ;;  %v6636_v58 = vld [vmem:[#allocation2 + $0x58] sm:$0x1] }
 0x1a9   : > { %v3227_v17 = vor.u32 %v3226_v0, %v3222_v31 }
 0x1aa   : > { %5193 = vmatmul.mubr.msk.bf16.gmra.mrb[28].mxu1 %vm382_vm1, %v2643_v15  ;;  %v1583_v15 = vrot.slane %v6236_v1, 1  ;;  %v2666_v1 = vrot.slane %v6438_v45, 1  ;;  %v1591_v45 = vrot.slane %v1512_v24, 1  ;;  %v3277_v24 = vshll.u32 %v6650_v59, 16 }
 0x1ab   : > { %5196 = vmatprep.mubr.msk.bf16.mxu1 %vm382_vm1, %v2646_v43  ;;  %v2587_v43 = vld [vmem:[#allocation2 + $0x100] sm:$0xfe] }
 0x1ac   : > { %5087 = vmatmul.mubr.msk.bf16.gmra.mrb[40].mxu0 %vm382_vm1, %v1563_v55  ;;  %v1584_v19 = vsel %vm1545_vm6, %v1582_v9, %v1583_v15  ;;  %v2665_v55 = vrot.slane %v2587_v43, 1  ;;  %v3262_v15 = vrot.slane %v3260_v60, 1  ;;  %v3253_v43 = vshll.u32 %v6636_v58, 16 }
 0x1ad   : > { %5090 = vmatprep.mubr.msk.bf16.mxu0 %vm382_vm1, %v1566_v11  ;;  %v1588_v11 = vrot.slane %v1511_v46, 1  ;;  %v3272_v46 = vshll.u32 %v6585_v37, 16 }
 0x1ae   : > { %v2667_v12 = vsel %vm1545_vm6, %v2665_v55, %v2666_v1  ;;  %v3255_v1 = vrot.slane %v3253_v43, 1 }
 0x1af   : > { %v1590_v36 = vsel %vm1545_vm6, %v1588_v11, %v1589_v18 }
 0x1b2   : > { %5197 = vmatmul.mubr.msk.bf16.gmra.mrb[0].mxu1 %vm382_vm1, %v2649_v28  ;;  %v3452_v28 = vsel %vm431_vm0, %v6469_v47, 0  ;;  %v6575_v47 = vld [vmem:[#allocation2 + $0x50] sm:$0xff] }
 0x1b3   : > { %5200 = vmatprep.mubr.msk.bf16.mxu1 %vm382_vm1, %v2652_v54  ;;  %v1592_v54 = vrot.slane %v7126_v42, 1  ;;  %v3289_v42 = vshll.u32 %v6653_v3, 16 }
 0x1b4   : > { %5091 = vmatmul.mubr.msk.bf16.gmra.mrb[44].mxu0 %vm382_vm1, %v1569_v2  ;;  %v4745_v2 = vld [vmem:[%s7109_s3 + $0x10] sm:$0x3] }
 0x1b5   : > { %5094 = vmatprep.mubr.msk.bf16.mxu0 %vm382_vm1, %v1572_v62  ;;  %v1593_v62 = vsel %vm1545_vm6, %v1591_v45, %v1592_v54  ;;  %v3794_v6 = vsel %vm431_vm0, %v4745_v2, 0  ;;  %v3193_v45 = vld [vmem:[#allocation2 + $0xa0] sm:$0xff] }
 0x1ba   : > { %5201 = vmatmul.mubr.msk.bf16.gmra.mrb[4].mxu1 %vm382_vm1, %v2655_v50  ;;  %v6625_v50 = vld [vmem:[#allocation2 + $0x48] sm:$0x1] }
 0x1bb   : > { %5204 = vmatprep.mubr.msk.bf16.mxu1 %vm382_vm1, %v2658_v23 }
 0x1bc   : > { %5095 = vmatmul.mubr.msk.bf16.gmra.mrb[48].mxu0 %vm382_vm1, %v1575_v39  ;;  %v3241_v39 = vshll.u32 %v6625_v50, 16 }
 0x1bd   : > { %5098 = vmatprep.mubr.msk.bf16.mxu0 %vm382_vm1, %v1578_v20  ;;  %v3248_v20 = vshll.u32 %v6575_v47, 16 }
 0x1be   : > { %v3243_v63 = vrot.slane %v3241_v39, 1  ;;  %v6672_v39 = vld [vmem:[#allocation2 + $0xb8] sm:$0x1] }
 0x1bf   : > { %v3250_v34 = vrot.slane %v3248_v20, 1 }
 0x1c2   : > { %5205 = vmatmul.mubr.msk.bf16.gmra.mrb[8].mxu1 %vm382_vm1, %v2661_v10 }
 0x1c3   : > { %5208 = vmatprep.mubr.msk.bf16.mxu1 %vm382_vm1, %v2664_v21  ;;  %v3246_v21 = vshrl.u32 %v6575_v47, 16 }
 0x1c4   : > { %5099 = vmatmul.mubr.msk.bf16.gmra.mrb[52].mxu0 %vm382_vm1, %v1581_v29  ;;  %v3258_v29 = vshrl.u32 %v6579_v48, 16 }
 0x1c5   : > { %5102 = vmatprep.mubr.msk.bf16.mxu0 %vm382_vm1, %v1584_v19  ;;  %v3265_v19 = vshll.u32 %v6639_v32, 16  ;;  %v3251_v26 = vor.u32 %v3250_v34, %v3246_v21  ;;  %v3201_v34 = vld [vmem:[#allocation2 + $0xe0] sm:$0xff] }
 0x1c6   : > { %v3263_v55 = vor.u32 %v3262_v15, %v3258_v29 }
 0x1c7   : > { %v3267_v11 = vrot.slane %v3265_v19, 1  ;;  %v3256_v4 = vsel %vm894_vm2, %v3251_v26, %v3255_v1  ;;  %v3356_v19 = vshll.u32 %v3201_v34, 16 }
 0x1c9   : > { %v3268_v18 = vsel %vm894_vm2, %v3263_v55, %v3267_v11  ;;  %v6682_v55 = vld [vmem:[#allocation2 + $0xd8] sm:$0x1]  ;;  %v6685_v11 = vld [vmem:[#allocation2 + $0xe8] sm:$0x1] }
 0x1ca   : > { %5209 = vmatmul.mubr.msk.bf16.gmra.mrb[12].mxu1 %vm382_vm1, %v2667_v12  ;;  %v3274_v12 = vrot.slane %v3272_v46, 1 }
 0x1cb   : > { %5214 = vmatprep.mubr.msk.bf16.mxu1 %vm382_vm1, %v2915_v7 }
 0x1cc   : > { %5103 = vmatmul.mubr.msk.bf16.gmra.mrb[56].mxu0 %vm382_vm1, %v1587_v16  ;;  %v3191_v16 = vld [vmem:[#allocation2 + $0x90] sm:$0xff] }
 0x1cd   : > { %5106 = vmatprep.mubr.msk.bf16.mxu0 %vm382_vm1, %v1590_v36  ;;  %v3270_v36 = vshrl.u32 %v6585_v37, 16 }
 0x1cf   : > { %v3275_v54 = vor.u32 %v3274_v12, %v3270_v36  ;;  %v3358_v12 = vrot.slane %v3356_v19, 1  ;;  %v3205_v36 = vld [vmem:[#allocation2 + $0x100] sm:$0xff] }
 0x1d0   : > { %v4082_v19 = vld [vmem:[%s5868_s21 + $0x20] sm:$0xff] }
 0x1d2   : > { %5215 = vmatmul.mubr.msk.bf16.vlgmr.msra.gmra.mrb[16].mxu1 %vm382_vm1, %v2916_v38 }
 0x1d3   : > { %5247 = vmatpush3.bf16.msra.mxu1 %v3452_v28  ;;  %5218 = vmatprep.mubr.msk.bf16.mxu1 %vm382_vm1, %v2917_v5 }
 0x1d4   : > { %5107 = vmatmul.mubr.msk.bf16.gmra.mrb[60].mxu0 %vm382_vm1, %v1593_v62  ;;  %5616 = vmatprep.subr.msk.bf16.mxu1 %vm431_vm0, %v4745_v2  ;;  %v3279_v62 = vrot.slane %v3277_v24, 1  ;;  %v3354_v24 = vshrl.u32 %v3201_v34, 16  ;;  %v4081_v34 = vld [vmem:[%s5868_s21 + $0x18] sm:$0xff] }
 0x1d5   : > { %5112 = vmatprep.mubr.msk.bf16.mxu0 %vm382_vm1, %v1840_v27  ;;  %v3291_v27 = vrot.slane %v3289_v42, 1 }
 0x1da   : > { %5219 = vmatmul.mubr.msk.bf16.gmra.mrb[20].mxu1 %vm382_vm1, %v6575_v47 }
 0x1db   : > { %5222 = vmatprep.mubr.msk.bf16.mxu1 %vm382_vm1, %v6579_v48 }
 0x1dc   : > { %5113 = vmatmul.mubr.msk.bf16.vlgmr.msra.gmra.mrb[32].mxu0 %vm382_vm1, %v2915_v7 }
 0x1dd   : > { %5116 = vmatprep.mubr.msk.bf16.mxu0 %vm382_vm1, %v2916_v38  ;;  %v3296_v38 = vshll.u32 %v3191_v16, 16 }
 0x1e2   : > { %5223 = vmatmul.mubr.msk.bf16.gmra.mrb[24].mxu1 %vm382_vm1, %v6585_v37 }
 0x1e3   : > { %5226 = vmatprep.mubr.msk.bf16.mxu1 %vm382_vm1, %v6150_v57  ;;  %v6604_v57 = vld [vmem:[#allocation2 + $0x80] sm:$0xff] }
 0x1e4   : > { %5117 = vmatmul.mubr.msk.bf16.gmra.mrb[36].mxu0 %vm382_vm1, %v2917_v5  ;;  %v3284_v52 = vshll.u32 %v6604_v57, 16  ;;  %v3282_v28 = vshrl.u32 %v6604_v57, 16  ;;  %v3308_v5 = vshll.u32 %v3193_v45, 16 }
 0x1e5   : > { %5120 = vmatprep.mubr.msk.bf16.mxu0 %vm382_vm1, %v6575_v47  ;;  %v6662_v47 = vld [vmem:[#allocation2 + $0x98] sm:$0x1] }
 0x1e6   : > { %v3301_v51 = vshll.u32 %v6662_v47, 16 }
 0x1ea   : > { %5227 = vmatmul.mubr.msk.bf16.gmra.mrb[28].mxu1 %vm382_vm1, %v6171_v8  ;;  %v3212_v8 = vshll.u32 %v2915_v7, 16 }
 0x1eb   : > { %5230 = vmatprep.mubr.msk.bf16.mxu1 %vm382_vm1, %v6179_v14  ;;  %v6614_v14 = vld [vmem:[#allocation2 + $0x28] sm:$0x1] }
 0x1ec   : > { %5121 = vmatmul.mubr.msk.bf16.gmra.mrb[40].mxu0 %vm382_vm1, %v6579_v48  ;;  %v3217_v61 = vshll.u32 %v6614_v14, 16  ;;  %v3280_v48 = vsel %vm894_vm2, %v3275_v54, %v3279_v62  ;;  %v3359_v54 = vor.u32 %v3358_v12, %v3354_v24  ;;  %v6692_v62 = vld [vmem:[#allocation2 + $0xf8] sm:$0x1] }
 0x1ed   : > { %5124 = vmatprep.mubr.msk.bf16.mxu0 %vm382_vm1, %v6585_v37  ;;  %v4085_v24 = vld [vmem:[%s5868_s21 + $0x38] sm:$0xff] }
 0x1ee   : > { %v3219_v25 = vrot.slane %v3217_v61, 1  ;;  %v3294_v61 = vshrl.u32 %v3191_v16, 16  ;;  %v3349_v16 = vshll.u32 %v6682_v55, 16 }
 0x1f2   : > { %5231 = vmatmul.mubr.msk.bf16.gmra.mrb[0].mxu1 %vm382_vm1, %v6212_v13  ;;  %v3214_v13 = vrot.slane %v3212_v8, 1  ;;  %v3298_v8 = vrot.slane %v3296_v38, 1  ;;  %v3380_v38 = vshll.u32 %v3205_v36, 16 }
 0x1f3   : > { %5234 = vmatprep.mubr.msk.bf16.mxu1 %vm382_vm1, %v6220_v22  ;;  %v3210_v22 = vshrl.u32 %v2915_v7, 16  ;;  %v3286_v7 = vrot.slane %v3284_v52, 1 }
 0x1f4   : > { %5125 = vmatmul.mubr.msk.bf16.gmra.mrb[44].mxu0 %vm382_vm1, %v6604_v57  ;;  %v3310_v57 = vrot.slane %v3308_v5, 1  ;;  %v3299_v0 = vor.u32 %v3298_v8, %v3294_v61  ;;  %v6695_v8 = vld [vmem:[#allocation2 + $0x108] sm:$0x1]  ;;  %v4078_v61 = vld [vmem:[%s5868_s21] sm:$0xff] }
 0x1f5   : > { %v3215_v44 = vor.u32 %v3214_v13, %v3210_v22  ;;  %v3287_v2 = vor.u32 %v3286_v7, %v3282_v28  ;;  %v6665_v13 = vld [vmem:[#allocation2 + $0xa8] sm:$0x1]  ;;  %v3195_v22 = vld [vmem:[#allocation2 + $0xb0] sm:$0xff] }
 0x1f7   : > { %v3292_v37 = vsel %vm894_vm2, %v3287_v2, %v3291_v27  ;;  %v3351_v2 = vrot.slane %v3349_v16, 1  ;;  %v3696_v16 = vrot.slane %v6614_v14, 1 }
 0x1fa   : > { %5235 = vmatmul.mubr.msk.bf16.gmra.mrb[4].mxu1 %vm382_vm1, %v6263_v56  ;;  %v6621_v56 = vld [vmem:[#allocation2 + $0x110] sm:$0xff] }
 0x1fb   : > { %5238 = vmatprep.mubr.msk.bf16.mxu1 %vm382_vm1, %v6258_v41  ;;  %v6623_v41 = vld [vmem:[#allocation2 + $0x38] sm:$0x1] }
 0x1fc   : > { %v3229_v23 = vshll.u32 %v6623_v41, 16 }
 0x1fe   : > { %v3231_v30 = vrot.slane %v3229_v23, 1  ;;  %v3303_v23 = vrot.slane %v3301_v51, 1  ;;  %v4079_v51 = vld [vmem:[%s5868_s21 + $0x8] sm:$0xff] }
 0x200   : > { %v3232_v9 = vsel %vm894_vm2, %v3227_v17, %v3231_v30  ;;  %v3304_v17 = vsel %vm894_vm2, %v3299_v0, %v3303_v23  ;;  %v4110_v0 = vmax.f32 %v4078_v61, 0.0  ;;  %v4092_v61 = vld [vmem:[%s5868_s21 + $0x70] sm:$0xff] }
 0x202   : > { %5239 = vmatmul.mubr.msk.bf16.gmra.mrb[8].mxu1 %vm382_vm1, %v6297_v49  ;;  %v3220_v49 = vsel %vm894_vm2, %v3215_v44, %v3219_v25  ;;  %v3197_v44 = vld [vmem:[#allocation2 + $0xc0] sm:$0xff]  ;;  %v3313_v25 = vshll.u32 %v6665_v13, 16 }
 0x203   : > { %5242 = vmatprep.mubr.msk.bf16.mxu1 %vm382_vm1, %v6307_v53  ;;  %v3238_v53 = vrot.slane %v3236_v40, 1  ;;  %v3306_v40 = vshrl.u32 %v3193_v45, 16  ;;  %v3332_v31 = vshll.u32 %v3197_v44, 16  ;;  %v3361_v45 = vshll.u32 %v6685_v11, 16 }
 0x205   : > { %v3239_v33 = vor.u32 %v3238_v53, %v3234_v35  ;;  %v3311_v53 = vor.u32 %v3310_v57, %v3306_v40  ;;  %v3315_v35 = vrot.slane %v3313_v25, 1  ;;  %v3334_v30 = vrot.slane %v3332_v31, 1  ;;  %v6703_v40 = vld [vmem:[#allocation2 + $0x118] sm:$0x1] }
 0x206   : > { %v3363_v5 = vrot.slane %v3361_v45, 1  ;;  %v3392_v25 = vshll.u32 %v6621_v56, 16  ;;  %v3385_v31 = vshll.u32 %v6695_v8, 16  ;;  %v3648_v45 = vld [vmem:[#allocation2 + $0x30] sm:$0xfe] }
 0x207   : > { %v3244_v10 = vsel %vm894_vm2, %v3239_v33, %v3243_v63  ;;  %v6675_v33 = vld [vmem:[#allocation2 + $0xc8] sm:$0x1]  ;;  %v3316_v60 = vsel %vm894_vm2, %v3311_v53, %v3315_v35  ;;  %v3318_v63 = vshrl.u32 %v3195_v22, 16  ;;  %v3378_v53 = vshrl.u32 %v3205_v36, 16  ;;  %v4084_v36 = vld [vmem:[%s5868_s21 + $0x30] sm:$0xff] }
 0x208   : > { %v3337_v15 = vshll.u32 %v6675_v33, 16 }
 0x20a   : > { %5243 = vmatmul.mubr.msk.bf16.gmra.mrb[12].mxu1 %vm382_vm1, %v6621_v56  ;;  %v3339_v46 = vrot.slane %v3337_v15, 1 }
 0x20b   : > { %5248 = vmatprep.mubr.msk.bf16.mxu1 %vm382_vm1, %v3220_v49  ;;  %v3320_v49 = vshll.u32 %v3195_v22, 16  ;;  %v3382_v22 = vrot.slane %v3380_v38, 1 }
 0x20d   : > { %v3322_v20 = vrot.slane %v3320_v49, 1  ;;  %v4111_v49 = vmax.f32 %v4079_v51, 0.0  ;;  %v4093_v51 = vld [vmem:[%s5868_s21 + $0x78] sm:$0xff] }
 0x20f   : > { %v3323_v21 = vor.u32 %v3322_v20, %v3318_v63  ;;  %v4142_v35 = vpack.c.bf16 %v4111_v49, %v4110_v0  ;;  %v3397_v20 = vshll.u32 %v6703_v40, 16  ;;  %v3387_v63 = vrot.slane %v3385_v31, 1  ;;  %v4090_v49 = vld [vmem:[%s5868_s21 + $0x60] sm:$0xff] }
 0x210   : > { %v4124_v0 = vmax.f32 %v4092_v61, 0.0 }
 0x211   : > { %4174 = vrot.lane.b32.xlu0 %v4142_v35, %s5759_s17  ;;  %v4122_v35 = vmax.f32 %v4090_v49, 0.0  ;;  %v4106_v49 = vld [vmem:[%s5868_s21 + $0xe0] sm:$0xff] }
 0x212   : > { %5249 = vmatmul.mubr.msk.bf16.vlgmr.msra.gmra.mrb[16].mxu1 %vm382_vm1, %v3232_v9  ;;  %v3325_v9 = vshll.u32 %v6672_v39, 16 }
 0x213   : > { %5281 = vmatpush3.bf16.msra.mxu1 %v3794_v6  ;;  %5252 = vmatprep.mubr.msk.bf16.mxu1 %vm382_vm1, %v3244_v10  ;;  %v3199_v6 = vld [vmem:[#allocation2 + $0xd0] sm:$0xff]  ;;  %v3330_v10 = vshrl.u32 %v3197_v44, 16  ;;  %v3373_v44 = vshll.u32 %v6692_v62, 16 }
 0x214   : > { %v3344_v43 = vshll.u32 %v3199_v6, 16  ;;  %v3327_v26 = vrot.slane %v3325_v9, 1  ;;  %v3342_v7 = vshrl.u32 %v3199_v6, 16  ;;  %v3394_v6 = vrot.slane %v3392_v25, 1  ;;  %v4080_v9 = vld [vmem:[%s5868_s21 + $0x10] sm:$0xff] }
 0x215   : > { %v3335_v29 = vor.u32 %v3334_v30, %v3330_v10  ;;  %v3390_v30 = vshrl.u32 %v6621_v56, 16  ;;  %v4112_v15 = vmax.f32 %v4080_v9, 0.0  ;;  %v4083_v56 = vld [vmem:[%s5868_s21 + $0x28] sm:$0xff]  ;;  %v4097_v9 = vld [vmem:[%s5868_s21 + $0x98] sm:$0xff] }
 0x216   : > { %v3328_v52 = vsel %vm894_vm2, %v3323_v21, %v3327_v26  ;;  %v3346_v1 = vrot.slane %v3344_v43, 1  ;;  %v4113_v21 = vmax.f32 %v4081_v34, 0.0  ;;  %v3699_v34 = vrot.slane %v6623_v41, 1  ;;  %v4099_v41 = vld [vmem:[%s5868_s21 + $0xa8] sm:$0xff] }
 0x217   : > { %v3395_v26 = vor.u32 %v3394_v6, %v3390_v30 }
 0x218   : > { %v3347_v28 = vor.u32 %v3346_v1, %v3342_v7  ;;  %v4114_v1 = vmax.f32 %v4082_v19, 0.0  ;;  %v3650_v19 = vld [vmem:[#allocation2 + $0x50] sm:$0xfe] }
 0x21a   : > { %5253 = vmatmul.mubr.msk.bf16.gmra.mrb[20].mxu1 %vm382_vm1, %v3256_v4  ;;  %v3340_v4 = vsel %vm894_vm2, %v3335_v29, %v3339_v46  ;;  %v3352_v27 = vsel %vm894_vm2, %v3347_v28, %v3351_v2  ;;  %v3399_v29 = vrot.slane %v3397_v20, 1  ;;  %v3647_v46 = vld [vmem:[#allocation2 + $0x20] sm:$0xfe]  ;;  %v4088_v2 = vld [vmem:[%s5868_s21 + $0x50] sm:$0xff] }
 0x21b   : > { %5256 = vmatprep.mubr.msk.bf16.mxu1 %vm382_vm1, %v3268_v18  ;;  %v3203_v18 = vld [vmem:[#allocation2 + $0xf0] sm:$0xff]  ;;  %v3649_v28 = vld [vmem:[#allocation2 + $0x40] sm:$0xfe] }
 0x21c   : > { %v3368_v42 = vshll.u32 %v3203_v18, 16  ;;  %v3366_v57 = vshrl.u32 %v3203_v18, 16  ;;  %v3695_v18 = vrot.slane %v3647_v46, 1  ;;  %v3400_v7 = vsel %vm894_vm2, %v3395_v26, %v3399_v29  ;;  %v4094_v20 = vld [vmem:[%s5868_s21 + $0x80] sm:$0xff] }
 0x21d   : > { %v3701_v30 = vrot.slane %v3649_v28, 1  ;;  %v4129_v46 = vmax.f32 %v4097_v9, 0.0 }
 0x21e   : > { %v3697_v38 = vsel %vm1545_vm6, %v3695_v18, %v3696_v16  ;;  %v3651_v18 = vld [vmem:[#allocation2 + $0x60] sm:$0xfe] }
 0x222   : > { %5257 = vmatmul.mubr.msk.bf16.gmra.mrb[24].mxu1 %vm382_vm1, %v3280_v48  ;;  %v3370_v48 = vrot.slane %v3368_v42, 1  ;;  %v4116_v42 = vmax.f32 %v4084_v36, 0.0 }
 0x223   : > { %5260 = vmatprep.mubr.msk.bf16.mxu1 %vm382_vm1, %v3292_v37  ;;  %v3364_v37 = vsel %vm894_vm2, %v3359_v54, %v3363_v5  ;;  %v4117_v54 = vmax.f32 %v4085_v24, 0.0  ;;  %v4089_v5 = vld [vmem:[%s5868_s21 + $0x58] sm:$0xff]  ;;  %v4131_v24 = vmax.f32 %v4099_v41, 0.0 }
 0x224   : > { %v3371_v23 = vor.u32 %v3370_v48, %v3366_v57  ;;  %v4120_v48 = vmax.f32 %v4088_v2, 0.0  ;;  %v4087_v57 = vld [vmem:[%s5868_s21 + $0x48] sm:$0xff] }
 0x225   : > { %v4145_v14 = vpack.c.bf16 %v4117_v54, %v4116_v42  ;;  %v4119_v25 = vmax.f32 %v4087_v57, 0.0  ;;  %v4103_v2 = vld [vmem:[%s5868_s21 + $0xc8] sm:$0xff] }
 0x226   : > { %v4135_v61 = vmax.f32 %v4103_v2, 0.0  ;;  %v3661_v2 = vld [vmem:[#allocation2 + $0x100] sm:$0xfe] }
 0x22a   : > { %5261 = vmatmul.mubr.msk.bf16.gmra.mrb[28].mxu1 %vm382_vm1, %v3304_v17  ;;  %v3383_v17 = vor.u32 %v3382_v22, %v3378_v53  ;;  %v4091_v53 = vld [vmem:[%s5868_s21 + $0x68] sm:$0xff] }
 0x22b   : > { %5264 = vmatprep.mubr.msk.bf16.mxu1 %vm382_vm1, %v3316_v60  ;;  %v3375_v60 = vrot.slane %v3373_v44, 1  ;;  %v3698_v44 = vrot.slane %v3648_v45, 1  ;;  %v3704_v45 = vrot.slane %v3650_v19, 1 }
 0x22c   : > { %v3388_v43 = vsel %vm894_vm2, %v3383_v17, %v3387_v63  ;;  %v4123_v17 = vmax.f32 %v4091_v53, 0.0  ;;  %v4096_v63 = vld [vmem:[%s5868_s21 + $0x90] sm:$0xff]  ;;  %v4107_v53 = vld [vmem:[%s5868_s21 + $0xe8] sm:$0xff] }
 0x22d   : > { %v3376_v10 = vsel %vm894_vm2, %v3371_v23, %v3375_v60  ;;  %v4125_v23 = vmax.f32 %v4093_v51, 0.0  ;;  %v4095_v60 = vld [vmem:[%s5868_s21 + $0x88] sm:$0xff]  ;;  %v3700_v29 = vsel %vm1545_vm6, %v3698_v44, %v3699_v34  ;;  %v4128_v26 = vmax.f32 %v4096_v63, 0.0 }
 0x22f   : > { %v4151_v28 = vpack.c.bf16 %v4129_v46, %v4128_v26  ;;  %v3655_v26 = vld [vmem:[#allocation2 + $0xa0] sm:$0xfe]  ;;  %v3717_v46 = vrot.slane %v6662_v47, 1 }
 0x232   : > { %5265 = vmatmul.mubr.msk.bf16.gmra.mrb[0].mxu1 %vm382_vm1, %v3328_v52  ;;  %v4143_v52 = vpack.c.bf16 %v4113_v21, %v4112_v15  ;;  %v4148_v15 = vpack.c.bf16 %v4123_v17, %v4122_v35  ;;  %v4126_v21 = vmax.f32 %v4094_v20, 0.0  ;;  %v3653_v35 = vld [vmem:[#allocation2 + $0x80] sm:$0xfe]  ;;  %v4138_v20 = vmax.f32 %v4106_v49, 0.0 }
 0x233   : > { %5268 = vmatprep.mubr.msk.bf16.mxu1 %vm382_vm1, %v3340_v4  ;;  %v4115_v4 = vmax.f32 %v4083_v56, 0.0  ;;  %v4149_v56 = vpack.c.bf16 %v4125_v23, %v4124_v0  ;;  %v4109_v23 = vld [vmem:[%s5868_s21 + $0xf8] sm:$0xff]  ;;  %v3713_v34 = vrot.slane %v3653_v35, 1 }
 0x234   : > { %4176 = vrot.lane.b32.xlu0 %v4143_v52, %s5759_s17  ;;  %v4098_v52 = vld [vmem:[%s5868_s21 + $0xa0] sm:$0xff]  ;;  %v4141_v9 = vmax.f32 %v4109_v23, 0.0 }
 0x235   : > { %v4144_v12 = vpack.c.bf16 %v4115_v4, %v4114_v1  ;;  %v4100_v1 = vld [vmem:[%s5868_s21 + $0xb0] sm:$0xff]  ;;  %v4101_v4 = vld [vmem:[%s5868_s21 + $0xb8] sm:$0xff]  ;;  %v4130_v36 = vmax.f32 %v4098_v52, 0.0  ;;  %v3720_v52 = vrot.slane %v6665_v13, 1 }
 0x236   : > { %v4132_v42 = vmax.f32 %v4100_v1, 0.0  ;;  %v4133_v54 = vmax.f32 %v4101_v4, 0.0  ;;  %v3656_v1 = vld [vmem:[#allocation2 + $0xb0] sm:$0xfe]  ;;  %v3657_v4 = vld [vmem:[#allocation2 + $0xc0] sm:$0xfe] }
 0x237   : > { %4178 = vrot.lane.b32.xlu1 %v4144_v12, %s5759_s17  ;;  %v4254_v12 = vld [vmem:[%s7111_s5] sm:$0xf]  ;;  %v4152_v57 = vpack.c.bf16 %v4131_v24, %v4130_v36  ;;  %v3658_v36 = vld [vmem:[#allocation2 + $0xd0] sm:$0xfe] }
 0x238   : > { %5617 = vmatprep.subr.msk.bf16.mxu0 %vm4295_vm7, %v4254_v12  ;;  %v4153_v44 = vpack.c.bf16 %v4133_v54, %v4132_v42  ;;  %v3659_v24 = vld [vmem:[#allocation2 + $0xe0] sm:$0xfe]  ;;  %v3729_v42 = vrot.slane %v6682_v55, 1  ;;  %v3732_v54 = vrot.slane %v6685_v11, 1 }
 0x23a   : > { %5269 = vmatmul.mubr.msk.bf16.gmra.mrb[4].mxu1 %vm382_vm1, %v3352_v27  ;;  %v4086_v27 = vld [vmem:[%s5868_s21 + $0x40] sm:$0xff] }
 0x23b   : > { %5272 = vmatprep.mubr.msk.bf16.mxu1 %vm382_vm1, %v3364_v37  ;;  %v4121_v37 = vmax.f32 %v4089_v5, 0.0  ;;  %v4118_v22 = vmax.f32 %v4086_v27, 0.0  ;;  %4180 = vrot.lane.b32.xlu1 %v4145_v14, %s5759_s17  ;;  %v3707_v5 = vrot.slane %v3651_v18, 1  ;;  %v4104_v27 = vld [vmem:[%s5868_s21 + $0xd0] sm:$0xff]  ;;  %v4105_v14 = vld [vmem:[%s5868_s21 + $0xd8] sm:$0xff]  ;;  %v3725_v18 = vrot.slane %v3657_v4, 1 }
 0x23c   : > { %v4137_v0 = vmax.f32 %v4105_v14, 0.0  ;;  %v3735_v14 = vrot.slane %v6692_v62, 1 }
 0x23d   : > { %v4147_v31 = vpack.c.bf16 %v4121_v37, %v4120_v48  ;;  %v4146_v6 = vpack.c.bf16 %v4119_v25, %v4118_v22  ;;  %v3705_v48 = vrot.slane %v6636_v58, 1  ;;  %v3708_v37 = vrot.slane %v6639_v32, 1  ;;  %v3652_v32 = vld [vmem:[#allocation2 + $0x70] sm:$0xfe] }
 0x23e   : > { %v4136_v25 = vmax.f32 %v4104_v27, 0.0  ;;  %v3737_v27 = vrot.slane %v3661_v2, 1 }
 0x23f   : > { %4182 = vrot.lane.b32.xlu0 %v4146_v6, %s5759_s17  ;;  %4184 = vrot.lane.b32.xlu1 %v4147_v31, %s5759_s17  ;;  %v3706_v51 = vsel %vm1545_vm6, %v3704_v45, %v3705_v48  ;;  %v3709_v58 = vsel %vm1545_vm6, %v3707_v5, %v3708_v37  ;;  %v4108_v31 = vld [vmem:[%s5868_s21 + $0xf0] sm:$0xff]  ;;  %v3728_v45 = vrot.slane %v3658_v36, 1  ;;  %v3738_v48 = vrot.slane %v6695_v8, 1 }
 0x240   : > { %v4155_v6 = vpack.c.bf16 %v4137_v0, %v4136_v25  ;;  %v4140_v63 = vmax.f32 %v4108_v31, 0.0  ;;  %v3662_v37 = vld [vmem:[#allocation2 + $0x110] sm:$0xfe] }
 0x241   : > { %v3739_v11 = vsel %vm1545_vm6, %v3737_v27, %v3738_v48 }
 0x242   : > { %5273 = vmatmul.mubr.msk.bf16.gmra.mrb[8].mxu1 %vm382_vm1, %v3376_v10  ;;  %v3702_v10 = vrot.slane %v6625_v50, 1 }
 0x243   : > { %5276 = vmatprep.mubr.msk.bf16.mxu1 %vm382_vm1, %v3388_v43  ;;  %v4127_v43 = vmax.f32 %v4095_v60, 0.0  ;;  %4186 = vrot.lane.b32.xlu0 %v4148_v15, %s5759_s17  ;;  %v4139_v60 = vmax.f32 %v4107_v53, 0.0  ;;  %v3714_v15 = vrot.slane %v6653_v3, 1  ;;  %v3719_v3 = vrot.slane %v3655_v26, 1 }
 0x244   : > { %v3703_v50 = vsel %vm1545_vm6, %v3701_v30, %v3702_v10  ;;  %4188 = vrot.lane.b32.xlu1 %v4149_v56, %s5759_s17  ;;  %v3710_v30 = vrot.slane %v3652_v32, 1  ;;  %v3711_v10 = vrot.slane %v6650_v59, 1  ;;  %v3654_v56 = vld [vmem:[#allocation2 + $0x90] sm:$0xfe] }
 0x245   : > { %v4150_v16 = vpack.c.bf16 %v4127_v43, %v4126_v21  ;;  %v4156_v21 = vpack.c.bf16 %v4139_v60, %v4138_v20  ;;  %v3715_v19 = vsel %vm1545_vm6, %v3713_v34, %v3714_v15  ;;  %v3716_v59 = vrot.slane %v3654_v56, 1 }
 0x246   : > { %v3712_v43 = vsel %vm1545_vm6, %v3710_v30, %v3711_v10 }
 0x247   : > { %4190 = vrot.lane.b32.xlu0 %v4150_v16, %s5759_s17  ;;  %v3718_v41 = vsel %vm1545_vm6, %v3716_v59, %v3717_v46  ;;  %v3726_v16 = vrot.slane %v6675_v33, 1 }
 0x248   : > { %4192 = vrot.lane.b32.xlu1 %v4151_v28, %s5759_s17  ;;  %v3731_v28 = vrot.slane %v3659_v24, 1 }
 0x249   : > { %v3727_v13 = vsel %vm1545_vm6, %v3725_v18, %v3726_v16 }
 0x24a   : > { %5277 = vmatmul.mubr.msk.bf16.gmra.mrb[12].mxu1 %vm382_vm1, %v3400_v7  ;;  %v4297_v7 = vsel %vm4295_vm7, %v4254_v12, 0  ;;  %v3722_v12 = vrot.slane %v3656_v1, 1  ;;  %v3733_v33 = vsel %vm1545_vm6, %v3731_v28, %v3732_v54 }
 0x24b   : > { %5282 = vmatprep.mubr.msk.bf16.mxu1 %vm382_vm1, %v3697_v38  ;;  %5315 = vmatpush3.bf16.msra.mxu0 %v4297_v7  ;;  %v4102_v38 = vld [vmem:[%s5868_s21 + $0xc0] sm:$0xff]  ;;  %v3723_v7 = vrot.slane %v6672_v39, 1  ;;  %v3730_v39 = vsel %vm1545_vm6, %v3728_v45, %v3729_v42  ;;  %s5760_s21 = smov [#allocation3]  }
 0x24c   : > { %v4134_v22 = vmax.f32 %v4102_v38, 0.0  ;;  %4194 = vrot.lane.b32.xlu0 %v4152_v57, %s5759_s17  ;;  %4196 = vrot.lane.b32.xlu1 %v4153_v44, %s5759_s17  ;;  %v3660_v38 = vld [vmem:[#allocation2 + $0xf0] sm:$0xfe]  ;;  %v3740_v57 = vrot.slane %v3662_v37, 1  ;;  %s5682_s20 = sshll.u32 %s5760_s21, 4  ;;  %s5683_s20 = int_to_ptr.vmem [resolvable:$false] %s5682_s20 }
 0x24d   : > { %v3724_v47 = vsel %vm1545_vm6, %v3722_v12, %v3723_v7  ;;  %v3734_v5 = vrot.slane %v3660_v38, 1  ;;  %s5684_s23 = scalar_lea.vmem %s5683_s20, 8192  ;;  %p5685_p1 = scmp.lt.s32.totalorder %s7049_s15, %s5683_s20 }
 0x24e   : > { %v4154_v17 = vpack.c.bf16 %v4135_v61, %v4134_v22  ;;  %v3741_v22 = vrot.slane %v6703_v40, 1  ;;  %p5686_p2 = scmp.lt.s32.totalorder %s5684_s23, %s5678_s19 }
 0x24f   : > { %v3736_v55 = vsel %vm1545_vm6, %v3734_v5, %v3735_v14 }
 0x250   : > { %4198 = vrot.lane.b32.xlu0 %v4154_v17, %s5759_s17  ;;  %4200 = vrot.lane.b32.xlu1 %v4155_v6, %s5759_s17  ;;  %v3742_v61 = vsel %vm1545_vm6, %v3740_v57, %v3741_v22  ;;  %p5687_p3 = por %p5686_p2, %p5685_p1 }
 0x252   : > { %5283 = vmatmul.mubr.msk.bf16.vlgmr.msra.gmra.mrb[16].mxu1 %vm382_vm1, %v3700_v29  ;;  %v4157_v29 = vpack.c.bf16 %v4141_v9, %v4140_v63  ;;  %p5688_p5 = pnand %p5687_p3, %p5681_p0 }
 0x253   : > { %5286 = vmatprep.mubr.msk.bf16.mxu1 %vm382_vm1, %v3703_v50  ;;  %v3721_v50 = vsel %vm1545_vm6, %v3719_v3, %v3720_v52  ;;  %v6857_v52 = vld [vmem:[%s7110_s4] ss:$0 sm:$0xff] }
 0x254   : > { %4202 = vrot.lane.b32.xlu0 %v4156_v21, %s5759_s17  ;;  %4204 = vrot.lane.b32.xlu1 %v4157_v29, %s5759_s17 }
 0x25a   : > { %5287 = vmatmul.mubr.msk.bf16.gmra.mrb[20].mxu1 %vm382_vm1, %v3706_v51 }
 0x25b   : > { %5290 = vmatprep.mubr.msk.bf16.mxu1 %vm382_vm1, %v3709_v58 }
 0x262   : > { %5291 = vmatmul.mubr.msk.bf16.gmra.mrb[24].mxu1 %vm382_vm1, %v3712_v43 }
 0x263   : > { %5294 = vmatprep.mubr.msk.bf16.mxu1 %vm382_vm1, %v3715_v19 }
 0x26a   : > { %5295 = vmatmul.mubr.msk.bf16.gmra.mrb[28].mxu1 %vm382_vm1, %v3718_v41 }
 0x26b   : > { %5298 = vmatprep.mubr.msk.bf16.mxu1 %vm382_vm1, %v3721_v50 }
 0x272   : > { %5299 = vmatmul.mubr.msk.bf16.gmra.mrb[0].mxu1 %vm382_vm1, %v3724_v47 }
 0x273   : > { %5302 = vmatprep.mubr.msk.bf16.mxu1 %vm382_vm1, %v3727_v13 }
 0x27a   : > { %5303 = vmatmul.mubr.msk.bf16.gmra.mrb[4].mxu1 %vm382_vm1, %v3730_v39 }
 0x27b   : > { %5306 = vmatprep.mubr.msk.bf16.mxu1 %vm382_vm1, %v3733_v33 }
 0x282   : > { %5307 = vmatmul.mubr.msk.bf16.gmra.mrb[8].mxu1 %vm382_vm1, %v3736_v55 }
 0x283   : > { %5310 = vmatprep.mubr.msk.bf16.mxu1 %vm382_vm1, %v3739_v11  ;;  %v4175_v13 = vpop.permute.xlu0 %4174 }
 0x28a   : > { %5311 = vmatmul.mubr.msk.bf16.gmra.mrb[12].mxu1 %vm382_vm1, %v3742_v61 }
 0x28f   : > { %v6814_v51 = vpop.f32.mrb[48].mxu0 }
 0x290   : > { %v6816_v62 = vpop.f32.mrb[49].mxu0 }
 0x291   : > { %v6818_v8 = vpop.f32.mrb[50].mxu0 }
 0x292   : > { %v6820_v44 = vpop.f32.mrb[51].mxu0 }
 0x297   : > { %v6822_v25 = vpop.f32.mrb[52].mxu0 }
 0x298   : > { %v6824_v0 = vpop.f32.mrb[53].mxu0 }
 0x299   : > { %v6826_v49 = vpop.f32.mrb[54].mxu0 }
 0x29a   : > { %v6828_v53 = vpop.f32.mrb[55].mxu0 }
 0x29f   : > { %v6830_v40 = vpop.f32.mrb[56].mxu0 }
 0x2a0   : > { %v6832_v58 = vpop.f32.mrb[57].mxu0 }
 0x2a1   : > { %v6834_v32 = vpop.f32.mrb[58].mxu0 }
 0x2a2   : > { %v6836_v31 = vpop.f32.mrb[59].mxu0 }
 0x2a6   : > { %v4177_v14 = vpop.permute.xlu0 %4176 }
 0x2a7   : > { %v6838_v23 = vpop.f32.mrb[60].mxu0 }
 0x2a8   : > { %v6840_v35 = vpop.f32.mrb[61].mxu0 }
 0x2a9   : > { %v6842_v17 = vpop.f32.mrb[62].mxu0 }
 0x2aa   : > { %v6844_v20 = vpop.f32.mrb[63].mxu0 }
 0x2af   : > { %v5114_v60 = vpop.f32.mrb[32].mxu0 }
 0x2b0   : > { %v1943_v30 = vpop.f32.mrb[33].mxu0 }
 0x2b1   : > { %v5115_v6 = vpop.f32.mrb[34].mxu0 }
 0x2b2   : > { %v1946_v63 = vpop.f32.mrb[35].mxu0 }
 0x2b7   : > { %v5118_v9 = vpop.f32.mrb[36].mxu0 }
 0x2b8   : > { %v1959_v34 = vpop.f32.mrb[37].mxu0 }
 0x2b9   : > { %v5119_v10 = vpop.f32.mrb[38].mxu0 }
 0x2ba   : > { %v1962_v15 = vpop.f32.mrb[39].mxu0 }
 0x2bf   : > { %v5122_v21 = vpop.f32.mrb[40].mxu0 }
 0x2c0   : > { %v1975_v43 = vpop.f32.mrb[41].mxu0 }
 0x2c1   : > { %v5123_v29 = vpop.f32.mrb[42].mxu0 }
 0x2c2   : > { %v1978_v19 = vpop.f32.mrb[43].mxu0 }
 0x2c7   : > { %v6846_v56 = vpop.f32.mrb[44].mxu0 }
 0x2c8   : > { %v6848_v26 = vpop.f32.mrb[45].mxu0 }
 0x2c9   : > { %v6850_v59 = vpop.f32.mrb[46].mxu0 }
 0x2ca   : > { %v6852_v3 = vpop.f32.mrb[47].mxu0 }
 0x325   : > { %v5284_v46 = vpop.f32.mrb[16].mxu1 }
 0x326   : > { %v5350_v41 = vadd.f32 %v5284_v46, %v5114_v60  ;;  %v3830_v50 = vpop.f32.mrb[17].mxu1  ;;  %v4179_v60 = vpop.permute.xlu1 %4178 }
 0x327   : > { %v5351_v1 = vadd.f32 %v3830_v50, %v1943_v30  ;;  %v5285_v4 = vpop.f32.mrb[18].mxu1 }
 0x328   : > { %v3998_v12 = vadd.f32 %v5350_v41, %v6857_v52  ;;  %v5352_v18 = vadd.f32 %v5285_v4, %v5115_v6  ;;  %v3833_v7 = vpop.f32.mrb[19].mxu1 }
 0x329   : > { %v3996_v16 = vadd.f32 %v5351_v1, %v6857_v52  ;;  %v5353_v47 = vadd.f32 %v3833_v7, %v1946_v63 }
 0x32a   : > { %v3999_v36 = vadd.f32 %v5352_v18, %v6857_v52  ;;  %v4030_v45 = vmax.f32 %v3998_v12, 0.0  ;;  %v4181_v18 = vpop.permute.xlu1 %4180 }
 0x32b   : > { %v3997_v24 = vadd.f32 %v5353_v47, %v6857_v52  ;;  %v4028_v42 = vmax.f32 %v3996_v16, 0.0 }
 0x32c   : > { %v4031_v28 = vmax.f32 %v3999_v36, 0.0 }
 0x32d   : > { %v4029_v54 = vmax.f32 %v3997_v24, 0.0  ;;  %v5288_v39 = vpop.f32.mrb[20].mxu1 }
 0x32e   : > { %v4061_v33 = vpack.c.bf16 %v4031_v28, %v4030_v45  ;;  %v5354_v38 = vadd.f32 %v5288_v39, %v5118_v9  ;;  %v3846_v2 = vpop.f32.mrb[21].mxu1 }
 0x32f   : > { %v4060_v5 = vpack.c.bf16 %v4029_v54, %v4028_v42  ;;  %v5355_v27 = vadd.f32 %v3846_v2, %v1959_v34  ;;  %v5289_v48 = vpop.f32.mrb[22].mxu1 }
 0x330   : > { %v4002_v37 = vadd.f32 %v5354_v38, %v6857_v52  ;;  %v5356_v55 = vadd.f32 %v5289_v48, %v5119_v10  ;;  %v3849_v11 = vpop.f32.mrb[23].mxu1  ;;  %v4211_v30 = vsel %vm382_vm1, %v4061_v33, %v4177_v14  ;;  %v4185_v48 = vpop.permute.xlu1 %4184 }
 0x331   : > { %v4208_v57 = vsel %vm382_vm1, %v4060_v5, %v4175_v13  ;;  %v4000_v22 = vadd.f32 %v5355_v27, %v6857_v52  ;;  %v5357_v61 = vadd.f32 %v3849_v11, %v1962_v15 }
 0x332   : > { %v4003_v6 = vadd.f32 %v5356_v55, %v6857_v52  ;;  %5316 = vmatprep.mubr.msk.bf16.mxu0 %vm4262_vm8, %v4208_v57  ;;  %v4034_v9 = vmax.f32 %v4002_v37, 0.0 }
 0x333   : > { %v4001_v63 = vadd.f32 %v5357_v61, %v6857_v52  ;;  %5317 = vmatmul.mubr.msk.bf16.vlgmr.msra.gmra.mrb[64].mxu0 %vm4262_vm8, %v4211_v30  ;;  %v4032_v10 = vmax.f32 %v4000_v22, 0.0 }
 0x334   : > { %v4035_v34 = vmax.f32 %v4003_v6, 0.0 }
 0x335   : > { %v4033_v46 = vmax.f32 %v4001_v63, 0.0  ;;  %v5292_v41 = vpop.f32.mrb[24].mxu1 }
 0x336   : > { %v4063_v50 = vpack.c.bf16 %v4035_v34, %v4034_v9  ;;  %v5358_v1 = vadd.f32 %v5292_v41, %v5122_v21  ;;  %v3862_v4 = vpop.f32.mrb[25].mxu1 }
 0x337   : > { %v4062_v15 = vpack.c.bf16 %v4033_v46, %v4032_v10  ;;  %v5359_v12 = vadd.f32 %v3862_v4, %v1975_v43  ;;  %v5293_v7 = vpop.f32.mrb[26].mxu1  ;;  %v4189_v4 = vpop.permute.xlu1 %4188 }
 0x338   : > { %v4006_v16 = vadd.f32 %v5358_v1, %v6857_v52  ;;  %v5360_v47 = vadd.f32 %v5293_v7, %v5123_v29  ;;  %v3865_v13 = vpop.f32.mrb[27].mxu1  ;;  %v4217_v28 = vsel %vm382_vm1, %v4063_v50, %v4181_v18 }
 0x339   : > { %v4214_v36 = vsel %vm382_vm1, %v4062_v15, %v4179_v60  ;;  %v4004_v24 = vadd.f32 %v5359_v12, %v6857_v52  ;;  %v5361_v45 = vadd.f32 %v3865_v13, %v1978_v19  ;;  %v4183_v19 = vpop.permute.xlu0 %4182 }
 0x33a   : > { %v4007_v42 = vadd.f32 %v5360_v47, %v6857_v52  ;;  %5320 = vmatprep.mubr.msk.bf16.mxu0 %vm4262_vm8, %v4214_v36  ;;  %v4038_v43 = vmax.f32 %v4006_v16, 0.0 }
 0x33b   : > { %v4005_v21 = vadd.f32 %v5361_v45, %v6857_v52  ;;  %5321 = vmatmul.mubr.msk.bf16.gmra.mrb[68].mxu0 %vm4262_vm8, %v4217_v28  ;;  %v4036_v39 = vmax.f32 %v4004_v24, 0.0 }
 0x33c   : > { %v4039_v54 = vmax.f32 %v4007_v42, 0.0 }
 0x33d   : > { %v4037_v29 = vmax.f32 %v4005_v21, 0.0  ;;  %v5296_v33 = vpop.f32.mrb[28].mxu1 }
 0x33e   : > { %v4065_v38 = vpack.c.bf16 %v4039_v54, %v4038_v43  ;;  %v5362_v2 = vadd.f32 %v5296_v33, %v6846_v56  ;;  %v3878_v5 = vpop.f32.mrb[29].mxu1  ;;  %v4193_v33 = vpop.permute.xlu1 %4192 }
 0x33f   : > { %v4064_v27 = vpack.c.bf16 %v4037_v29, %v4036_v39  ;;  %v5363_v14 = vadd.f32 %v3878_v5, %v6848_v26  ;;  %v5297_v37 = vpop.f32.mrb[30].mxu1 }
 0x340   : > { %v4010_v55 = vadd.f32 %v5362_v2, %v6857_v52  ;;  %v5364_v11 = vadd.f32 %v5297_v37, %v6850_v59  ;;  %v3881_v57 = vpop.f32.mrb[31].mxu1  ;;  %v4223_v56 = vsel %vm382_vm1, %v4065_v38, %v4185_v48 }
 0x341   : > { %v4008_v22 = vadd.f32 %v5363_v14, %v6857_v52  ;;  %v4220_v61 = vsel %vm382_vm1, %v4064_v27, %v4183_v19  ;;  %v5365_v60 = vadd.f32 %v3881_v57, %v6852_v3  ;;  %v4187_v3 = vpop.permute.xlu0 %4186 }
 0x342   : > { %v4011_v30 = vadd.f32 %v5364_v11, %v6857_v52  ;;  %5324 = vmatprep.mubr.msk.bf16.mxu0 %vm4262_vm8, %v4220_v61  ;;  %v4042_v6 = vmax.f32 %v4010_v55, 0.0 }
 0x343   : > { %v4009_v26 = vadd.f32 %v5365_v60, %v6857_v52  ;;  %5325 = vmatmul.mubr.msk.bf16.gmra.mrb[72].mxu0 %vm4262_vm8, %v4223_v56  ;;  %v4040_v59 = vmax.f32 %v4008_v22, 0.0 }
 0x344   : > { %v4043_v63 = vmax.f32 %v4011_v30, 0.0 }
 0x345   : > { %v4041_v9 = vmax.f32 %v4009_v26, 0.0  ;;  %v5300_v34 = vpop.f32.mrb[0].mxu1 }
 0x346   : > { %v4067_v10 = vpack.c.bf16 %v4043_v63, %v4042_v6  ;;  %v5366_v46 = vadd.f32 %v5300_v34, %v6814_v51  ;;  %v3894_v41 = vpop.f32.mrb[1].mxu1  ;;  %v4197_v6 = vpop.permute.xlu1 %4196 }
 0x347   : > { %v4066_v50 = vpack.c.bf16 %v4041_v9, %v4040_v59  ;;  %v5367_v1 = vadd.f32 %v3894_v41, %v6816_v62  ;;  %v5301_v15 = vpop.f32.mrb[2].mxu1 }
 0x348   : > { %v4014_v12 = vadd.f32 %v5366_v46, %v6857_v52  ;;  %v5368_v18 = vadd.f32 %v5301_v15, %v6818_v8  ;;  %v3897_v7 = vpop.f32.mrb[3].mxu1  ;;  %v4229_v51 = vsel %vm382_vm1, %v4067_v10, %v4189_v4 }
 0x349   : > { %v4012_v16 = vadd.f32 %v5367_v1, %v6857_v52  ;;  %v4226_v47 = vsel %vm382_vm1, %v4066_v50, %v4187_v3  ;;  %v5369_v13 = vadd.f32 %v3897_v7, %v6820_v44  ;;  %v4191_v44 = vpop.permute.xlu0 %4190 }
 0x34a   : > { %v4015_v36 = vadd.f32 %v5368_v18, %v6857_v52  ;;  %5328 = vmatprep.mubr.msk.bf16.mxu0 %vm4262_vm8, %v4226_v47  ;;  %v4046_v24 = vmax.f32 %v4014_v12, 0.0 }
 0x34b   : > { %v4013_v62 = vadd.f32 %v5369_v13, %v6857_v52  ;;  %5329 = vmatmul.mubr.msk.bf16.gmra.mrb[76].mxu0 %vm4262_vm8, %v4229_v51  ;;  %v4044_v8 = vmax.f32 %v4012_v16, 0.0  ;;  %v4201_v13 = vpop.permute.xlu1 %4200 }
 0x34c   : > { %v4047_v45 = vmax.f32 %v4015_v36, 0.0 }
 0x34d   : > { %v4045_v28 = vmax.f32 %v4013_v62, 0.0  ;;  %v5304_v42 = vpop.f32.mrb[4].mxu1 }
 0x34e   : > { %v4069_v21 = vpack.c.bf16 %v4047_v45, %v4046_v24  ;;  %v5370_v43 = vadd.f32 %v5304_v42, %v6822_v25  ;;  %v3910_v54 = vpop.f32.mrb[5].mxu1 }
 0x34f   : > { %v4068_v39 = vpack.c.bf16 %v4045_v28, %v4044_v8  ;;  %v5371_v29 = vadd.f32 %v3910_v54, %v6824_v0  ;;  %v5305_v38 = vpop.f32.mrb[6].mxu1 }
 0x350   : > { %v4018_v2 = vadd.f32 %v5370_v43, %v6857_v52  ;;  %v5372_v5 = vadd.f32 %v5305_v38, %v6826_v49  ;;  %v3913_v19 = vpop.f32.mrb[7].mxu1  ;;  %v4235_v25 = vsel %vm382_vm1, %v4069_v21, %v4193_v33 }
 0x351   : > { %v4016_v27 = vadd.f32 %v5371_v29, %v6857_v52  ;;  %v4232_v14 = vsel %vm382_vm1, %v4068_v39, %v4191_v44  ;;  %v5373_v48 = vadd.f32 %v3913_v19, %v6828_v53  ;;  %v4195_v53 = vpop.permute.xlu0 %4194 }
 0x352   : > { %v4019_v37 = vadd.f32 %v5372_v5, %v6857_v52  ;;  %5332 = vmatprep.mubr.msk.bf16.mxu0 %vm4262_vm8, %v4232_v14  ;;  %v4050_v55 = vmax.f32 %v4018_v2, 0.0 }
 0x353   : > { %v4017_v0 = vadd.f32 %v5373_v48, %v6857_v52  ;;  %5333 = vmatmul.mubr.msk.bf16.gmra.mrb[80].mxu0 %vm4262_vm8, %v4235_v25  ;;  %v4048_v49 = vmax.f32 %v4016_v27, 0.0 }
 0x354   : > { %v4051_v11 = vmax.f32 %v4019_v37, 0.0 }
 0x355   : > { %v4049_v57 = vmax.f32 %v4017_v0, 0.0  ;;  %v5308_v22 = vpop.f32.mrb[8].mxu1 }
 0x356   : > { %v4071_v61 = vpack.c.bf16 %v4051_v11, %v4050_v55  ;;  %v5374_v60 = vadd.f32 %v5308_v22, %v6830_v40  ;;  %v3926_v56 = vpop.f32.mrb[9].mxu1 }
 0x357   : > { %v4070_v30 = vpack.c.bf16 %v4049_v57, %v4048_v49  ;;  %v5375_v26 = vadd.f32 %v3926_v56, %v6832_v58  ;;  %v5309_v63 = vpop.f32.mrb[10].mxu1 }
 0x358   : > { %v4022_v59 = vadd.f32 %v5374_v60, %v6857_v52  ;;  %v5376_v9 = vadd.f32 %v5309_v63, %v6834_v32  ;;  %v3929_v34 = vpop.f32.mrb[11].mxu1  ;;  %v4241_v40 = vsel %vm382_vm1, %v4071_v61, %v4197_v6 }
 0x359   : > { %v4020_v10 = vadd.f32 %v5375_v26, %v6857_v52  ;;  %v4238_v46 = vsel %vm382_vm1, %v4070_v30, %v4195_v53  ;;  %v5377_v41 = vadd.f32 %v3929_v34, %v6836_v31  ;;  %v4199_v31 = vpop.permute.xlu0 %4198 }
 0x35a   : > { %v4023_v3 = vadd.f32 %v5376_v9, %v6857_v52  ;;  %5336 = vmatprep.mubr.msk.bf16.mxu0 %vm4262_vm8, %v4238_v46  ;;  %v4054_v50 = vmax.f32 %v4022_v59, 0.0 }
 0x35b   : > { %v4021_v58 = vadd.f32 %v5377_v41, %v6857_v52  ;;  %5337 = vmatmul.mubr.msk.bf16.gmra.mrb[84].mxu0 %vm4262_vm8, %v4241_v40  ;;  %v4052_v32 = vmax.f32 %v4020_v10, 0.0 }
 0x35c   : > { %v4055_v1 = vmax.f32 %v4023_v3, 0.0 }
 0x35d   : > { %v4053_v4 = vmax.f32 %v4021_v58, 0.0  ;;  %v5312_v15 = vpop.f32.mrb[12].mxu1  ;;  %v4203_v39 = vpop.permute.xlu0 %4202 }
 0x35e   : > { %v4073_v12 = vpack.c.bf16 %v4055_v1, %v4054_v50  ;;  %v5378_v18 = vadd.f32 %v5312_v15, %v6838_v23  ;;  %v3942_v7 = vpop.f32.mrb[13].mxu1 }
 0x35f   : > { %v4072_v16 = vpack.c.bf16 %v4053_v4, %v4052_v32  ;;  %v5379_v47 = vadd.f32 %v3942_v7, %v6840_v35  ;;  %v5313_v51 = vpop.f32.mrb[14].mxu1 }
 0x360   : > { %v4026_v36 = vadd.f32 %v5378_v18, %v6857_v52  ;;  %v5380_v62 = vadd.f32 %v5313_v51, %v6842_v17  ;;  %v3945_v24 = vpop.f32.mrb[15].mxu1  ;;  %v4247_v23 = vsel %vm382_vm1, %v4073_v12, %v4201_v13 }
 0x361   : > { %v4024_v45 = vadd.f32 %v5379_v47, %v6857_v52  ;;  %v4244_v8 = vsel %vm382_vm1, %v4072_v16, %v4199_v31  ;;  %v5381_v28 = vadd.f32 %v3945_v24, %v6844_v20  ;;  %v4205_v20 = vpop.permute.xlu1 %4204 }
 0x362   : > { %v4027_v42 = vadd.f32 %v5380_v62, %v6857_v52  ;;  %5340 = vmatprep.mubr.msk.bf16.mxu0 %vm4262_vm8, %v4244_v8  ;;  %v4058_v17 = vmax.f32 %v4026_v36, 0.0 }
 0x363   : > { %v4025_v35 = vadd.f32 %v5381_v28, %v6857_v52  ;;  %5341 = vmatmul.mubr.msk.bf16.gmra.mrb[88].mxu0 %vm4262_vm8, %v4247_v23  ;;  %v4056_v43 = vmax.f32 %v4024_v45, 0.0  ;;  %v6949_v52 = vld [vmem:[%s7112_s6] ss:$0 sm:$0xff] }
 0x364   : > { %v4059_v21 = vmax.f32 %v4027_v42, 0.0 }
 0x365   : > { %v4057_v54 = vmax.f32 %v4025_v35, 0.0 }
 0x366   : > { %v4075_v44 = vpack.c.bf16 %v4059_v21, %v4058_v17 }
 0x367   : > { %v4074_v29 = vpack.c.bf16 %v4057_v54, %v4056_v43 }
 0x368   : > { %v4253_v38 = vsel %vm382_vm1, %v4075_v44, %v4205_v20 }
 0x369   : > { %v4250_v33 = vsel %vm382_vm1, %v4074_v29, %v4203_v39 }
 0x36a   : > { %5344 = vmatprep.mubr.msk.bf16.mxu0 %vm4262_vm8, %v4250_v33 }
 0x36b   : > { %5345 = vmatmul.mubr.msk.bf16.gmra.mrb[92].mxu0 %vm4262_vm8, %v4253_v38 }
 0x406   : > { %v5318_v2 = vpop.f32.mrb[64].mxu0 }
 0x407   : > { %v4342_v5 = vadd.f32 %v5318_v2, %v6949_v52  ;;  %v4333_v19 = vpop.f32.mrb[65].mxu0 }
 0x408   : > { %v4334_v27 = vadd.f32 %v6949_v52, %v4333_v19  ;;  %v5319_v14 = vpop.f32.mrb[66].mxu0 }
 0x409   : > { %4463 = vst.msk [vmem:[%s6953_s10 + $0x10] sm:$0xff] %vm4460_vm9, %v4342_v5  ;;  %v4345_v48 = vadd.f32 %v5319_v14, %v6949_v52  ;;  %v4336_v25 = vpop.f32.mrb[67].mxu0 }
 0x40a   : > { %4461 = vst.msk [vmem:[%s6953_s10] sm:$0xff] %vm4460_vm9, %v4334_v27  ;;  %v4337_v37 = vadd.f32 %v6949_v52, %v4336_v25 }
 0x40b   : > { %4464 = vst.msk [vmem:[%s6953_s10 + $0x18] sm:$0xff] %vm4460_vm9, %v4345_v48 }
 0x40c   : > { %4462 = vst.msk [vmem:[%s6953_s10 + $0x8] sm:$0xff] %vm4460_vm9, %v4337_v37 }
 0x40e   : > { %v5322_v0 = vpop.f32.mrb[68].mxu0 }
 0x40f   : > { %v4358_v55 = vadd.f32 %v5322_v0, %v6949_v52  ;;  %v4349_v11 = vpop.f32.mrb[69].mxu0 }
 0x410   : > { %v4350_v49 = vadd.f32 %v6949_v52, %v4349_v11  ;;  %v5323_v57 = vpop.f32.mrb[70].mxu0 }
 0x411   : > { %4467 = vst.msk [vmem:[%s6953_s10 + $0x30] sm:$0xff] %vm4460_vm9, %v4358_v55  ;;  %v4361_v22 = vadd.f32 %v5323_v57, %v6949_v52  ;;  %v4352_v61 = vpop.f32.mrb[71].mxu0 }
 0x412   : > { %4465 = vst.msk [vmem:[%s6953_s10 + $0x20] sm:$0xff] %vm4460_vm9, %v4350_v49  ;;  %v4353_v60 = vadd.f32 %v6949_v52, %v4352_v61 }
 0x413   : > { %4468 = vst.msk [vmem:[%s6953_s10 + $0x38] sm:$0xff] %vm4460_vm9, %v4361_v22 }
 0x414   : > { %4466 = vst.msk [vmem:[%s6953_s10 + $0x28] sm:$0xff] %vm4460_vm9, %v4353_v60 }
 0x416   : > { %v5326_v56 = vpop.f32.mrb[72].mxu0 }
 0x417   : > { %v4374_v53 = vadd.f32 %v5326_v56, %v6949_v52  ;;  %v4365_v30 = vpop.f32.mrb[73].mxu0 }
 0x418   : > { %v4366_v26 = vadd.f32 %v6949_v52, %v4365_v30  ;;  %v5327_v6 = vpop.f32.mrb[74].mxu0 }
 0x419   : > { %4471 = vst.msk [vmem:[%s6953_s10 + $0x50] sm:$0xff] %vm4460_vm9, %v4374_v53  ;;  %v4377_v63 = vadd.f32 %v5327_v6, %v6949_v52  ;;  %v4368_v59 = vpop.f32.mrb[75].mxu0 }
 0x41a   : > { %4469 = vst.msk [vmem:[%s6953_s10 + $0x40] sm:$0xff] %vm4460_vm9, %v4366_v26  ;;  %v4369_v9 = vadd.f32 %v6949_v52, %v4368_v59 }
 0x41b   : > { %4472 = vst.msk [vmem:[%s6953_s10 + $0x58] sm:$0xff] %vm4460_vm9, %v4377_v63 }
 0x41c   : > { %4470 = vst.msk [vmem:[%s6953_s10 + $0x48] sm:$0xff] %vm4460_vm9, %v4369_v9 }
 0x41e   : > { %v5330_v34 = vpop.f32.mrb[76].mxu0 }
 0x41f   : > { %v4390_v10 = vadd.f32 %v5330_v34, %v6949_v52  ;;  %v4381_v46 = vpop.f32.mrb[77].mxu0 }
 0x420   : > { %v4382_v41 = vadd.f32 %v6949_v52, %v4381_v46  ;;  %v5331_v40 = vpop.f32.mrb[78].mxu0 }
 0x421   : > { %4475 = vst.msk [vmem:[%s6953_s10 + $0x70] sm:$0xff] %vm4460_vm9, %v4390_v10  ;;  %v4393_v3 = vadd.f32 %v5331_v40, %v6949_v52  ;;  %v4384_v58 = vpop.f32.mrb[79].mxu0 }
 0x422   : > { %4473 = vst.msk [vmem:[%s6953_s10 + $0x60] sm:$0xff] %vm4460_vm9, %v4382_v41  ;;  %v4385_v50 = vadd.f32 %v6949_v52, %v4384_v58 }
 0x423   : > { %4476 = vst.msk [vmem:[%s6953_s10 + $0x78] sm:$0xff] %vm4460_vm9, %v4393_v3 }
 0x424   : > { %4474 = vst.msk [vmem:[%s6953_s10 + $0x68] sm:$0xff] %vm4460_vm9, %v4385_v50 }
 0x426   : > { %v5334_v1 = vpop.f32.mrb[80].mxu0 }
 0x427   : > { %v4406_v32 = vadd.f32 %v5334_v1, %v6949_v52  ;;  %v4397_v4 = vpop.f32.mrb[81].mxu0 }
 0x428   : > { %v4398_v15 = vadd.f32 %v6949_v52, %v4397_v4  ;;  %v5335_v12 = vpop.f32.mrb[82].mxu0 }
 0x429   : > { %4479 = vst.msk [vmem:[%s6953_s10 + $0x90] sm:$0xff] %vm4460_vm9, %v4406_v32  ;;  %v4409_v18 = vadd.f32 %v5335_v12, %v6949_v52  ;;  %v4400_v7 = vpop.f32.mrb[83].mxu0 }
 0x42a   : > { %4477 = vst.msk [vmem:[%s6953_s10 + $0x80] sm:$0xff] %vm4460_vm9, %v4398_v15  ;;  %v4401_v31 = vadd.f32 %v6949_v52, %v4400_v7 }
 0x42b   : > { %4480 = vst.msk [vmem:[%s6953_s10 + $0x98] sm:$0xff] %vm4460_vm9, %v4409_v18 }
 0x42c   : > { %4478 = vst.msk [vmem:[%s6953_s10 + $0x88] sm:$0xff] %vm4460_vm9, %v4401_v31 }
 0x42e   : > { %v5338_v16 = vpop.f32.mrb[84].mxu0 }
 0x42f   : > { %v4422_v47 = vadd.f32 %v5338_v16, %v6949_v52  ;;  %v4413_v13 = vpop.f32.mrb[85].mxu0 }
 0x430   : > { %v4414_v51 = vadd.f32 %v6949_v52, %v4413_v13  ;;  %v5339_v36 = vpop.f32.mrb[86].mxu0 }
 0x431   : > { %4483 = vst.msk [vmem:[%s6953_s10 + $0xb0] sm:$0xff] %vm4460_vm9, %v4422_v47  ;;  %v4425_v62 = vadd.f32 %v5339_v36, %v6949_v52  ;;  %v4416_v24 = vpop.f32.mrb[87].mxu0 }
 0x432   : > { %4481 = vst.msk [vmem:[%s6953_s10 + $0xa0] sm:$0xff] %vm4460_vm9, %v4414_v51  ;;  %v4417_v45 = vadd.f32 %v6949_v52, %v4416_v24 }
 0x433   : > { %4484 = vst.msk [vmem:[%s6953_s10 + $0xb8] sm:$0xff] %vm4460_vm9, %v4425_v62 }
 0x434   : > { %4482 = vst.msk [vmem:[%s6953_s10 + $0xa8] sm:$0xff] %vm4460_vm9, %v4417_v45 }
 0x436   : > { %v5342_v8 = vpop.f32.mrb[88].mxu0 }
 0x437   : > { %v4438_v28 = vadd.f32 %v5342_v8, %v6949_v52  ;;  %v4429_v23 = vpop.f32.mrb[89].mxu0 }
 0x438   : > { %v4430_v42 = vadd.f32 %v6949_v52, %v4429_v23  ;;  %v5343_v35 = vpop.f32.mrb[90].mxu0 }
 0x439   : > { %4487 = vst.msk [vmem:[%s6953_s10 + $0xd0] sm:$0xff] %vm4460_vm9, %v4438_v28  ;;  %v4441_v17 = vadd.f32 %v5343_v35, %v6949_v52  ;;  %v4432_v21 = vpop.f32.mrb[91].mxu0 }
 0x43a   : > { %4485 = vst.msk [vmem:[%s6953_s10 + $0xc0] sm:$0xff] %vm4460_vm9, %v4430_v42  ;;  %v4433_v43 = vadd.f32 %v6949_v52, %v4432_v21 }
 0x43b   : > { %4488 = vst.msk [vmem:[%s6953_s10 + $0xd8] sm:$0xff] %vm4460_vm9, %v4441_v17 }
 0x43c   : > { %4486 = vst.msk [vmem:[%s6953_s10 + $0xc8] sm:$0xff] %vm4460_vm9, %v4433_v43 }
 0x43e   : > { %v5346_v54 = vpop.f32.mrb[92].mxu0 }
 0x43f   : > { %v4454_v44 = vadd.f32 %v5346_v54, %v6949_v52  ;;  %v4445_v39 = vpop.f32.mrb[93].mxu0 }
 0x440   : > { %v4446_v29 = vadd.f32 %v6949_v52, %v4445_v39  ;;  %v5347_v20 = vpop.f32.mrb[94].mxu0 }
 0x441   : > { %4491 = vst.msk [vmem:[%s6953_s10 + $0xf0] sm:$0xff] %vm4460_vm9, %v4454_v44  ;;  %v4457_v33 = vadd.f32 %v5347_v20, %v6949_v52  ;;  %v4448_v38 = vpop.f32.mrb[95].mxu0 }
 0x442   : > { %4489 = vst.msk [vmem:[%s6953_s10 + $0xe0] sm:$0xff] %vm4460_vm9, %v4446_v29  ;;  %v4449_v2 = vadd.f32 %v6949_v52, %v4448_v38 }
 0x443   : > { %4492 = vst.msk [vmem:[%s6953_s10 + $0xf8] sm:$0xff] %vm4460_vm9, %v4457_v33 }
 0x444   : > { %4490 = vst.msk [vmem:[%s6953_s10 + $0xe8] sm:$0xff] %vm4460_vm9, %v4449_v2 }
 0x445   : > { %5691 = shalt.err (!%p5688_p5)
}
 0x446   : > { %s5692_s22 = scalar_lea.hbm %s7047_s18, 4096  ;;  %s5696_s10 = scalar_lea.hbm %s7113_s7, 8192 }
 0x447   : > { %p5693_p6 = scmp.ne.s32.totalorder %s7047_s18, %s5692_s22  ;;  %p5697_p10 = scmp.lt.u32.totalorder %s7047_s18, %s7113_s7 }
 0x448   : > { %p5698_p11 = scmp.lt.u32.totalorder %s5696_s10, %s5692_s22  ;;  %p5700_p13 = scmp.lt.u32.totalorder %s5692_s22, %s7047_s18 }
 0x449   : > { %p5694_p7 = pnand %p5693_p6, %p5843_p4 }
 0x44a   : > { %p5699_p12 = por %p5698_p11, %p5697_p10 }
 0x44b   : > { %p5695_p9 = pneg %p5694_p7 }
 0x44c   : > { %p5701_p0 = por %p5700_p13, %p5699_p12 }
 0x44e   : > { %p5702_p1 = pnand %p5701_p0, %p5695_p9 }
 0x450   : > { %5705 = shalt.err (!%p5702_p1)
}
 0x451   : > { %s5761_s17 = smov 128   ;;  %s5762_s19 = smov 8  }
 0x452   : > { %5618 = dma.vmem_to_hbm [thread:$0]  (%p5843_p4), %s7049_s15, 4096, %s7047_s18, %s7060_s27, %s5761_s17, %s5761_s17, %s5762_s19  }
 0x453 PF: > { %p5624_p2 = scmp.ge.s32.totalorder %s5756_s29, 2  ;;  %s4525_s21 = sand.u32 1, %s5736_s24  }
 0x454   : > { %s4526_s20 = scalar_lea.sflag [#allocation4], %s4525_s21 }
 0x455   : > { %p5621_p3 = pnand %p5624_p2, %p5850_p8 }
 0x457   : > { %5731 = dma.done.wait (!%p5621_p3), %s4526_s20, 4096  }
 0x458   : > { %5733 = vsyncadd (!%p5621_p3), %s4526_s20, 4294963200  ;;  %s20_s29 = sadd.s32 1, %s5756_s29   ;;  %s7127_s24 = smov %s5740_s25 }
 0x459   : > { %p17_p5 = scmp.ge.s32.totalorder %s20_s29, 4   ;;  %s7128_s25 = smov %s5744_s26 }
 0x45a   : > { %s7129_s26 = smov %s5856_s14  ;;  %s7130_s27 = smov %s5752_s28 }
 0x45b   : > { %s7131_s28 = smov %s7133_s9  ;;  %19 = sbr.rel (!%p17_p5) target bundleno = 4 (0x4), region = 95 }
 0x462   :  { %4531 = vsyncpa [#allocation4], 1 }
 0x463   :  { %4533 = vsyncpa [#allocation4 + $0x1], 1 }

</bundles_post_ra>
